<compile_context>
chip_gen: v5e
topology: v5e:2x2
jax: 0.10.0
libtpu: 0.0.40
codegen_flags: <defaults>
</compile_context>

<pallas_src>
import functools

import jax
import jax.numpy as jnp
from jax.experimental import pallas as pl
from jax.experimental.pallas import tpu as pltpu

LANE = 128
SUBLANE = 8


def _round_up(x, m):
    return (x + m - 1) // m * m


def _pick_vmem_limit():
    # v5e/v6e: 128 MiB physical -> ~96 MiB scoped; v7x: 64 MiB physical -> cap lower.
    try:
        cap = int(pltpu.get_tpu_info().vmem_capacity_bytes)
        return int(min(max(cap * 3 // 4, 32 * 1024 * 1024), 96 * 1024 * 1024))
    except Exception:
        return 48 * 1024 * 1024


VMEM_LIMIT = _pick_vmem_limit()


def _ln(x, g, b, eps):
    mu = jnp.mean(x, axis=-1, keepdims=True)
    var = jnp.mean(jnp.square(x - mu), axis=-1, keepdims=True)
    return (x - mu) * jax.lax.rsqrt(var + eps) * g + b


# ----------------------------------------------------------------------------
# Embedding LayerNorm (the only standalone LN; per-layer LNs are fused)
# ----------------------------------------------------------------------------

def _layernorm_kernel(x_ref, g_ref, b_ref, o_ref, *, eps):
    o_ref[...] = _ln(x_ref[...], g_ref[...], b_ref[...], eps).astype(o_ref.dtype)


def layernorm(x2d, gamma, beta, eps=1e-5, tile_m=512):
    M, D = x2d.shape
    tm = M if M <= tile_m else tile_m
    assert M % tm == 0
    return pl.pallas_call(
        functools.partial(_layernorm_kernel, eps=eps),
        out_shape=jax.ShapeDtypeStruct((M, D), jnp.float32),
        grid=(M // tm,),
        in_specs=[
            pl.BlockSpec((tm, D), lambda i: (i, 0)),
            pl.BlockSpec((1, D), lambda i: (0, 0)),
            pl.BlockSpec((1, D), lambda i: (0, 0)),
        ],
        out_specs=pl.BlockSpec((tm, D), lambda i: (i, 0)),
        compiler_params=pltpu.CompilerParams(
            dimension_semantics=("parallel",),
            vmem_limit_bytes=VMEM_LIMIT),
    )(x2d, gamma, beta)


# ----------------------------------------------------------------------------
# Fully-fused decoder layer:
#   QKV proj -> all-head causal attention -> concat heads -> single out-proj
#   -> residual -> LN1 -> FFN (gelu) -> residual -> LN2
# One pallas_call per layer, one grid step per batch element.
# ----------------------------------------------------------------------------

def _decoder_layer_kernel(h_ref, wqkv_ref, bqkv_ref, wo_ref, bo_ref,
                          l1g_ref, l1b_ref, w1_ref, b1_ref, w2_ref, b2_ref,
                          l2g_ref, l2b_ref, o_ref, *, n_heads, eps):
    S, D = h_ref.shape
    Dh = D // n_heads
    scale = 1.0 / (Dh ** 0.5)

    h = h_ref[...]                                     # [S, D] f32 (residual)
    h_bf = h.astype(jnp.bfloat16)

    # Fused QKV projection: one [S,D]@[D,3D] MXU pass, no HBM round trip.
    qkv = jnp.dot(h_bf, wqkv_ref[...],
                  preferred_element_type=jnp.float32) + bqkv_ref[...]   # [S, 3D]
    q = qkv[:, :D] * scale
    k = qkv[:, D:2 * D]
    v = qkv[:, 2 * D:]

    row = jax.lax.broadcasted_iota(jnp.int32, (S, S), 0)
    col = jax.lax.broadcasted_iota(jnp.int32, (S, S), 1)
    causal = col <= row

    # Per-head attention; contexts are concatenated so the output projection is a
    # single K=D matmul (not n_heads K=Dh matmuls).
    # TODO(synk): for n_heads > 4 switch to lax.fori_loop(unroll=True) + an [S,D]
    # accumulator to bound vreg live ranges.
    ctx_heads = []
    for hd in range(n_heads):
        sl = slice(hd * Dh, (hd + 1) * Dh)
        qh = q[:, sl].astype(jnp.bfloat16)
        kh = k[:, sl].astype(jnp.bfloat16)
        vh = v[:, sl].astype(jnp.bfloat16)
        s = jax.lax.dot_general(qh, kh, (((1,), (1,)), ((), ())),
                                preferred_element_type=jnp.float32)      # [S, S]
        s = jnp.where(causal, s, -1e30)
        s = s - jnp.max(s, axis=-1, keepdims=True)
        p = jnp.exp(s)
        p = p * pl.reciprocal(jnp.sum(p, axis=-1, keepdims=True), approx=True)
        ctx_heads.append(jnp.dot(p.astype(jnp.bfloat16), vh,
                                 preferred_element_type=jnp.float32))    # [S, Dh]
    ctx = jnp.concatenate(ctx_heads, axis=-1).astype(jnp.bfloat16)       # [S, D]

    o = jnp.dot(ctx, wo_ref[...], preferred_element_type=jnp.float32) + bo_ref[...]
    h1 = _ln(h + o, l1g_ref[...], l1b_ref[...], eps)

    f = jnp.dot(h1.astype(jnp.bfloat16), w1_ref[...],
                preferred_element_type=jnp.float32) + b1_ref[...]
    f = jax.nn.gelu(f)  # TODO(synk): HF BART uses exact erf GELU (tanh approx here)
    f = jnp.dot(f.astype(jnp.bfloat16), w2_ref[...],
                preferred_element_type=jnp.float32) + b2_ref[...]
    h2 = _ln(h1 + f, l2g_ref[...], l2b_ref[...], eps)

    o_ref[...] = h2.astype(o_ref.dtype)


def decoder_layer(h, layer, *, n_heads, eps=1e-5):
    B, S, D = h.shape
    three_d = layer["wqkv"].shape[1]
    F = layer["w1"].shape[1]

    def w_spec(r, c):
        return pl.BlockSpec((r, c), lambda b: (0, 0))

    return pl.pallas_call(
        functools.partial(_decoder_layer_kernel, n_heads=n_heads, eps=eps),
        out_shape=jax.ShapeDtypeStruct((B, S, D), jnp.float32),
        grid=(B,),
        in_specs=[
            pl.BlockSpec((None, S, D), lambda b: (b, 0, 0)),   # hidden / residual
            w_spec(D, three_d), w_spec(1, three_d),            # wqkv, bqkv
            w_spec(D, D), w_spec(1, D),                        # wo, bo
            w_spec(1, D), w_spec(1, D),                        # ln1 gamma, beta
            w_spec(D, F), w_spec(1, F),                        # w1, b1
            w_spec(F, D), w_spec(1, D),                        # w2, b2
            w_spec(1, D), w_spec(1, D),                        # ln2 gamma, beta
        ],
        out_specs=pl.BlockSpec((None, S, D), lambda b: (b, 0, 0)),
        compiler_params=pltpu.CompilerParams(
            dimension_semantics=("parallel",),
            vmem_limit_bytes=VMEM_LIMIT),
    )(h, layer["wqkv"], layer["bqkv"], layer["wo"], layer["bo"],
      layer["ln1_g"], layer["ln1_b"], layer["w1"], layer["b1"],
      layer["w2"], layer["b2"], layer["ln2_g"], layer["ln2_b"])


# ----------------------------------------------------------------------------
# Fused scatter_mean (over sequence) + shared projection + head/tail shift
# + relation classifier + masked log_softmax.  Everything stays in VMEM; the
# only HBM output is the [B, Gpad, Cpad] log-prob slab (lane/sublane dense).
# ----------------------------------------------------------------------------

def _scatter_proj_cls_kernel(h_ref, pos_ref, pw_ref, pb_ref, wh_ref, wt_ref, cb_ref,
                             o_ref, *, num_classes):
    h = h_ref[...]                      # [S, D] f32
    pos = pos_ref[...]                  # [1, S] int32
    S = h.shape[0]
    Gp, Cp = o_ref.shape

    # scatter_mean via one-hot matmul (bf16 one-hot is exact; f32 accumulate).
    gids = jax.lax.broadcasted_iota(jnp.int32, (Gp, S), 0)
    onehot = (gids == pos).astype(jnp.bfloat16)                          # [Gp, S]
    sums = jnp.dot(onehot, h.astype(jnp.bfloat16),
                   preferred_element_type=jnp.float32)                   # [Gp, D]
    counts = jnp.sum(onehot.astype(jnp.float32), axis=-1, keepdims=True)
    mean = sums / jnp.maximum(counts, 1.0)

    # Shared projection (applied once; head/tail are views of the same groups).
    proj = jnp.dot(mean.astype(jnp.bfloat16), pw_ref[...],
                   preferred_element_type=jnp.float32) + pb_ref[...]     # [Gp, E]

    # head[i] = proj[i], tail[i] = proj[i+1]; the shift stays in VMEM via a tiny
    # [Gp,Gp] shift-matrix matmul (no HBM copies of overlapping slices).
    head_bf = proj.astype(jnp.bfloat16)
    gi = jax.lax.broadcasted_iota(jnp.int32, (Gp, Gp), 0)
    gj = jax.lax.broadcasted_iota(jnp.int32, (Gp, Gp), 1)
    shift = (gj == gi + 1).astype(jnp.bfloat16)                          # [Gp, Gp]
    tail_bf = jnp.dot(shift, head_bf,
                      preferred_element_type=jnp.float32).astype(jnp.bfloat16)

    # TODO(synk): exact ClassificationHead definition is not shown in the reference;
    # assumed cat([head, tail]) -> Linear(2E, C) -> log_softmax, realized as split
    # weights (head@W_h + tail@W_t) with the class axis zero-padded to 128 lanes.
    logits = (jnp.dot(head_bf, wh_ref[...], preferred_element_type=jnp.float32)
              + jnp.dot(tail_bf, wt_ref[...], preferred_element_type=jnp.float32)
              + cb_ref[...])                                             # [Gp, Cp]
    colid = jax.lax.broadcasted_iota(jnp.int32, (Gp, Cp), 1)
    logits = jnp.where(colid < num_classes, logits, -1e30)
    z = logits - jnp.max(logits, axis=-1, keepdims=True)
    lse = jnp.log(jnp.sum(jnp.exp(z), axis=-1, keepdims=True))
    o_ref[...] = (z - lse).astype(o_ref.dtype)


def scatter_proj_classify(hidden, discourse_pos, pw_bf16, pb_row,
                          wh_bf16, wt_bf16, cb_row, *, num_groups, num_classes):
    B, S, D = hidden.shape
    E = pw_bf16.shape[1]
    Cp = wh_bf16.shape[1]
    g_pad = _round_up(max(num_groups, 2), SUBLANE)      # sublane-dense stores
    pos3 = discourse_pos.astype(jnp.int32).reshape(B, 1, S)
    out = pl.pallas_call(
        functools.partial(_scatter_proj_cls_kernel, num_classes=num_classes),
        out_shape=jax.ShapeDtypeStruct((B, g_pad, Cp), jnp.float32),
        grid=(B,),
        in_specs=[
            pl.BlockSpec((None, S, D), lambda b: (b, 0, 0)),
            pl.BlockSpec((None, 1, S), lambda b: (b, 0, 0)),
            pl.BlockSpec((D, E), lambda b: (0, 0)),
            pl.BlockSpec((1, E), lambda b: (0, 0)),
            pl.BlockSpec((E, Cp), lambda b: (0, 0)),
            pl.BlockSpec((E, Cp), lambda b: (0, 0)),
            pl.BlockSpec((1, Cp), lambda b: (0, 0)),
        ],
        out_specs=pl.BlockSpec((None, g_pad, Cp), lambda b: (b, 0, 0)),
        compiler_params=pltpu.CompilerParams(
            dimension_semantics=("parallel",),
            vmem_limit_bytes=VMEM_LIMIT),
    )(hidden, pos3, pw_bf16, pb_row, wh_bf16, wt_bf16, cb_row)
    return out[:, :num_groups - 1, :num_classes]


# ----------------------------------------------------------------------------
# Parameter init (synthetic BART-style decoder) + forward orchestration
# ----------------------------------------------------------------------------

def init_params(key, vocab, max_pos, d_model, d_ff, n_layers, latent, class_size):
    class_pad = _round_up(class_size, LANE)
    keys = jax.random.split(key, 8 + 4 * n_layers)
    it = iter(keys)

    def nrm(shape, std=0.02, dtype=jnp.float32):
        return (jax.random.normal(next(it), shape, jnp.float32) * std).astype(dtype)

    params = {
        "tok_emb": nrm((vocab, d_model)),
        "pos_emb": nrm((max_pos, d_model)),
        "emb_ln_g": jnp.ones((1, d_model), jnp.float32),
        "emb_ln_b": jnp.zeros((1, d_model), jnp.float32),
        "layers": [],
        "proj_w": nrm((d_model, latent), dtype=jnp.bfloat16),
        "proj_b": jnp.zeros((1, latent), jnp.float32),
        "cls_w_head": jnp.pad(nrm((latent, class_size)),
                              ((0, 0), (0, class_pad - class_size))).astype(jnp.bfloat16),
        "cls_w_tail": jnp.pad(nrm((latent, class_size)),
                              ((0, 0), (0, class_pad - class_size))).astype(jnp.bfloat16),
        "cls_b": jnp.zeros((1, class_pad), jnp.float32),
    }
    for _ in range(n_layers):
        params["layers"].append({
            "wqkv": nrm((d_model, 3 * d_model), dtype=jnp.bfloat16),
            "bqkv": jnp.zeros((1, 3 * d_model), jnp.float32),
            "wo": nrm((d_model, d_model), dtype=jnp.bfloat16),
            "bo": jnp.zeros((1, d_model), jnp.float32),
            "ln1_g": jnp.ones((1, d_model), jnp.float32),
            "ln1_b": jnp.zeros((1, d_model), jnp.float32),
            "w1": nrm((d_model, d_ff), dtype=jnp.bfloat16),
            "b1": jnp.zeros((1, d_ff), jnp.float32),
            "w2": nrm((d_ff, d_model), dtype=jnp.bfloat16),
            "b2": jnp.zeros((1, d_model), jnp.float32),
            "ln2_g": jnp.ones((1, d_model), jnp.float32),
            "ln2_b": jnp.zeros((1, d_model), jnp.float32),
        })
    return params


def discriminator_forward(params, input_ids, discourse_pos, *, n_heads, num_groups,
                          class_size):
    B, S = input_ids.shape
    D = params["tok_emb"].shape[1]

    # --- frozen BART-style decoder used as encoder ------------------------------
    # TODO(synk): real facebook/bart-base learned positions use an offset of +2.
    h = params["tok_emb"][input_ids] + params["pos_emb"][jnp.arange(S)][None]
    h = layernorm(h.reshape(B * S, D), params["emb_ln_g"], params["emb_ln_b"])
    h = h.reshape(B, S, D)

    for layer in params["layers"]:
        h = decoder_layer(h, layer, n_heads=n_heads)    # one fused pallas_call/layer

    # --- scatter_mean + shared proj + head/tail shift + classifier + log_softmax --
    return scatter_proj_classify(
        h, discourse_pos,
        params["proj_w"], params["proj_b"],
        params["cls_w_head"], params["cls_w_tail"], params["cls_b"],
        num_groups=num_groups, num_classes=class_size)          # [B, G-1, C]


# ----------------------------------------------------------------------------
# Entry point
# ----------------------------------------------------------------------------

if __name__ == "__main__":
    B, S = 2, 8
    vocab = 100
    d_model, n_heads, d_ff, n_layers = 128, 4, 256, 2   # lane-dense toy BART config
    latent = 128            # stands in for latent_hidden_size=256 (kept small & lane-dense)
    class_size = 2
    num_groups = 4          # max discourse index + 1

    key = jax.random.PRNGKey(0)
    pkey, ikey = jax.random.split(key)

    params = init_params(pkey, vocab, S, d_model, d_ff, n_layers, latent, class_size)
    input_ids = jax.random.randint(ikey, (B, S), 0, vocab, dtype=jnp.int32)
    discourse_pos = jnp.array(
        [[0, 0, 1, 1, 2, 2, 3, 3],
         [0, 1, 1, 2, 2, 3, 3, 3]], dtype=jnp.int32)

    fwd = jax.jit(functools.partial(
        discriminator_forward, n_heads=n_heads, num_groups=num_groups,
        class_size=class_size))
    out = fwd(params, input_ids, discourse_pos)
    jax.block_until_ready(out)

    assert out.shape == (B, num_groups - 1, class_size)
    assert bool(jnp.all(jnp.isfinite(out)))
    print("KERNEL_OK")
</pallas_src>

<mosaic_0001>
module attributes {stable_mosaic.version = 11 : i64} {
  func.func @_layernorm_kernel(%arg0: i32, %arg1: memref<16x128xf32, #tpu.memory_space<vmem>>, %arg2: memref<1x128xf32, #tpu.memory_space<vmem>>, %arg3: memref<1x128xf32, #tpu.memory_space<vmem>>, %arg4: memref<16x128xf32, #tpu.memory_space<vmem>>) attributes {dimension_semantics = [#tpu.dimension_semantics<parallel>], iteration_bounds = array<i64: 1>, scalar_prefetch = 0 : i64, scratch_operands = 0 : i64, tpu.core_type = #tpu.core_type<tc>, window_params = [{transform_indices = @transform_0, window_bounds = array<i64: 16, 128>}, {pipeline_mode = #tpu.pipeline_mode<synchronous>, transform_indices = @transform_1, window_bounds = array<i64: 1, 128>}, {pipeline_mode = #tpu.pipeline_mode<synchronous>, transform_indices = @transform_2, window_bounds = array<i64: 1, 128>}, {transform_indices = @transform_3, window_bounds = array<i64: 16, 128>}]} {
    %c0 = arith.constant 0 : index
    %c0_0 = arith.constant 0 : index
    %0 = vector.load %arg1[%c0, %c0_0] : memref<16x128xf32, #tpu.memory_space<vmem>>, vector<16x128xf32>
    %c0_1 = arith.constant 0 : index
    %c0_2 = arith.constant 0 : index
    %1 = vector.load %arg2[%c0_1, %c0_2] : memref<1x128xf32, #tpu.memory_space<vmem>>, vector<1x128xf32>
    %c0_3 = arith.constant 0 : index
    %c0_4 = arith.constant 0 : index
    %2 = vector.load %arg3[%c0_3, %c0_4] : memref<1x128xf32, #tpu.memory_space<vmem>>, vector<1x128xf32>
    %cst = arith.constant dense<0.000000e+00> : vector<16xf32>
    %3 = vector.multi_reduction <add>, %0, %cst [1] : vector<16x128xf32> to vector<16xf32>
    %4 = vector.shape_cast %3 : vector<16xf32> to vector<16x1xf32>
    %cst_5 = arith.constant 1.280000e+02 : f32
    %5 = vector.broadcast %cst_5 : f32 to vector<16x1xf32>
    %6 = arith.divf %4, %5 : vector<16x1xf32>
    %7 = vector.broadcast %6 : vector<16x1xf32> to vector<16x128xf32>
    %8 = arith.subf %0, %7 : vector<16x128xf32>
    %9 = arith.mulf %8, %8 : vector<16x128xf32>
    %cst_6 = arith.constant dense<0.000000e+00> : vector<16xf32>
    %10 = vector.multi_reduction <add>, %9, %cst_6 [1] : vector<16x128xf32> to vector<16xf32>
    %11 = vector.shape_cast %10 : vector<16xf32> to vector<16x1xf32>
    %cst_7 = arith.constant 1.280000e+02 : f32
    %12 = vector.broadcast %cst_7 : f32 to vector<16x1xf32>
    %13 = arith.divf %11, %12 : vector<16x1xf32>
    %14 = vector.broadcast %6 : vector<16x1xf32> to vector<16x128xf32>
    %15 = arith.subf %0, %14 : vector<16x128xf32>
    %cst_8 = arith.constant 9.99999974E-6 : f32
    %16 = vector.broadcast %cst_8 : f32 to vector<16x1xf32>
    %17 = arith.addf %13, %16 : vector<16x1xf32>
    %18 = math.rsqrt %17 : vector<16x1xf32>
    %19 = vector.broadcast %18 : vector<16x1xf32> to vector<16x128xf32>
    %20 = arith.mulf %15, %19 : vector<16x128xf32>
    %21 = vector.broadcast %1 : vector<1x128xf32> to vector<16x128xf32>
    %22 = arith.mulf %20, %21 : vector<16x128xf32>
    %23 = vector.broadcast %2 : vector<1x128xf32> to vector<16x128xf32>
    %24 = arith.addf %22, %23 : vector<16x128xf32>
    %c0_9 = arith.constant 0 : index
    %c0_10 = arith.constant 0 : index
    %25 = vector.load %arg4[%c0_9, %c0_10] : memref<16x128xf32, #tpu.memory_space<vmem>>, vector<16x128xf32>
    tpu.vector_store %arg4[%c0_9, %c0_10], %24 {strides = array<i32>} : memref<16x128xf32, #tpu.memory_space<vmem>>, vector<16x128xf32>,
    return
  }
  func.func @transform_0(%arg0: i32) -> (i32, i32) {
    %c0_i32 = arith.constant 0 : i32
    %c0_i32_0 = arith.constant 0 : i32
    return %arg0, %c0_i32 : i32, i32
  }
  func.func @transform_1(%arg0: i32) -> (i32, i32) {
    %c0_i32 = arith.constant 0 : i32
    %c0_i32_0 = arith.constant 0 : i32
    %c0_i32_1 = arith.constant 0 : i32
    return %c0_i32, %c0_i32_0 : i32, i32
  }
  func.func @transform_2(%arg0: i32) -> (i32, i32) {
    %c0_i32 = arith.constant 0 : i32
    %c0_i32_0 = arith.constant 0 : i32
    %c0_i32_1 = arith.constant 0 : i32
    return %c0_i32, %c0_i32_0 : i32, i32
  }
  func.func @transform_3(%arg0: i32) -> (i32, i32) {
    %c0_i32 = arith.constant 0 : i32
    %c0_i32_0 = arith.constant 0 : i32
    return %arg0, %c0_i32 : i32, i32
  }
}

module attributes {stable_mosaic.version = 11 : i64} {
  func.func @_decoder_layer_kernel(%arg0: i32, %arg1: memref<1x8x128xf32, #tpu.memory_space<vmem>>, %arg2: memref<128x384xbf16, #tpu.memory_space<vmem>>, %arg3: memref<1x384xf32, #tpu.memory_space<vmem>>, %arg4: memref<128x128xbf16, #tpu.memory_space<vmem>>, %arg5: memref<1x128xf32, #tpu.memory_space<vmem>>, %arg6: memref<1x128xf32, #tpu.memory_space<vmem>>, %arg7: memref<1x128xf32, #tpu.memory_space<vmem>>, %arg8: memref<128x256xbf16, #tpu.memory_space<vmem>>, %arg9: memref<1x256xf32, #tpu.memory_space<vmem>>, %arg10: memref<256x128xbf16, #tpu.memory_space<vmem>>, %arg11: memref<1x128xf32, #tpu.memory_space<vmem>>, %arg12: memref<1x128xf32, #tpu.memory_space<vmem>>, %arg13: memref<1x128xf32, #tpu.memory_space<vmem>>, %arg14: memref<1x8x128xf32, #tpu.memory_space<vmem>>) attributes {dimension_semantics = [#tpu.dimension_semantics<parallel>], iteration_bounds = array<i64: 2>, scalar_prefetch = 0 : i64, scratch_operands = 0 : i64, tpu.core_type = #tpu.core_type<tc>, window_params = [{transform_indices = @transform_0, window_bounds = array<i64: 1, 8, 128>}, {pipeline_mode = #tpu.pipeline_mode<synchronous>, transform_indices = @transform_1, window_bounds = array<i64: 128, 384>}, {pipeline_mode = #tpu.pipeline_mode<synchronous>, transform_indices = @transform_2, window_bounds = array<i64: 1, 384>}, {pipeline_mode = #tpu.pipeline_mode<synchronous>, transform_indices = @transform_3, window_bounds = array<i64: 128, 128>}, {pipeline_mode = #tpu.pipeline_mode<synchronous>, transform_indices = @transform_4, window_bounds = array<i64: 1, 128>}, {pipeline_mode = #tpu.pipeline_mode<synchronous>, transform_indices = @transform_5, window_bounds = array<i64: 1, 128>}, {pipeline_mode = #tpu.pipeline_mode<synchronous>, transform_indices = @transform_6, window_bounds = array<i64: 1, 128>}, {pipeline_mode = #tpu.pipeline_mode<synchronous>, transform_indices = @transform_7, window_bounds = array<i64: 128, 256>}, {pipeline_mode = #tpu.pipeline_mode<synchronous>, transform_indices = @transform_8, window_bounds = array<i64: 1, 256>}, {pipeline_mode = #tpu.pipeline_mode<synchronous>, transform_indices = @transform_9, window_bounds = array<i64: 256, 128>}, {pipeline_mode = #tpu.pipeline_mode<synchronous>, transform_indices = @transform_10, window_bounds = array<i64: 1, 128>}, {pipeline_mode = #tpu.pipeline_mode<synchronous>, transform_indices = @transform_11, window_bounds = array<i64: 1, 128>}, {pipeline_mode = #tpu.pipeline_mode<synchronous>, transform_indices = @transform_12, window_bounds = array<i64: 1, 128>}, {transform_indices = @transform_13, window_bounds = array<i64: 1, 8, 128>}]} {
    %c0 = arith.constant 0 : index
    %c0_0 = arith.constant 0 : index
    %c0_1 = arith.constant 0 : index
    %0 = vector.load %arg1[%c0, %c0_0, %c0_1] : memref<1x8x128xf32, #tpu.memory_space<vmem>>, vector<1x8x128xf32>
    %1 = vector.shape_cast %0 : vector<1x8x128xf32> to vector<8x128xf32>
    %2 = arith.truncf %1 : vector<8x128xf32> to vector<8x128xbf16>
    %c0_2 = arith.constant 0 : index
    %c0_3 = arith.constant 0 : index
    %3 = vector.load %arg2[%c0_2, %c0_3] : memref<128x384xbf16, #tpu.memory_space<vmem>>, vector<128x384xbf16>
    %cst = arith.constant dense<0.000000e+00> : vector<8x384xf32>
    %4 = tpu.matmul %2, %3, %cst {dimension_numbers = #tpu.dot_dimension_numbers<[1], [0], [0], [1], [0, 0, 1, 1], [], []>} : vector<8x128xbf16>, vector<128x384xbf16>, vector<8x384xf32> -> vector<8x384xf32>
    %c0_4 = arith.constant 0 : index
    %c0_5 = arith.constant 0 : index
    %5 = vector.load %arg3[%c0_4, %c0_5] : memref<1x384xf32, #tpu.memory_space<vmem>>, vector<1x384xf32>
    %6 = vector.broadcast %5 : vector<1x384xf32> to vector<8x384xf32>
    %7 = arith.addf %4, %6 : vector<8x384xf32>
    %8 = vector.extract_strided_slice %7 {offsets = [0, 0], sizes = [8, 128], strides = [1, 1]} : vector<8x384xf32> to vector<8x128xf32>
    %cst_6 = arith.constant 0.176776692 : f32
    %9 = vector.broadcast %cst_6 : f32 to vector<8x128xf32>
    %10 = arith.mulf %8, %9 : vector<8x128xf32>
    %11 = vector.extract_strided_slice %7 {offsets = [0, 128], sizes = [8, 128], strides = [1, 1]} : vector<8x384xf32> to vector<8x128xf32>
    %12 = vector.extract_strided_slice %7 {offsets = [0, 256], sizes = [8, 128], strides = [1, 1]} : vector<8x384xf32> to vector<8x128xf32>
    %13 = tpu.iota {dimensions = array<i32: 0>} : vector<8x8xi32>
    %14 = tpu.iota {dimensions = array<i32: 1>} : vector<8x8xi32>
    %15 = arith.cmpi sle, %14, %13 : vector<8x8xi32>
    %16 = vector.extract_strided_slice %10 {offsets = [0, 0], sizes = [8, 32], strides = [1, 1]} : vector<8x128xf32> to vector<8x32xf32>
    %17 = arith.truncf %16 : vector<8x32xf32> to vector<8x32xbf16>
    %18 = vector.extract_strided_slice %11 {offsets = [0, 0], sizes = [8, 32], strides = [1, 1]} : vector<8x128xf32> to vector<8x32xf32>
    %19 = arith.truncf %18 : vector<8x32xf32> to vector<8x32xbf16>
    %20 = vector.extract_strided_slice %12 {offsets = [0, 0], sizes = [8, 32], strides = [1, 1]} : vector<8x128xf32> to vector<8x32xf32>
    %21 = arith.truncf %20 : vector<8x32xf32> to vector<8x32xbf16>
    %cst_7 = arith.constant dense<0.000000e+00> : vector<8x8xf32>
    %22 = tpu.matmul %17, %19, %cst_7 {dimension_numbers = #tpu.dot_dimension_numbers<[1], [1], [0], [0], [0, 0, 1, 0], [], []>} : vector<8x32xbf16>, vector<8x32xbf16>, vector<8x8xf32> -> vector<8x8xf32>
    %cst_8 = arith.constant -1.000000e+30 : f32
    %23 = vector.broadcast %cst_8 : f32 to vector<8x8xf32>
    %24 = arith.select %15, %22, %23 : vector<8x8xi1>, vector<8x8xf32>
    %cst_9 = arith.constant dense<0xFF800000> : vector<8xf32>
    %25 = vector.multi_reduction <maximumf>, %24, %cst_9 [1] : vector<8x8xf32> to vector<8xf32>
    %26 = vector.shape_cast %25 : vector<8xf32> to vector<8x1xf32>
    %27 = vector.broadcast %26 : vector<8x1xf32> to vector<8x8xf32>
    %28 = arith.subf %24, %27 : vector<8x8xf32>
    %29 = math.exp %28 : vector<8x8xf32>
    %cst_10 = arith.constant dense<0.000000e+00> : vector<8xf32>
    %30 = vector.multi_reduction <add>, %29, %cst_10 [1] : vector<8x8xf32> to vector<8xf32>
    %31 = vector.shape_cast %30 : vector<8xf32> to vector<8x1xf32>
    %32 = tpu.reciprocal %31 {approx = true} : vector<8x1xf32> -> vector<8x1xf32>
    %33 = vector.broadcast %32 : vector<8x1xf32> to vector<8x8xf32>
    %34 = arith.mulf %29, %33 : vector<8x8xf32>
    %35 = arith.truncf %34 : vector<8x8xf32> to vector<8x8xbf16>
    %cst_11 = arith.constant dense<0.000000e+00> : vector<8x32xf32>
    %36 = tpu.matmul %35, %21, %cst_11 {dimension_numbers = #tpu.dot_dimension_numbers<[1], [0], [0], [1], [0, 0, 1, 1], [], []>} : vector<8x8xbf16>, vector<8x32xbf16>, vector<8x32xf32> -> vector<8x32xf32>
    %37 = vector.extract_strided_slice %10 {offsets = [0, 32], sizes = [8, 32], strides = [1, 1]} : vector<8x128xf32> to vector<8x32xf32>
    %38 = arith.truncf %37 : vector<8x32xf32> to vector<8x32xbf16>
    %39 = vector.extract_strided_slice %11 {offsets = [0, 32], sizes = [8, 32], strides = [1, 1]} : vector<8x128xf32> to vector<8x32xf32>
    %40 = arith.truncf %39 : vector<8x32xf32> to vector<8x32xbf16>
    %41 = vector.extract_strided_slice %12 {offsets = [0, 32], sizes = [8, 32], strides = [1, 1]} : vector<8x128xf32> to vector<8x32xf32>
    %42 = arith.truncf %41 : vector<8x32xf32> to vector<8x32xbf16>
    %cst_12 = arith.constant dense<0.000000e+00> : vector<8x8xf32>
    %43 = tpu.matmul %38, %40, %cst_12 {dimension_numbers = #tpu.dot_dimension_numbers<[1], [1], [0], [0], [0, 0, 1, 0], [], []>} : vector<8x32xbf16>, vector<8x32xbf16>, vector<8x8xf32> -> vector<8x8xf32>
    %cst_13 = arith.constant -1.000000e+30 : f32
    %44 = vector.broadcast %cst_13 : f32 to vector<8x8xf32>
    %45 = arith.select %15, %43, %44 : vector<8x8xi1>, vector<8x8xf32>
    %cst_14 = arith.constant dense<0xFF800000> : vector<8xf32>
    %46 = vector.multi_reduction <maximumf>, %45, %cst_14 [1] : vector<8x8xf32> to vector<8xf32>
    %47 = vector.shape_cast %46 : vector<8xf32> to vector<8x1xf32>
    %48 = vector.broadcast %47 : vector<8x1xf32> to vector<8x8xf32>
    %49 = arith.subf %45, %48 : vector<8x8xf32>
    %50 = math.exp %49 : vector<8x8xf32>
    %cst_15 = arith.constant dense<0.000000e+00> : vector<8xf32>
    %51 = vector.multi_reduction <add>, %50, %cst_15 [1] : vector<8x8xf32> to vector<8xf32>
    %52 = vector.shape_cast %51 : vector<8xf32> to vector<8x1xf32>
    %53 = tpu.reciprocal %52 {approx = true} : vector<8x1xf32> -> vector<8x1xf32>
    %54 = vector.broadcast %53 : vector<8x1xf32> to vector<8x8xf32>
    %55 = arith.mulf %50, %54 : vector<8x8xf32>
    %56 = arith.truncf %55 : vector<8x8xf32> to vector<8x8xbf16>
    %cst_16 = arith.constant dense<0.000000e+00> : vector<8x32xf32>
    %57 = tpu.matmul %56, %42, %cst_16 {dimension_numbers = #tpu.dot_dimension_numbers<[1], [0], [0], [1], [0, 0, 1, 1], [], []>} : vector<8x8xbf16>, vector<8x32xbf16>, vector<8x32xf32> -> vector<8x32xf32>
    %58 = vector.extract_strided_slice %10 {offsets = [0, 64], sizes = [8, 32], strides = [1, 1]} : vector<8x128xf32> to vector<8x32xf32>
    %59 = arith.truncf %58 : vector<8x32xf32> to vector<8x32xbf16>
    %60 = vector.extract_strided_slice %11 {offsets = [0, 64], sizes = [8, 32], strides = [1, 1]} : vector<8x128xf32> to vector<8x32xf32>
    %61 = arith.truncf %60 : vector<8x32xf32> to vector<8x32xbf16>
    %62 = vector.extract_strided_slice %12 {offsets = [0, 64], sizes = [8, 32], strides = [1, 1]} : vector<8x128xf32> to vector<8x32xf32>
    %63 = arith.truncf %62 : vector<8x32xf32> to vector<8x32xbf16>
    %cst_17 = arith.constant dense<0.000000e+00> : vector<8x8xf32>
    %64 = tpu.matmul %59, %61, %cst_17 {dimension_numbers = #tpu.dot_dimension_numbers<[1], [1], [0], [0], [0, 0, 1, 0], [], []>} : vector<8x32xbf16>, vector<8x32xbf16>, vector<8x8xf32> -> vector<8x8xf32>
    %cst_18 = arith.constant -1.000000e+30 : f32
    %65 = vector.broadcast %cst_18 : f32 to vector<8x8xf32>
    %66 = arith.select %15, %64, %65 : vector<8x8xi1>, vector<8x8xf32>
    %cst_19 = arith.constant dense<0xFF800000> : vector<8xf32>
    %67 = vector.multi_reduction <maximumf>, %66, %cst_19 [1] : vector<8x8xf32> to vector<8xf32>
    %68 = vector.shape_cast %67 : vector<8xf32> to vector<8x1xf32>
    %69 = vector.broadcast %68 : vector<8x1xf32> to vector<8x8xf32>
    %70 = arith.subf %66, %69 : vector<8x8xf32>
    %71 = math.exp %70 : vector<8x8xf32>
    %cst_20 = arith.constant dense<0.000000e+00> : vector<8xf32>
    %72 = vector.multi_reduction <add>, %71, %cst_20 [1] : vector<8x8xf32> to vector<8xf32>
    %73 = vector.shape_cast %72 : vector<8xf32> to vector<8x1xf32>
    %74 = tpu.reciprocal %73 {approx = true} : vector<8x1xf32> -> vector<8x1xf32>
    %75 = vector.broadcast %74 : vector<8x1xf32> to vector<8x8xf32>
    %76 = arith.mulf %71, %75 : vector<8x8xf32>
    %77 = arith.truncf %76 : vector<8x8xf32> to vector<8x8xbf16>
    %cst_21 = arith.constant dense<0.000000e+00> : vector<8x32xf32>
    %78 = tpu.matmul %77, %63, %cst_21 {dimension_numbers = #tpu.dot_dimension_numbers<[1], [0], [0], [1], [0, 0, 1, 1], [], []>} : vector<8x8xbf16>, vector<8x32xbf16>, vector<8x32xf32> -> vector<8x32xf32>
    %79 = vector.extract_strided_slice %10 {offsets = [0, 96], sizes = [8, 32], strides = [1, 1]} : vector<8x128xf32> to vector<8x32xf32>
    %80 = arith.truncf %79 : vector<8x32xf32> to vector<8x32xbf16>
    %81 = vector.extract_strided_slice %11 {offsets = [0, 96], sizes = [8, 32], strides = [1, 1]} : vector<8x128xf32> to vector<8x32xf32>
    %82 = arith.truncf %81 : vector<8x32xf32> to vector<8x32xbf16>
    %83 = vector.extract_strided_slice %12 {offsets = [0, 96], sizes = [8, 32], strides = [1, 1]} : vector<8x128xf32> to vector<8x32xf32>
    %84 = arith.truncf %83 : vector<8x32xf32> to vector<8x32xbf16>
    %cst_22 = arith.constant dense<0.000000e+00> : vector<8x8xf32>
    %85 = tpu.matmul %80, %82, %cst_22 {dimension_numbers = #tpu.dot_dimension_numbers<[1], [1], [0], [0], [0, 0, 1, 0], [], []>} : vector<8x32xbf16>, vector<8x32xbf16>, vector<8x8xf32> -> vector<8x8xf32>
    %cst_23 = arith.constant -1.000000e+30 : f32
    %86 = vector.broadcast %cst_23 : f32 to vector<8x8xf32>
    %87 = arith.select %15, %85, %86 : vector<8x8xi1>, vector<8x8xf32>
    %cst_24 = arith.constant dense<0xFF800000> : vector<8xf32>
    %88 = vector.multi_reduction <maximumf>, %87, %cst_24 [1] : vector<8x8xf32> to vector<8xf32>
    %89 = vector.shape_cast %88 : vector<8xf32> to vector<8x1xf32>
    %90 = vector.broadcast %89 : vector<8x1xf32> to vector<8x8xf32>
    %91 = arith.subf %87, %90 : vector<8x8xf32>
    %92 = math.exp %91 : vector<8x8xf32>
    %cst_25 = arith.constant dense<0.000000e+00> : vector<8xf32>
    %93 = vector.multi_reduction <add>, %92, %cst_25 [1] : vector<8x8xf32> to vector<8xf32>
    %94 = vector.shape_cast %93 : vector<8xf32> to vector<8x1xf32>
    %95 = tpu.reciprocal %94 {approx = true} : vector<8x1xf32> -> vector<8x1xf32>
    %96 = vector.broadcast %95 : vector<8x1xf32> to vector<8x8xf32>
    %97 = arith.mulf %92, %96 : vector<8x8xf32>
    %98 = arith.truncf %97 : vector<8x8xf32> to vector<8x8xbf16>
    %cst_26 = arith.constant dense<0.000000e+00> : vector<8x32xf32>
    %99 = tpu.matmul %98, %84, %cst_26 {dimension_numbers = #tpu.dot_dimension_numbers<[1], [0], [0], [1], [0, 0, 1, 1], [], []>} : vector<8x8xbf16>, vector<8x32xbf16>, vector<8x32xf32> -> vector<8x32xf32>
    %100 = tpu.concatenate %36, %57, %78, %99 in 1 : vector<8x32xf32>, vector<8x32xf32>, vector<8x32xf32>, vector<8x32xf32> -> vector<8x128xf32>
    %101 = arith.truncf %100 : vector<8x128xf32> to vector<8x128xbf16>
    %c0_27 = arith.constant 0 : index
    %c0_28 = arith.constant 0 : index
    %102 = vector.load %arg4[%c0_27, %c0_28] : memref<128x128xbf16, #tpu.memory_space<vmem>>, vector<128x128xbf16>
    %cst_29 = arith.constant dense<0.000000e+00> : vector<8x128xf32>
    %103 = tpu.matmul %101, %102, %cst_29 {dimension_numbers = #tpu.dot_dimension_numbers<[1], [0], [0], [1], [0, 0, 1, 1], [], []>} : vector<8x128xbf16>, vector<128x128xbf16>, vector<8x128xf32> -> vector<8x128xf32>
    %c0_30 = arith.constant 0 : index
    %c0_31 = arith.constant 0 : index
    %104 = vector.load %arg5[%c0_30, %c0_31] : memref<1x128xf32, #tpu.memory_space<vmem>>, vector<1x128xf32>
    %105 = vector.broadcast %104 : vector<1x128xf32> to vector<8x128xf32>
    %106 = arith.addf %103, %105 : vector<8x128xf32>
    %107 = arith.addf %1, %106 : vector<8x128xf32>
    %c0_32 = arith.constant 0 : index
    %c0_33 = arith.constant 0 : index
    %108 = vector.load %arg6[%c0_32, %c0_33] : memref<1x128xf32, #tpu.memory_space<vmem>>, vector<1x128xf32>
    %c0_34 = arith.constant 0 : index
    %c0_35 = arith.constant 0 : index
    %109 = vector.load %arg7[%c0_34, %c0_35] : memref<1x128xf32, #tpu.memory_space<vmem>>, vector<1x128xf32>
    %cst_36 = arith.constant dense<0.000000e+00> : vector<8xf32>
    %110 = vector.multi_reduction <add>, %107, %cst_36 [1] : vector<8x128xf32> to vector<8xf32>
    %111 = vector.shape_cast %110 : vector<8xf32> to vector<8x1xf32>
    %cst_37 = arith.constant 1.280000e+02 : f32
    %112 = vector.broadcast %cst_37 : f32 to vector<8x1xf32>
    %113 = arith.divf %111, %112 : vector<8x1xf32>
    %114 = vector.broadcast %113 : vector<8x1xf32> to vector<8x128xf32>
    %115 = arith.subf %107, %114 : vector<8x128xf32>
    %116 = arith.mulf %115, %115 : vector<8x128xf32>
    %cst_38 = arith.constant dense<0.000000e+00> : vector<8xf32>
    %117 = vector.multi_reduction <add>, %116, %cst_38 [1] : vector<8x128xf32> to vector<8xf32>
    %118 = vector.shape_cast %117 : vector<8xf32> to vector<8x1xf32>
    %cst_39 = arith.constant 1.280000e+02 : f32
    %119 = vector.broadcast %cst_39 : f32 to vector<8x1xf32>
    %120 = arith.divf %118, %119 : vector<8x1xf32>
    %121 = vector.broadcast %113 : vector<8x1xf32> to vector<8x128xf32>
    %122 = arith.subf %107, %121 : vector<8x128xf32>
    %cst_40 = arith.constant 9.99999974E-6 : f32
    %123 = vector.broadcast %cst_40 : f32 to vector<8x1xf32>
    %124 = arith.addf %120, %123 : vector<8x1xf32>
    %125 = math.rsqrt %124 : vector<8x1xf32>
    %126 = vector.broadcast %125 : vector<8x1xf32> to vector<8x128xf32>
    %127 = arith.mulf %122, %126 : vector<8x128xf32>
    %128 = vector.broadcast %108 : vector<1x128xf32> to vector<8x128xf32>
    %129 = arith.mulf %127, %128 : vector<8x128xf32>
    %130 = vector.broadcast %109 : vector<1x128xf32> to vector<8x128xf32>
    %131 = arith.addf %129, %130 : vector<8x128xf32>
    %132 = arith.truncf %131 : vector<8x128xf32> to vector<8x128xbf16>
    %c0_41 = arith.constant 0 : index
    %c0_42 = arith.constant 0 : index
    %133 = vector.load %arg8[%c0_41, %c0_42] : memref<128x256xbf16, #tpu.memory_space<vmem>>, vector<128x256xbf16>
    %cst_43 = arith.constant dense<0.000000e+00> : vector<8x256xf32>
    %134 = tpu.matmul %132, %133, %cst_43 {dimension_numbers = #tpu.dot_dimension_numbers<[1], [0], [0], [1], [0, 0, 1, 1], [], []>} : vector<8x128xbf16>, vector<128x256xbf16>, vector<8x256xf32> -> vector<8x256xf32>
    %c0_44 = arith.constant 0 : index
    %c0_45 = arith.constant 0 : index
    %135 = vector.load %arg9[%c0_44, %c0_45] : memref<1x256xf32, #tpu.memory_space<vmem>>, vector<1x256xf32>
    %136 = vector.broadcast %135 : vector<1x256xf32> to vector<8x256xf32>
    %137 = arith.addf %134, %136 : vector<8x256xf32>
    %138 = arith.mulf %137, %137 : vector<8x256xf32>
    %139 = arith.mulf %137, %138 : vector<8x256xf32>
    %cst_46 = arith.constant 4.471500e-02 : f32
    %140 = vector.broadcast %cst_46 : f32 to vector<8x256xf32>
    %141 = arith.mulf %140, %139 : vector<8x256xf32>
    %142 = arith.addf %137, %141 : vector<8x256xf32>
    %cst_47 = arith.constant 0.797884583 : f32
    %143 = vector.broadcast %cst_47 : f32 to vector<8x256xf32>
    %144 = arith.mulf %143, %142 : vector<8x256xf32>
    %145 = math.tanh %144 : vector<8x256xf32>
    %cst_48 = arith.constant 1.000000e+00 : f32
    %146 = vector.broadcast %cst_48 : f32 to vector<8x256xf32>
    %147 = arith.addf %146, %145 : vector<8x256xf32>
    %cst_49 = arith.constant 5.000000e-01 : f32
    %148 = vector.broadcast %cst_49 : f32 to vector<8x256xf32>
    %149 = arith.mulf %148, %147 : vector<8x256xf32>
    %150 = arith.mulf %137, %149 : vector<8x256xf32>
    %151 = arith.truncf %150 : vector<8x256xf32> to vector<8x256xbf16>
    %c0_50 = arith.constant 0 : index
    %c0_51 = arith.constant 0 : index
    %152 = vector.load %arg10[%c0_50, %c0_51] : memref<256x128xbf16, #tpu.memory_space<vmem>>, vector<256x128xbf16>
    %cst_52 = arith.constant dense<0.000000e+00> : vector<8x128xf32>
    %153 = tpu.matmul %151, %152, %cst_52 {dimension_numbers = #tpu.dot_dimension_numbers<[1], [0], [0], [1], [0, 0, 1, 1], [], []>} : vector<8x256xbf16>, vector<256x128xbf16>, vector<8x128xf32> -> vector<8x128xf32>
    %c0_53 = arith.constant 0 : index
    %c0_54 = arith.constant 0 : index
    %154 = vector.load %arg11[%c0_53, %c0_54] : memref<1x128xf32, #tpu.memory_space<vmem>>, vector<1x128xf32>
    %155 = vector.broadcast %154 : vector<1x128xf32> to vector<8x128xf32>
    %156 = arith.addf %153, %155 : vector<8x128xf32>
    %157 = arith.addf %131, %156 : vector<8x128xf32>
    %c0_55 = arith.constant 0 : index
    %c0_56 = arith.constant 0 : index
    %158 = vector.load %arg12[%c0_55, %c0_56] : memref<1x128xf32, #tpu.memory_space<vmem>>, vector<1x128xf32>
    %c0_57 = arith.constant 0 : index
    %c0_58 = arith.constant 0 : index
    %159 = vector.load %arg13[%c0_57, %c0_58] : memref<1x128xf32, #tpu.memory_space<vmem>>, vector<1x128xf32>
    %cst_59 = arith.constant dense<0.000000e+00> : vector<8xf32>
    %160 = vector.multi_reduction <add>, %157, %cst_59 [1] : vector<8x128xf32> to vector<8xf32>
    %161 = vector.shape_cast %160 : vector<8xf32> to vector<8x1xf32>
    %cst_60 = arith.constant 1.280000e+02 : f32
    %162 = vector.broadcast %cst_60 : f32 to vector<8x1xf32>
    %163 = arith.divf %161, %162 : vector<8x1xf32>
    %164 = vector.broadcast %163 : vector<8x1xf32> to vector<8x128xf32>
    %165 = arith.subf %157, %164 : vector<8x128xf32>
    %166 = arith.mulf %165, %165 : vector<8x128xf32>
    %cst_61 = arith.constant dense<0.000000e+00> : vector<8xf32>
    %167 = vector.multi_reduction <add>, %166, %cst_61 [1] : vector<8x128xf32> to vector<8xf32>
    %168 = vector.shape_cast %167 : vector<8xf32> to vector<8x1xf32>
    %cst_62 = arith.constant 1.280000e+02 : f32
    %169 = vector.broadcast %cst_62 : f32 to vector<8x1xf32>
    %170 = arith.divf %168, %169 : vector<8x1xf32>
    %171 = vector.broadcast %163 : vector<8x1xf32> to vector<8x128xf32>
    %172 = arith.subf %157, %171 : vector<8x128xf32>
    %cst_63 = arith.constant 9.99999974E-6 : f32
    %173 = vector.broadcast %cst_63 : f32 to vector<8x1xf32>
    %174 = arith.addf %170, %173 : vector<8x1xf32>
    %175 = math.rsqrt %174 : vector<8x1xf32>
    %176 = vector.broadcast %175 : vector<8x1xf32> to vector<8x128xf32>
    %177 = arith.mulf %172, %176 : vector<8x128xf32>
    %178 = vector.broadcast %158 : vector<1x128xf32> to vector<8x128xf32>
    %179 = arith.mulf %177, %178 : vector<8x128xf32>
    %180 = vector.broadcast %159 : vector<1x128xf32> to vector<8x128xf32>
    %181 = arith.addf %179, %180 : vector<8x128xf32>
    %c0_64 = arith.constant 0 : index
    %c0_65 = arith.constant 0 : index
    %c0_66 = arith.constant 0 : index
    %182 = vector.load %arg14[%c0_64, %c0_65, %c0_66] : memref<1x8x128xf32, #tpu.memory_space<vmem>>, vector<1x8x128xf32>
    %183 = vector.shape_cast %182 : vector<1x8x128xf32> to vector<8x128xf32>
    %184 = vector.shape_cast %181 : vector<8x128xf32> to vector<1x8x128xf32>
    tpu.vector_store %arg14[%c0_64, %c0_65, %c0_66], %184 {strides = array<i32>} : memref<1x8x128xf32, #tpu.memory_space<vmem>>, vector<1x8x128xf32>,
    return
  }
  func.func @transform_0(%arg0: i32) -> (i32, i32, i32) {
    %c0_i32 = arith.constant 0 : i32
    %c0_i32_0 = arith.constant 0 : i32
    %c0_i32_1 = arith.constant 0 : i32
    return %arg0, %c0_i32, %c0_i32_0 : i32, i32, i32
  }
  func.func @transform_1(%arg0: i32) -> (i32, i32) {
    %c0_i32 = arith.constant 0 : i32
    %c0_i32_0 = arith.constant 0 : i32
    %c0_i32_1 = arith.constant 0 : i32
    return %c0_i32, %c0_i32_0 : i32, i32
  }
  func.func @transform_2(%arg0: i32) -> (i32, i32) {
    %c0_i32 = arith.constant 0 : i32
    %c0_i32_0 = arith.constant 0 : i32
    %c0_i32_1 = arith.constant 0 : i32
    return %c0_i32, %c0_i32_0 : i32, i32
  }
  func.func @transform_3(%arg0: i32) -> (i32, i32) {
    %c0_i32 = arith.constant 0 : i32
    %c0_i32_0 = arith.constant 0 : i32
    %c0_i32_1 = arith.constant 0 : i32
    return %c0_i32, %c0_i32_0 : i32, i32
  }
  func.func @transform_4(%arg0: i32) -> (i32, i32) {
    %c0_i32 = arith.constant 0 : i32
    %c0_i32_0 = arith.constant 0 : i32
    %c0_i32_1 = arith.constant 0 : i32
    return %c0_i32, %c0_i32_0 : i32, i32
  }
  func.func @transform_5(%arg0: i32) -> (i32, i32) {
    %c0_i32 = arith.constant 0 : i32
    %c0_i32_0 = arith.constant 0 : i32
    %c0_i32_1 = arith.constant 0 : i32
    return %c0_i32, %c0_i32_0 : i32, i32
  }
  func.func @transform_6(%arg0: i32) -> (i32, i32) {
    %c0_i32 = arith.constant 0 : i32
    %c0_i32_0 = arith.constant 0 : i32
    %c0_i32_1 = arith.constant 0 : i32
    return %c0_i32, %c0_i32_0 : i32, i32
  }
  func.func @transform_7(%arg0: i32) -> (i32, i32) {
    %c0_i32 = arith.constant 0 : i32
    %c0_i32_0 = arith.constant 0 : i32
    %c0_i32_1 = arith.constant 0 : i32
    return %c0_i32, %c0_i32_0 : i32, i32
  }
  func.func @transform_8(%arg0: i32) -> (i32, i32) {
    %c0_i32 = arith.constant 0 : i32
    %c0_i32_0 = arith.constant 0 : i32
    %c0_i32_1 = arith.constant 0 : i32
    return %c0_i32, %c0_i32_0 : i32, i32
  }
  func.func @transform_9(%arg0: i32) -> (i32, i32) {
    %c0_i32 = arith.constant 0 : i32
    %c0_i32_0 = arith.constant 0 : i32
    %c0_i32_1 = arith.constant 0 : i32
    return %c0_i32, %c0_i32_0 : i32, i32
  }
  func.func @transform_10(%arg0: i32) -> (i32, i32) {
    %c0_i32 = arith.constant 0 : i32
    %c0_i32_0 = arith.constant 0 : i32
    %c0_i32_1 = arith.constant 0 : i32
    return %c0_i32, %c0_i32_0 : i32, i32
  }
  func.func @transform_11(%arg0: i32) -> (i32, i32) {
    %c0_i32 = arith.constant 0 : i32
    %c0_i32_0 = arith.constant 0 : i32
    %c0_i32_1 = arith.constant 0 : i32
    return %c0_i32, %c0_i32_0 : i32, i32
  }
  func.func @transform_12(%arg0: i32) -> (i32, i32) {
    %c0_i32 = arith.constant 0 : i32
    %c0_i32_0 = arith.constant 0 : i32
    %c0_i32_1 = arith.constant 0 : i32
    return %c0_i32, %c0_i32_0 : i32, i32
  }
  func.func @transform_13(%arg0: i32) -> (i32, i32, i32) {
    %c0_i32 = arith.constant 0 : i32
    %c0_i32_0 = arith.constant 0 : i32
    %c0_i32_1 = arith.constant 0 : i32
    return %arg0, %c0_i32, %c0_i32_0 : i32, i32, i32
  }
}

module attributes {stable_mosaic.version = 11 : i64} {
  func.func @_decoder_layer_kernel(%arg0: i32, %arg1: memref<1x8x128xf32, #tpu.memory_space<vmem>>, %arg2: memref<128x384xbf16, #tpu.memory_space<vmem>>, %arg3: memref<1x384xf32, #tpu.memory_space<vmem>>, %arg4: memref<128x128xbf16, #tpu.memory_space<vmem>>, %arg5: memref<1x128xf32, #tpu.memory_space<vmem>>, %arg6: memref<1x128xf32, #tpu.memory_space<vmem>>, %arg7: memref<1x128xf32, #tpu.memory_space<vmem>>, %arg8: memref<128x256xbf16, #tpu.memory_space<vmem>>, %arg9: memref<1x256xf32, #tpu.memory_space<vmem>>, %arg10: memref<256x128xbf16, #tpu.memory_space<vmem>>, %arg11: memref<1x128xf32, #tpu.memory_space<vmem>>, %arg12: memref<1x128xf32, #tpu.memory_space<vmem>>, %arg13: memref<1x128xf32, #tpu.memory_space<vmem>>, %arg14: memref<1x8x128xf32, #tpu.memory_space<vmem>>) attributes {dimension_semantics = [#tpu.dimension_semantics<parallel>], iteration_bounds = array<i64: 2>, scalar_prefetch = 0 : i64, scratch_operands = 0 : i64, tpu.core_type = #tpu.core_type<tc>, window_params = [{transform_indices = @transform_0, window_bounds = array<i64: 1, 8, 128>}, {pipeline_mode = #tpu.pipeline_mode<synchronous>, transform_indices = @transform_1, window_bounds = array<i64: 128, 384>}, {pipeline_mode = #tpu.pipeline_mode<synchronous>, transform_indices = @transform_2, window_bounds = array<i64: 1, 384>}, {pipeline_mode = #tpu.pipeline_mode<synchronous>, transform_indices = @transform_3, window_bounds = array<i64: 128, 128>}, {pipeline_mode = #tpu.pipeline_mode<synchronous>, transform_indices = @transform_4, window_bounds = array<i64: 1, 128>}, {pipeline_mode = #tpu.pipeline_mode<synchronous>, transform_indices = @transform_5, window_bounds = array<i64: 1, 128>}, {pipeline_mode = #tpu.pipeline_mode<synchronous>, transform_indices = @transform_6, window_bounds = array<i64: 1, 128>}, {pipeline_mode = #tpu.pipeline_mode<synchronous>, transform_indices = @transform_7, window_bounds = array<i64: 128, 256>}, {pipeline_mode = #tpu.pipeline_mode<synchronous>, transform_indices = @transform_8, window_bounds = array<i64: 1, 256>}, {pipeline_mode = #tpu.pipeline_mode<synchronous>, transform_indices = @transform_9, window_bounds = array<i64: 256, 128>}, {pipeline_mode = #tpu.pipeline_mode<synchronous>, transform_indices = @transform_10, window_bounds = array<i64: 1, 128>}, {pipeline_mode = #tpu.pipeline_mode<synchronous>, transform_indices = @transform_11, window_bounds = array<i64: 1, 128>}, {pipeline_mode = #tpu.pipeline_mode<synchronous>, transform_indices = @transform_12, window_bounds = array<i64: 1, 128>}, {transform_indices = @transform_13, window_bounds = array<i64: 1, 8, 128>}]} {
    %c0 = arith.constant 0 : index
    %c0_0 = arith.constant 0 : index
    %c0_1 = arith.constant 0 : index
    %0 = vector.load %arg1[%c0, %c0_0, %c0_1] : memref<1x8x128xf32, #tpu.memory_space<vmem>>, vector<1x8x128xf32>
    %1 = vector.shape_cast %0 : vector<1x8x128xf32> to vector<8x128xf32>
    %2 = arith.truncf %1 : vector<8x128xf32> to vector<8x128xbf16>
    %c0_2 = arith.constant 0 : index
    %c0_3 = arith.constant 0 : index
    %3 = vector.load %arg2[%c0_2, %c0_3] : memref<128x384xbf16, #tpu.memory_space<vmem>>, vector<128x384xbf16>
    %cst = arith.constant dense<0.000000e+00> : vector<8x384xf32>
    %4 = tpu.matmul %2, %3, %cst {dimension_numbers = #tpu.dot_dimension_numbers<[1], [0], [0], [1], [0, 0, 1, 1], [], []>} : vector<8x128xbf16>, vector<128x384xbf16>, vector<8x384xf32> -> vector<8x384xf32>
    %c0_4 = arith.constant 0 : index
    %c0_5 = arith.constant 0 : index
    %5 = vector.load %arg3[%c0_4, %c0_5] : memref<1x384xf32, #tpu.memory_space<vmem>>, vector<1x384xf32>
    %6 = vector.broadcast %5 : vector<1x384xf32> to vector<8x384xf32>
    %7 = arith.addf %4, %6 : vector<8x384xf32>
    %8 = vector.extract_strided_slice %7 {offsets = [0, 0], sizes = [8, 128], strides = [1, 1]} : vector<8x384xf32> to vector<8x128xf32>
    %cst_6 = arith.constant 0.176776692 : f32
    %9 = vector.broadcast %cst_6 : f32 to vector<8x128xf32>
    %10 = arith.mulf %8, %9 : vector<8x128xf32>
    %11 = vector.extract_strided_slice %7 {offsets = [0, 128], sizes = [8, 128], strides = [1, 1]} : vector<8x384xf32> to vector<8x128xf32>
    %12 = vector.extract_strided_slice %7 {offsets = [0, 256], sizes = [8, 128], strides = [1, 1]} : vector<8x384xf32> to vector<8x128xf32>
    %13 = tpu.iota {dimensions = array<i32: 0>} : vector<8x8xi32>
    %14 = tpu.iota {dimensions = array<i32: 1>} : vector<8x8xi32>
    %15 = arith.cmpi sle, %14, %13 : vector<8x8xi32>
    %16 = vector.extract_strided_slice %10 {offsets = [0, 0], sizes = [8, 32], strides = [1, 1]} : vector<8x128xf32> to vector<8x32xf32>
    %17 = arith.truncf %16 : vector<8x32xf32> to vector<8x32xbf16>
    %18 = vector.extract_strided_slice %11 {offsets = [0, 0], sizes = [8, 32], strides = [1, 1]} : vector<8x128xf32> to vector<8x32xf32>
    %19 = arith.truncf %18 : vector<8x32xf32> to vector<8x32xbf16>
    %20 = vector.extract_strided_slice %12 {offsets = [0, 0], sizes = [8, 32], strides = [1, 1]} : vector<8x128xf32> to vector<8x32xf32>
    %21 = arith.truncf %20 : vector<8x32xf32> to vector<8x32xbf16>
    %cst_7 = arith.constant dense<0.000000e+00> : vector<8x8xf32>
    %22 = tpu.matmul %17, %19, %cst_7 {dimension_numbers = #tpu.dot_dimension_numbers<[1], [1], [0], [0], [0, 0, 1, 0], [], []>} : vector<8x32xbf16>, vector<8x32xbf16>, vector<8x8xf32> -> vector<8x8xf32>
    %cst_8 = arith.constant -1.000000e+30 : f32
    %23 = vector.broadcast %cst_8 : f32 to vector<8x8xf32>
    %24 = arith.select %15, %22, %23 : vector<8x8xi1>, vector<8x8xf32>
    %cst_9 = arith.constant dense<0xFF800000> : vector<8xf32>
    %25 = vector.multi_reduction <maximumf>, %24, %cst_9 [1] : vector<8x8xf32> to vector<8xf32>
    %26 = vector.shape_cast %25 : vector<8xf32> to vector<8x1xf32>
    %27 = vector.broadcast %26 : vector<8x1xf32> to vector<8x8xf32>
    %28 = arith.subf %24, %27 : vector<8x8xf32>
    %29 = math.exp %28 : vector<8x8xf32>
    %cst_10 = arith.constant dense<0.000000e+00> : vector<8xf32>
    %30 = vector.multi_reduction <add>, %29, %cst_10 [1] : vector<8x8xf32> to vector<8xf32>
    %31 = vector.shape_cast %30 : vector<8xf32> to vector<8x1xf32>
    %32 = tpu.reciprocal %31 {approx = true} : vector<8x1xf32> -> vector<8x1xf32>
    %33 = vector.broadcast %32 : vector<8x1xf32> to vector<8x8xf32>
    %34 = arith.mulf %29, %33 : vector<8x8xf32>
    %35 = arith.truncf %34 : vector<8x8xf32> to vector<8x8xbf16>
    %cst_11 = arith.constant dense<0.000000e+00> : vector<8x32xf32>
    %36 = tpu.matmul %35, %21, %cst_11 {dimension_numbers = #tpu.dot_dimension_numbers<[1], [0], [0], [1], [0, 0, 1, 1], [], []>} : vector<8x8xbf16>, vector<8x32xbf16>, vector<8x32xf32> -> vector<8x32xf32>
    %37 = vector.extract_strided_slice %10 {offsets = [0, 32], sizes = [8, 32], strides = [1, 1]} : vector<8x128xf32> to vector<8x32xf32>
    %38 = arith.truncf %37 : vector<8x32xf32> to vector<8x32xbf16>
    %39 = vector.extract_strided_slice %11 {offsets = [0, 32], sizes = [8, 32], strides = [1, 1]} : vector<8x128xf32> to vector<8x32xf32>
    %40 = arith.truncf %39 : vector<8x32xf32> to vector<8x32xbf16>
    %41 = vector.extract_strided_slice %12 {offsets = [0, 32], sizes = [8, 32], strides = [1, 1]} : vector<8x128xf32> to vector<8x32xf32>
    %42 = arith.truncf %41 : vector<8x32xf32> to vector<8x32xbf16>
    %cst_12 = arith.constant dense<0.000000e+00> : vector<8x8xf32>
    %43 = tpu.matmul %38, %40, %cst_12 {dimension_numbers = #tpu.dot_dimension_numbers<[1], [1], [0], [0], [0, 0, 1, 0], [], []>} : vector<8x32xbf16>, vector<8x32xbf16>, vector<8x8xf32> -> vector<8x8xf32>
    %cst_13 = arith.constant -1.000000e+30 : f32
    %44 = vector.broadcast %cst_13 : f32 to vector<8x8xf32>
    %45 = arith.select %15, %43, %44 : vector<8x8xi1>, vector<8x8xf32>
    %cst_14 = arith.constant dense<0xFF800000> : vector<8xf32>
    %46 = vector.multi_reduction <maximumf>, %45, %cst_14 [1] : vector<8x8xf32> to vector<8xf32>
    %47 = vector.shape_cast %46 : vector<8xf32> to vector<8x1xf32>
    %48 = vector.broadcast %47 : vector<8x1xf32> to vector<8x8xf32>
    %49 = arith.subf %45, %48 : vector<8x8xf32>
    %50 = math.exp %49 : vector<8x8xf32>
    %cst_15 = arith.constant dense<0.000000e+00> : vector<8xf32>
    %51 = vector.multi_reduction <add>, %50, %cst_15 [1] : vector<8x8xf32> to vector<8xf32>
    %52 = vector.shape_cast %51 : vector<8xf32> to vector<8x1xf32>
    %53 = tpu.reciprocal %52 {approx = true} : vector<8x1xf32> -> vector<8x1xf32>
    %54 = vector.broadcast %53 : vector<8x1xf32> to vector<8x8xf32>
    %55 = arith.mulf %50, %54 : vector<8x8xf32>
    %56 = arith.truncf %55 : vector<8x8xf32> to vector<8x8xbf16>
    %cst_16 = arith.constant dense<0.000000e+00> : vector<8x32xf32>
    %57 = tpu.matmul %56, %42, %cst_16 {dimension_numbers = #tpu.dot_dimension_numbers<[1], [0], [0], [1], [0, 0, 1, 1], [], []>} : vector<8x8xbf16>, vector<8x32xbf16>, vector<8x32xf32> -> vector<8x32xf32>
    %58 = vector.extract_strided_slice %10 {offsets = [0, 64], sizes = [8, 32], strides = [1, 1]} : vector<8x128xf32> to vector<8x32xf32>
    %59 = arith.truncf %58 : vector<8x32xf32> to vector<8x32xbf16>
    %60 = vector.extract_strided_slice %11 {offsets = [0, 64], sizes = [8, 32], strides = [1, 1]} : vector<8x128xf32> to vector<8x32xf32>
    %61 = arith.truncf %60 : vector<8x32xf32> to vector<8x32xbf16>
    %62 = vector.extract_strided_slice %12 {offsets = [0, 64], sizes = [8, 32], strides = [1, 1]} : vector<8x128xf32> to vector<8x32xf32>
    %63 = arith.truncf %62 : vector<8x32xf32> to vector<8x32xbf16>
    %cst_17 = arith.constant dense<0.000000e+00> : vector<8x8xf32>
    %64 = tpu.matmul %59, %61, %cst_17 {dimension_numbers = #tpu.dot_dimension_numbers<[1], [1], [0], [0], [0, 0, 1, 0], [], []>} : vector<8x32xbf16>, vector<8x32xbf16>, vector<8x8xf32> -> vector<8x8xf32>
    %cst_18 = arith.constant -1.000000e+30 : f32
    %65 = vector.broadcast %cst_18 : f32 to vector<8x8xf32>
    %66 = arith.select %15, %64, %65 : vector<8x8xi1>, vector<8x8xf32>
    %cst_19 = arith.constant dense<0xFF800000> : vector<8xf32>
    %67 = vector.multi_reduction <maximumf>, %66, %cst_19 [1] : vector<8x8xf32> to vector<8xf32>
    %68 = vector.shape_cast %67 : vector<8xf32> to vector<8x1xf32>
    %69 = vector.broadcast %68 : vector<8x1xf32> to vector<8x8xf32>
    %70 = arith.subf %66, %69 : vector<8x8xf32>
    %71 = math.exp %70 : vector<8x8xf32>
    %cst_20 = arith.constant dense<0.000000e+00> : vector<8xf32>
    %72 = vector.multi_reduction <add>, %71, %cst_20 [1] : vector<8x8xf32> to vector<8xf32>
    %73 = vector.shape_cast %72 : vector<8xf32> to vector<8x1xf32>
    %74 = tpu.reciprocal %73 {approx = true} : vector<8x1xf32> -> vector<8x1xf32>
    %75 = vector.broadcast %74 : vector<8x1xf32> to vector<8x8xf32>
    %76 = arith.mulf %71, %75 : vector<8x8xf32>
    %77 = arith.truncf %76 : vector<8x8xf32> to vector<8x8xbf16>
    %cst_21 = arith.constant dense<0.000000e+00> : vector<8x32xf32>
    %78 = tpu.matmul %77, %63, %cst_21 {dimension_numbers = #tpu.dot_dimension_numbers<[1], [0], [0], [1], [0, 0, 1, 1], [], []>} : vector<8x8xbf16>, vector<8x32xbf16>, vector<8x32xf32> -> vector<8x32xf32>
    %79 = vector.extract_strided_slice %10 {offsets = [0, 96], sizes = [8, 32], strides = [1, 1]} : vector<8x128xf32> to vector<8x32xf32>
    %80 = arith.truncf %79 : vector<8x32xf32> to vector<8x32xbf16>
    %81 = vector.extract_strided_slice %11 {offsets = [0, 96], sizes = [8, 32], strides = [1, 1]} : vector<8x128xf32> to vector<8x32xf32>
    %82 = arith.truncf %81 : vector<8x32xf32> to vector<8x32xbf16>
    %83 = vector.extract_strided_slice %12 {offsets = [0, 96], sizes = [8, 32], strides = [1, 1]} : vector<8x128xf32> to vector<8x32xf32>
    %84 = arith.truncf %83 : vector<8x32xf32> to vector<8x32xbf16>
    %cst_22 = arith.constant dense<0.000000e+00> : vector<8x8xf32>
    %85 = tpu.matmul %80, %82, %cst_22 {dimension_numbers = #tpu.dot_dimension_numbers<[1], [1], [0], [0], [0, 0, 1, 0], [], []>} : vector<8x32xbf16>, vector<8x32xbf16>, vector<8x8xf32> -> vector<8x8xf32>
    %cst_23 = arith.constant -1.000000e+30 : f32
    %86 = vector.broadcast %cst_23 : f32 to vector<8x8xf32>
    %87 = arith.select %15, %85, %86 : vector<8x8xi1>, vector<8x8xf32>
    %cst_24 = arith.constant dense<0xFF800000> : vector<8xf32>
    %88 = vector.multi_reduction <maximumf>, %87, %cst_24 [1] : vector<8x8xf32> to vector<8xf32>
    %89 = vector.shape_cast %88 : vector<8xf32> to vector<8x1xf32>
    %90 = vector.broadcast %89 : vector<8x1xf32> to vector<8x8xf32>
    %91 = arith.subf %87, %90 : vector<8x8xf32>
    %92 = math.exp %91 : vector<8x8xf32>
    %cst_25 = arith.constant dense<0.000000e+00> : vector<8xf32>
    %93 = vector.multi_reduction <add>, %92, %cst_25 [1] : vector<8x8xf32> to vector<8xf32>
    %94 = vector.shape_cast %93 : vector<8xf32> to vector<8x1xf32>
    %95 = tpu.reciprocal %94 {approx = true} : vector<8x1xf32> -> vector<8x1xf32>
    %96 = vector.broadcast %95 : vector<8x1xf32> to vector<8x8xf32>
    %97 = arith.mulf %92, %96 : vector<8x8xf32>
    %98 = arith.truncf %97 : vector<8x8xf32> to vector<8x8xbf16>
    %cst_26 = arith.constant dense<0.000000e+00> : vector<8x32xf32>
    %99 = tpu.matmul %98, %84, %cst_26 {dimension_numbers = #tpu.dot_dimension_numbers<[1], [0], [0], [1], [0, 0, 1, 1], [], []>} : vector<8x8xbf16>, vector<8x32xbf16>, vector<8x32xf32> -> vector<8x32xf32>
    %100 = tpu.concatenate %36, %57, %78, %99 in 1 : vector<8x32xf32>, vector<8x32xf32>, vector<8x32xf32>, vector<8x32xf32> -> vector<8x128xf32>
    %101 = arith.truncf %100 : vector<8x128xf32> to vector<8x128xbf16>
    %c0_27 = arith.constant 0 : index
    %c0_28 = arith.constant 0 : index
    %102 = vector.load %arg4[%c0_27, %c0_28] : memref<128x128xbf16, #tpu.memory_space<vmem>>, vector<128x128xbf16>
    %cst_29 = arith.constant dense<0.000000e+00> : vector<8x128xf32>
    %103 = tpu.matmul %101, %102, %cst_29 {dimension_numbers = #tpu.dot_dimension_numbers<[1], [0], [0], [1], [0, 0, 1, 1], [], []>} : vector<8x128xbf16>, vector<128x128xbf16>, vector<8x128xf32> -> vector<8x128xf32>
    %c0_30 = arith.constant 0 : index
    %c0_31 = arith.constant 0 : index
    %104 = vector.load %arg5[%c0_30, %c0_31] : memref<1x128xf32, #tpu.memory_space<vmem>>, vector<1x128xf32>
    %105 = vector.broadcast %104 : vector<1x128xf32> to vector<8x128xf32>
    %106 = arith.addf %103, %105 : vector<8x128xf32>
    %107 = arith.addf %1, %106 : vector<8x128xf32>
    %c0_32 = arith.constant 0 : index
    %c0_33 = arith.constant 0 : index
    %108 = vector.load %arg6[%c0_32, %c0_33] : memref<1x128xf32, #tpu.memory_space<vmem>>, vector<1x128xf32>
    %c0_34 = arith.constant 0 : index
    %c0_35 = arith.constant 0 : index
    %109 = vector.load %arg7[%c0_34, %c0_35] : memref<1x128xf32, #tpu.memory_space<vmem>>, vector<1x128xf32>
    %cst_36 = arith.constant dense<0.000000e+00> : vector<8xf32>
    %110 = vector.multi_reduction <add>, %107, %cst_36 [1] : vector<8x128xf32> to vector<8xf32>
    %111 = vector.shape_cast %110 : vector<8xf32> to vector<8x1xf32>
    %cst_37 = arith.constant 1.280000e+02 : f32
    %112 = vector.broadcast %cst_37 : f32 to vector<8x1xf32>
    %113 = arith.divf %111, %112 : vector<8x1xf32>
    %114 = vector.broadcast %113 : vector<8x1xf32> to vector<8x128xf32>
    %115 = arith.subf %107, %114 : vector<8x128xf32>
    %116 = arith.mulf %115, %115 : vector<8x128xf32>
    %cst_38 = arith.constant dense<0.000000e+00> : vector<8xf32>
    %117 = vector.multi_reduction <add>, %116, %cst_38 [1] : vector<8x128xf32> to vector<8xf32>
    %118 = vector.shape_cast %117 : vector<8xf32> to vector<8x1xf32>
    %cst_39 = arith.constant 1.280000e+02 : f32
    %119 = vector.broadcast %cst_39 : f32 to vector<8x1xf32>
    %120 = arith.divf %118, %119 : vector<8x1xf32>
    %121 = vector.broadcast %113 : vector<8x1xf32> to vector<8x128xf32>
    %122 = arith.subf %107, %121 : vector<8x128xf32>
    %cst_40 = arith.constant 9.99999974E-6 : f32
    %123 = vector.broadcast %cst_40 : f32 to vector<8x1xf32>
    %124 = arith.addf %120, %123 : vector<8x1xf32>
    %125 = math.rsqrt %124 : vector<8x1xf32>
    %126 = vector.broadcast %125 : vector<8x1xf32> to vector<8x128xf32>
    %127 = arith.mulf %122, %126 : vector<8x128xf32>
    %128 = vector.broadcast %108 : vector<1x128xf32> to vector<8x128xf32>
    %129 = arith.mulf %127, %128 : vector<8x128xf32>
    %130 = vector.broadcast %109 : vector<1x128xf32> to vector<8x128xf32>
    %131 = arith.addf %129, %130 : vector<8x128xf32>
    %132 = arith.truncf %131 : vector<8x128xf32> to vector<8x128xbf16>
    %c0_41 = arith.constant 0 : index
    %c0_42 = arith.constant 0 : index
    %133 = vector.load %arg8[%c0_41, %c0_42] : memref<128x256xbf16, #tpu.memory_space<vmem>>, vector<128x256xbf16>
    %cst_43 = arith.constant dense<0.000000e+00> : vector<8x256xf32>
    %134 = tpu.matmul %132, %133, %cst_43 {dimension_numbers = #tpu.dot_dimension_numbers<[1], [0], [0], [1], [0, 0, 1, 1], [], []>} : vector<8x128xbf16>, vector<128x256xbf16>, vector<8x256xf32> -> vector<8x256xf32>
    %c0_44 = arith.constant 0 : index
    %c0_45 = arith.constant 0 : index
    %135 = vector.load %arg9[%c0_44, %c0_45] : memref<1x256xf32, #tpu.memory_space<vmem>>, vector<1x256xf32>
    %136 = vector.broadcast %135 : vector<1x256xf32> to vector<8x256xf32>
    %137 = arith.addf %134, %136 : vector<8x256xf32>
    %138 = arith.mulf %137, %137 : vector<8x256xf32>
    %139 = arith.mulf %137, %138 : vector<8x256xf32>
    %cst_46 = arith.constant 4.471500e-02 : f32
    %140 = vector.broadcast %cst_46 : f32 to vector<8x256xf32>
    %141 = arith.mulf %140, %139 : vector<8x256xf32>
    %142 = arith.addf %137, %141 : vector<8x256xf32>
    %cst_47 = arith.constant 0.797884583 : f32
    %143 = vector.broadcast %cst_47 : f32 to vector<8x256xf32>
    %144 = arith.mulf %143, %142 : vector<8x256xf32>
    %145 = math.tanh %144 : vector<8x256xf32>
    %cst_48 = arith.constant 1.000000e+00 : f32
    %146 = vector.broadcast %cst_48 : f32 to vector<8x256xf32>
    %147 = arith.addf %146, %145 : vector<8x256xf32>
    %cst_49 = arith.constant 5.000000e-01 : f32
    %148 = vector.broadcast %cst_49 : f32 to vector<8x256xf32>
    %149 = arith.mulf %148, %147 : vector<8x256xf32>
    %150 = arith.mulf %137, %149 : vector<8x256xf32>
    %151 = arith.truncf %150 : vector<8x256xf32> to vector<8x256xbf16>
    %c0_50 = arith.constant 0 : index
    %c0_51 = arith.constant 0 : index
    %152 = vector.load %arg10[%c0_50, %c0_51] : memref<256x128xbf16, #tpu.memory_space<vmem>>, vector<256x128xbf16>
    %cst_52 = arith.constant dense<0.000000e+00> : vector<8x128xf32>
    %153 = tpu.matmul %151, %152, %cst_52 {dimension_numbers = #tpu.dot_dimension_numbers<[1], [0], [0], [1], [0, 0, 1, 1], [], []>} : vector<8x256xbf16>, vector<256x128xbf16>, vector<8x128xf32> -> vector<8x128xf32>
    %c0_53 = arith.constant 0 : index
    %c0_54 = arith.constant 0 : index
    %154 = vector.load %arg11[%c0_53, %c0_54] : memref<1x128xf32, #tpu.memory_space<vmem>>, vector<1x128xf32>
    %155 = vector.broadcast %154 : vector<1x128xf32> to vector<8x128xf32>
    %156 = arith.addf %153, %155 : vector<8x128xf32>
    %157 = arith.addf %131, %156 : vector<8x128xf32>
    %c0_55 = arith.constant 0 : index
    %c0_56 = arith.constant 0 : index
    %158 = vector.load %arg12[%c0_55, %c0_56] : memref<1x128xf32, #tpu.memory_space<vmem>>, vector<1x128xf32>
    %c0_57 = arith.constant 0 : index
    %c0_58 = arith.constant 0 : index
    %159 = vector.load %arg13[%c0_57, %c0_58] : memref<1x128xf32, #tpu.memory_space<vmem>>, vector<1x128xf32>
    %cst_59 = arith.constant dense<0.000000e+00> : vector<8xf32>
    %160 = vector.multi_reduction <add>, %157, %cst_59 [1] : vector<8x128xf32> to vector<8xf32>
    %161 = vector.shape_cast %160 : vector<8xf32> to vector<8x1xf32>
    %cst_60 = arith.constant 1.280000e+02 : f32
    %162 = vector.broadcast %cst_60 : f32 to vector<8x1xf32>
    %163 = arith.divf %161, %162 : vector<8x1xf32>
    %164 = vector.broadcast %163 : vector<8x1xf32> to vector<8x128xf32>
    %165 = arith.subf %157, %164 : vector<8x128xf32>
    %166 = arith.mulf %165, %165 : vector<8x128xf32>
    %cst_61 = arith.constant dense<0.000000e+00> : vector<8xf32>
    %167 = vector.multi_reduction <add>, %166, %cst_61 [1] : vector<8x128xf32> to vector<8xf32>
    %168 = vector.shape_cast %167 : vector<8xf32> to vector<8x1xf32>
    %cst_62 = arith.constant 1.280000e+02 : f32
    %169 = vector.broadcast %cst_62 : f32 to vector<8x1xf32>
    %170 = arith.divf %168, %169 : vector<8x1xf32>
    %171 = vector.broadcast %163 : vector<8x1xf32> to vector<8x128xf32>
    %172 = arith.subf %157, %171 : vector<8x128xf32>
    %cst_63 = arith.constant 9.99999974E-6 : f32
    %173 = vector.broadcast %cst_63 : f32 to vector<8x1xf32>
    %174 = arith.addf %170, %173 : vector<8x1xf32>
    %175 = math.rsqrt %174 : vector<8x1xf32>
    %176 = vector.broadcast %175 : vector<8x1xf32> to vector<8x128xf32>
    %177 = arith.mulf %172, %176 : vector<8x128xf32>
    %178 = vector.broadcast %158 : vector<1x128xf32> to vector<8x128xf32>
    %179 = arith.mulf %177, %178 : vector<8x128xf32>
    %180 = vector.broadcast %159 : vector<1x128xf32> to vector<8x128xf32>
    %181 = arith.addf %179, %180 : vector<8x128xf32>
    %c0_64 = arith.constant 0 : index
    %c0_65 = arith.constant 0 : index
    %c0_66 = arith.constant 0 : index
    %182 = vector.load %arg14[%c0_64, %c0_65, %c0_66] : memref<1x8x128xf32, #tpu.memory_space<vmem>>, vector<1x8x128xf32>
    %183 = vector.shape_cast %182 : vector<1x8x128xf32> to vector<8x128xf32>
    %184 = vector.shape_cast %181 : vector<8x128xf32> to vector<1x8x128xf32>
    tpu.vector_store %arg14[%c0_64, %c0_65, %c0_66], %184 {strides = array<i32>} : memref<1x8x128xf32, #tpu.memory_space<vmem>>, vector<1x8x128xf32>,
    return
  }
  func.func @transform_0(%arg0: i32) -> (i32, i32, i32) {
    %c0_i32 = arith.constant 0 : i32
    %c0_i32_0 = arith.constant 0 : i32
    %c0_i32_1 = arith.constant 0 : i32
    return %arg0, %c0_i32, %c0_i32_0 : i32, i32, i32
  }
  func.func @transform_1(%arg0: i32) -> (i32, i32) {
    %c0_i32 = arith.constant 0 : i32
    %c0_i32_0 = arith.constant 0 : i32
    %c0_i32_1 = arith.constant 0 : i32
    return %c0_i32, %c0_i32_0 : i32, i32
  }
  func.func @transform_2(%arg0: i32) -> (i32, i32) {
    %c0_i32 = arith.constant 0 : i32
    %c0_i32_0 = arith.constant 0 : i32
    %c0_i32_1 = arith.constant 0 : i32
    return %c0_i32, %c0_i32_0 : i32, i32
  }
  func.func @transform_3(%arg0: i32) -> (i32, i32) {
    %c0_i32 = arith.constant 0 : i32
    %c0_i32_0 = arith.constant 0 : i32
    %c0_i32_1 = arith.constant 0 : i32
    return %c0_i32, %c0_i32_0 : i32, i32
  }
  func.func @transform_4(%arg0: i32) -> (i32, i32) {
    %c0_i32 = arith.constant 0 : i32
    %c0_i32_0 = arith.constant 0 : i32
    %c0_i32_1 = arith.constant 0 : i32
    return %c0_i32, %c0_i32_0 : i32, i32
  }
  func.func @transform_5(%arg0: i32) -> (i32, i32) {
    %c0_i32 = arith.constant 0 : i32
    %c0_i32_0 = arith.constant 0 : i32
    %c0_i32_1 = arith.constant 0 : i32
    return %c0_i32, %c0_i32_0 : i32, i32
  }
  func.func @transform_6(%arg0: i32) -> (i32, i32) {
    %c0_i32 = arith.constant 0 : i32
    %c0_i32_0 = arith.constant 0 : i32
    %c0_i32_1 = arith.constant 0 : i32
    return %c0_i32, %c0_i32_0 : i32, i32
  }
  func.func @transform_7(%arg0: i32) -> (i32, i32) {
    %c0_i32 = arith.constant 0 : i32
    %c0_i32_0 = arith.constant 0 : i32
    %c0_i32_1 = arith.constant 0 : i32
    return %c0_i32, %c0_i32_0 : i32, i32
  }
  func.func @transform_8(%arg0: i32) -> (i32, i32) {
    %c0_i32 = arith.constant 0 : i32
    %c0_i32_0 = arith.constant 0 : i32
    %c0_i32_1 = arith.constant 0 : i32
    return %c0_i32, %c0_i32_0 : i32, i32
  }
  func.func @transform_9(%arg0: i32) -> (i32, i32) {
    %c0_i32 = arith.constant 0 : i32
    %c0_i32_0 = arith.constant 0 : i32
    %c0_i32_1 = arith.constant 0 : i32
    return %c0_i32, %c0_i32_0 : i32, i32
  }
  func.func @transform_10(%arg0: i32) -> (i32, i32) {
    %c0_i32 = arith.constant 0 : i32
    %c0_i32_0 = arith.constant 0 : i32
    %c0_i32_1 = arith.constant 0 : i32
    return %c0_i32, %c0_i32_0 : i32, i32
  }
  func.func @transform_11(%arg0: i32) -> (i32, i32) {
    %c0_i32 = arith.constant 0 : i32
    %c0_i32_0 = arith.constant 0 : i32
    %c0_i32_1 = arith.constant 0 : i32
    return %c0_i32, %c0_i32_0 : i32, i32
  }
  func.func @transform_12(%arg0: i32) -> (i32, i32) {
    %c0_i32 = arith.constant 0 : i32
    %c0_i32_0 = arith.constant 0 : i32
    %c0_i32_1 = arith.constant 0 : i32
    return %c0_i32, %c0_i32_0 : i32, i32
  }
  func.func @transform_13(%arg0: i32) -> (i32, i32, i32) {
    %c0_i32 = arith.constant 0 : i32
    %c0_i32_0 = arith.constant 0 : i32
    %c0_i32_1 = arith.constant 0 : i32
    return %arg0, %c0_i32, %c0_i32_0 : i32, i32, i32
  }
}

module attributes {stable_mosaic.version = 11 : i64} {
  func.func @_scatter_proj_cls_kernel(%arg0: i32, %arg1: memref<1x8x128xf32, #tpu.memory_space<vmem>>, %arg2: memref<1x1x8xi32, #tpu.memory_space<vmem>>, %arg3: memref<128x128xbf16, #tpu.memory_space<vmem>>, %arg4: memref<1x128xf32, #tpu.memory_space<vmem>>, %arg5: memref<128x128xbf16, #tpu.memory_space<vmem>>, %arg6: memref<128x128xbf16, #tpu.memory_space<vmem>>, %arg7: memref<1x128xf32, #tpu.memory_space<vmem>>, %arg8: memref<1x8x128xf32, #tpu.memory_space<vmem>>) attributes {dimension_semantics = [#tpu.dimension_semantics<parallel>], iteration_bounds = array<i64: 2>, scalar_prefetch = 0 : i64, scratch_operands = 0 : i64, tpu.core_type = #tpu.core_type<tc>, window_params = [{transform_indices = @transform_0, window_bounds = array<i64: 1, 8, 128>}, {transform_indices = @transform_1, window_bounds = array<i64: 1, 1, 8>}, {pipeline_mode = #tpu.pipeline_mode<synchronous>, transform_indices = @transform_2, window_bounds = array<i64: 128, 128>}, {pipeline_mode = #tpu.pipeline_mode<synchronous>, transform_indices = @transform_3, window_bounds = array<i64: 1, 128>}, {pipeline_mode = #tpu.pipeline_mode<synchronous>, transform_indices = @transform_4, window_bounds = array<i64: 128, 128>}, {pipeline_mode = #tpu.pipeline_mode<synchronous>, transform_indices = @transform_5, window_bounds = array<i64: 128, 128>}, {pipeline_mode = #tpu.pipeline_mode<synchronous>, transform_indices = @transform_6, window_bounds = array<i64: 1, 128>}, {transform_indices = @transform_7, window_bounds = array<i64: 1, 8, 128>}]} {
    %c0 = arith.constant 0 : index
    %c0_0 = arith.constant 0 : index
    %c0_1 = arith.constant 0 : index
    %0 = vector.load %arg1[%c0, %c0_0, %c0_1] : memref<1x8x128xf32, #tpu.memory_space<vmem>>, vector<1x8x128xf32>
    %1 = vector.shape_cast %0 : vector<1x8x128xf32> to vector<8x128xf32>
    %c0_2 = arith.constant 0 : index
    %c0_3 = arith.constant 0 : index
    %c0_4 = arith.constant 0 : index
    %2 = vector.load %arg2[%c0_2, %c0_3, %c0_4] : memref<1x1x8xi32, #tpu.memory_space<vmem>>, vector<1x1x8xi32>
    %3 = vector.shape_cast %2 : vector<1x1x8xi32> to vector<1x8xi32>
    %4 = tpu.iota {dimensions = array<i32: 0>} : vector<8x8xi32>
    %5 = vector.broadcast %3 : vector<1x8xi32> to vector<8x8xi32>
    %6 = arith.cmpi eq, %4, %5 : vector<8x8xi32>
    %7 = arith.extui %6 : vector<8x8xi1> to vector<8x8xi32>
    %8 = arith.sitofp %7 : vector<8x8xi32> to vector<8x8xf32>
    %9 = arith.truncf %8 : vector<8x8xf32> to vector<8x8xbf16>
    %10 = arith.truncf %1 : vector<8x128xf32> to vector<8x128xbf16>
    %cst = arith.constant dense<0.000000e+00> : vector<8x128xf32>
    %11 = tpu.matmul %9, %10, %cst {dimension_numbers = #tpu.dot_dimension_numbers<[1], [0], [0], [1], [0, 0, 1, 1], [], []>} : vector<8x8xbf16>, vector<8x128xbf16>, vector<8x128xf32> -> vector<8x128xf32>
    %12 = arith.extf %9 : vector<8x8xbf16> to vector<8x8xf32>
    %cst_5 = arith.constant dense<0.000000e+00> : vector<8xf32>
    %13 = vector.multi_reduction <add>, %12, %cst_5 [1] : vector<8x8xf32> to vector<8xf32>
    %14 = vector.shape_cast %13 : vector<8xf32> to vector<8x1xf32>
    %cst_6 = arith.constant 1.000000e+00 : f32
    %15 = vector.broadcast %cst_6 : f32 to vector<8x1xf32>
    %16 = arith.maximumf %14, %15 : vector<8x1xf32>
    %17 = vector.broadcast %16 : vector<8x1xf32> to vector<8x128xf32>
    %18 = arith.divf %11, %17 : vector<8x128xf32>
    %19 = arith.truncf %18 : vector<8x128xf32> to vector<8x128xbf16>
    %c0_7 = arith.constant 0 : index
    %c0_8 = arith.constant 0 : index
    %20 = vector.load %arg3[%c0_7, %c0_8] : memref<128x128xbf16, #tpu.memory_space<vmem>>, vector<128x128xbf16>
    %cst_9 = arith.constant dense<0.000000e+00> : vector<8x128xf32>
    %21 = tpu.matmul %19, %20, %cst_9 {dimension_numbers = #tpu.dot_dimension_numbers<[1], [0], [0], [1], [0, 0, 1, 1], [], []>} : vector<8x128xbf16>, vector<128x128xbf16>, vector<8x128xf32> -> vector<8x128xf32>
    %c0_10 = arith.constant 0 : index
    %c0_11 = arith.constant 0 : index
    %22 = vector.load %arg4[%c0_10, %c0_11] : memref<1x128xf32, #tpu.memory_space<vmem>>, vector<1x128xf32>
    %23 = vector.broadcast %22 : vector<1x128xf32> to vector<8x128xf32>
    %24 = arith.addf %21, %23 : vector<8x128xf32>
    %25 = arith.truncf %24 : vector<8x128xf32> to vector<8x128xbf16>
    %26 = tpu.iota {dimensions = array<i32: 0>} : vector<8x8xi32>
    %27 = tpu.iota {dimensions = array<i32: 1>} : vector<8x8xi32>
    %c1_i32 = arith.constant 1 : i32
    %28 = vector.broadcast %c1_i32 : i32 to vector<8x8xi32>
    %29 = arith.addi %26, %28 : vector<8x8xi32>
    %30 = arith.cmpi eq, %27, %29 : vector<8x8xi32>
    %31 = arith.extui %30 : vector<8x8xi1> to vector<8x8xi32>
    %32 = arith.sitofp %31 : vector<8x8xi32> to vector<8x8xf32>
    %33 = arith.truncf %32 : vector<8x8xf32> to vector<8x8xbf16>
    %cst_12 = arith.constant dense<0.000000e+00> : vector<8x128xf32>
    %34 = tpu.matmul %33, %25, %cst_12 {dimension_numbers = #tpu.dot_dimension_numbers<[1], [0], [0], [1], [0, 0, 1, 1], [], []>} : vector<8x8xbf16>, vector<8x128xbf16>, vector<8x128xf32> -> vector<8x128xf32>
    %35 = arith.truncf %34 : vector<8x128xf32> to vector<8x128xbf16>
    %c0_13 = arith.constant 0 : index
    %c0_14 = arith.constant 0 : index
    %36 = vector.load %arg5[%c0_13, %c0_14] : memref<128x128xbf16, #tpu.memory_space<vmem>>, vector<128x128xbf16>
    %cst_15 = arith.constant dense<0.000000e+00> : vector<8x128xf32>
    %37 = tpu.matmul %25, %36, %cst_15 {dimension_numbers = #tpu.dot_dimension_numbers<[1], [0], [0], [1], [0, 0, 1, 1], [], []>} : vector<8x128xbf16>, vector<128x128xbf16>, vector<8x128xf32> -> vector<8x128xf32>
    %c0_16 = arith.constant 0 : index
    %c0_17 = arith.constant 0 : index
    %38 = vector.load %arg6[%c0_16, %c0_17] : memref<128x128xbf16, #tpu.memory_space<vmem>>, vector<128x128xbf16>
    %cst_18 = arith.constant dense<0.000000e+00> : vector<8x128xf32>
    %39 = tpu.matmul %35, %38, %cst_18 {dimension_numbers = #tpu.dot_dimension_numbers<[1], [0], [0], [1], [0, 0, 1, 1], [], []>} : vector<8x128xbf16>, vector<128x128xbf16>, vector<8x128xf32> -> vector<8x128xf32>
    %40 = arith.addf %37, %39 : vector<8x128xf32>
    %c0_19 = arith.constant 0 : index
    %c0_20 = arith.constant 0 : index
    %41 = vector.load %arg7[%c0_19, %c0_20] : memref<1x128xf32, #tpu.memory_space<vmem>>, vector<1x128xf32>
    %42 = vector.broadcast %41 : vector<1x128xf32> to vector<8x128xf32>
    %43 = arith.addf %40, %42 : vector<8x128xf32>
    %44 = tpu.iota {dimensions = array<i32: 1>} : vector<8x128xi32>
    %c2_i32 = arith.constant 2 : i32
    %45 = vector.broadcast %c2_i32 : i32 to vector<8x128xi32>
    %46 = arith.cmpi slt, %44, %45 : vector<8x128xi32>
    %cst_21 = arith.constant -1.000000e+30 : f32
    %47 = vector.broadcast %cst_21 : f32 to vector<8x128xf32>
    %48 = arith.select %46, %43, %47 : vector<8x128xi1>, vector<8x128xf32>
    %cst_22 = arith.constant dense<0xFF800000> : vector<8xf32>
    %49 = vector.multi_reduction <maximumf>, %48, %cst_22 [1] : vector<8x128xf32> to vector<8xf32>
    %50 = vector.shape_cast %49 : vector<8xf32> to vector<8x1xf32>
    %51 = vector.broadcast %50 : vector<8x1xf32> to vector<8x128xf32>
    %52 = arith.subf %48, %51 : vector<8x128xf32>
    %53 = math.exp %52 : vector<8x128xf32>
    %cst_23 = arith.constant dense<0.000000e+00> : vector<8xf32>
    %54 = vector.multi_reduction <add>, %53, %cst_23 [1] : vector<8x128xf32> to vector<8xf32>
    %55 = vector.shape_cast %54 : vector<8xf32> to vector<8x1xf32>
    %56 = math.log %55 : vector<8x1xf32>
    %57 = vector.broadcast %56 : vector<8x1xf32> to vector<8x128xf32>
    %58 = arith.subf %52, %57 : vector<8x128xf32>
    %c0_24 = arith.constant 0 : index
    %c0_25 = arith.constant 0 : index
    %c0_26 = arith.constant 0 : index
    %59 = vector.load %arg8[%c0_24, %c0_25, %c0_26] : memref<1x8x128xf32, #tpu.memory_space<vmem>>, vector<1x8x128xf32>
    %60 = vector.shape_cast %59 : vector<1x8x128xf32> to vector<8x128xf32>
    %61 = vector.shape_cast %58 : vector<8x128xf32> to vector<1x8x128xf32>
    tpu.vector_store %arg8[%c0_24, %c0_25, %c0_26], %61 {strides = array<i32>} : memref<1x8x128xf32, #tpu.memory_space<vmem>>, vector<1x8x128xf32>,
    return
  }
  func.func @transform_0(%arg0: i32) -> (i32, i32, i32) {
    %c0_i32 = arith.constant 0 : i32
    %c0_i32_0 = arith.constant 0 : i32
    %c0_i32_1 = arith.constant 0 : i32
    return %arg0, %c0_i32, %c0_i32_0 : i32, i32, i32
  }
  func.func @transform_1(%arg0: i32) -> (i32, i32, i32) {
    %c0_i32 = arith.constant 0 : i32
    %c0_i32_0 = arith.constant 0 : i32
    %c0_i32_1 = arith.constant 0 : i32
    return %arg0, %c0_i32, %c0_i32_0 : i32, i32, i32
  }
  func.func @transform_2(%arg0: i32) -> (i32, i32) {
    %c0_i32 = arith.constant 0 : i32
    %c0_i32_0 = arith.constant 0 : i32
    %c0_i32_1 = arith.constant 0 : i32
    return %c0_i32, %c0_i32_0 : i32, i32
  }
  func.func @transform_3(%arg0: i32) -> (i32, i32) {
    %c0_i32 = arith.constant 0 : i32
    %c0_i32_0 = arith.constant 0 : i32
    %c0_i32_1 = arith.constant 0 : i32
    return %c0_i32, %c0_i32_0 : i32, i32
  }
  func.func @transform_4(%arg0: i32) -> (i32, i32) {
    %c0_i32 = arith.constant 0 : i32
    %c0_i32_0 = arith.constant 0 : i32
    %c0_i32_1 = arith.constant 0 : i32
    return %c0_i32, %c0_i32_0 : i32, i32
  }
  func.func @transform_5(%arg0: i32) -> (i32, i32) {
    %c0_i32 = arith.constant 0 : i32
    %c0_i32_0 = arith.constant 0 : i32
    %c0_i32_1 = arith.constant 0 : i32
    return %c0_i32, %c0_i32_0 : i32, i32
  }
  func.func @transform_6(%arg0: i32) -> (i32, i32) {
    %c0_i32 = arith.constant 0 : i32
    %c0_i32_0 = arith.constant 0 : i32
    %c0_i32_1 = arith.constant 0 : i32
    return %c0_i32, %c0_i32_0 : i32, i32
  }
  func.func @transform_7(%arg0: i32) -> (i32, i32, i32) {
    %c0_i32 = arith.constant 0 : i32
    %c0_i32_0 = arith.constant 0 : i32
    %c0_i32_1 = arith.constant 0 : i32
    return %arg0, %c0_i32, %c0_i32_0 : i32, i32, i32
  }
}

</mosaic_0001>

<bundles_post_ra>
// kernel: discriminator_forward.4
= control target key start
LH: loop header
LB: loop body
LE: loop exit
PB: predicated region body
PF: predicated region fallthrough
CT: control target
= control target key end

     0   :  { %v90_v2 = vmov 128.0   ;;  %s129_s0 = inlined_call_operand.vmem [shape: f32[16,128], index: 0, kind: input, shape index: {}]   ;;  %s130_s1 = inlined_call_operand.vmem [shape: f32[1,128], index: 1, kind: input, shape index: {}]   ;;  %s131_s2 = inlined_call_operand.vmem [shape: f32[1,128], index: 2, kind: input, shape index: {}]   ;;  %s132_s3 = inlined_call_operand.vmem [shape: f32[16,128], index: 3, kind: output, shape index: {}]  }
   0x1   :  { %v14_v0 = vld [vmem:[%s129_s0] sm:$0xff]  ;;  %v15_v1 = vld [vmem:[%s129_s0 + $0x8] sm:$0xff]  ;;  %84 = vrcp.f32 %v90_v2 }
   0x2   :  { %18 = vadd.xlane.f32.xlu0 %v14_v0  ;;  %v82_v31 = vld [vmem:[%s130_s1] ss:$0 sm:$0xff] }
   0x3   :  { %v83_v34 = vld [vmem:[%s131_s2] ss:$0 sm:$0xff] }
   0x7   :  { %v85_v3 = vpop.eup %84 }
   0x8   :  { %v23_v4 = vmul.f32 128.0, %v85_v3  ;;  %vm27_vm0 = vweird.f32 %v85_v3 }
   0xa   :  { %20 = vadd.xlane.f32.xlu0 %v15_v1  ;;  %v24_v5 = vsub.f32 1.0, %v23_v4 }
   0xc   :  { %v25_v6 = vmul.f32 %v85_v3, %v24_v5 }
   0xe   :  { %v26_v7 = vadd.f32 %v85_v3, %v25_v6 }
  0x10   :  { %v28_v8 = vsel %vm27_vm0, %v85_v3, %v26_v7 }
  0x75   :  { %v19_v9 = vpop.xlane.xlu0 %18 }
  0x76   :  { %v29_v10 = vmul.f32 %v28_v8, %v19_v9 }
  0x78   :  { %v31_v11 = vsub.f32 %v14_v0, %v29_v10 }
  0x7a   :  { %v33_v12 = vmul.f32 %v31_v11, %v31_v11 }
  0x7c   :  { %35 = vadd.xlane.f32.xlu1 %v33_v12 }
  0x7d   :  { %v21_v13 = vpop.xlane.xlu0 %20 }
  0x7e   :  { %v30_v14 = vmul.f32 %v28_v8, %v21_v13 }
  0x80   :  { %v32_v15 = vsub.f32 %v15_v1, %v30_v14 }
  0x82   :  { %v34_v16 = vmul.f32 %v32_v15, %v32_v15 }
  0x84   :  { %37 = vadd.xlane.f32.xlu1 %v34_v16 }
  0xef   :  { %v36_v17 = vpop.xlane.xlu1 %35 }
  0xf0   :  { %v39_v18 = vmul.f32 %v36_v17, %v28_v8 }
  0xf2   :  { %v41_v19 = vadd.f32 1e-05, %v39_v18 }
  0xf4   :  { %86 = vrsqrt.f32 %v41_v19  ;;  %vm49_vm2 = vweird.f32 %v41_v19 }
  0xf7   :  { %v38_v20 = vpop.xlane.xlu1 %37 }
  0xf8   :  { %v40_v21 = vmul.f32 %v38_v20, %v28_v8 }
  0xfa   :  { %v87_v22 = vpop.eup %86  ;;  %v42_v23 = vadd.f32 1e-05, %v40_v21 }
  0xfb   :  { %v44_v24 = vmul.f32 %v87_v22, %v41_v19  ;;  %vm50_vm1 = vweird.f32 %v87_v22 }
  0xfc   :  { %88 = vrsqrt.f32 %v42_v23  ;;  %vm51_vm3 = vmor %vm49_vm2, %vm50_vm1  ;;  %vm59_vm5 = vweird.f32 %v42_v23 }
  0xfd   :  { %v45_v25 = vmul.f32 %v87_v22, %v44_v24 }
  0xff   :  { %v46_v26 = vmul.f32 0.5, %v45_v25 }
 0x101   :  { %v47_v27 = vsub.f32 1.5, %v46_v26 }
 0x102   :  { %v89_v28 = vpop.eup %88 }
 0x103   :  { %v48_v29 = vmul.f32 %v87_v22, %v47_v27  ;;  %v54_v30 = vmul.f32 %v89_v28, %v42_v23  ;;  %vm60_vm4 = vweird.f32 %v89_v28 }
 0x104   :  { %vm61_vm6 = vmor %vm59_vm5, %vm60_vm4 }
 0x105   :  { %v52_v32 = vsel %vm51_vm3, %v87_v22, %v48_v29  ;;  %v55_v33 = vmul.f32 %v89_v28, %v54_v30 }
 0x106   :  { %v63_v35 = vmul.f32 %v52_v32, %v31_v11 }
 0x107   :  { %v56_v36 = vmul.f32 0.5, %v55_v33 }
 0x108   :  { %v68_v37 = vmul.f32 %v82_v31, %v63_v35 }
 0x109   :  { %v57_v38 = vsub.f32 1.5, %v56_v36 }
 0x10a   :  { %v73_v39 = vadd.f32 %v83_v34, %v68_v37 }
 0x10b   :  { %v58_v40 = vmul.f32 %v89_v28, %v57_v38 }
 0x10c   :  { %75 = vst [vmem:[%s132_s3] sm:$0xff] %v73_v39 }
 0x10d   :  { %v62_v41 = vsel %vm61_vm6, %v89_v28, %v58_v40 }
 0x10e   :  { %v64_v42 = vmul.f32 %v62_v41, %v32_v15 }
 0x110   :  { %v69_v43 = vmul.f32 %v82_v31, %v64_v42 }
 0x112   :  { %v74_v44 = vadd.f32 %v83_v34, %v69_v43 }
 0x114   :  { %76 = vst [vmem:[%s132_s3 + $0x8] sm:$0xff] %v74_v44 }

// kernel: discriminator_forward.7
= control target key start
LH: loop header
LB: loop body
LE: loop exit
PB: predicated region body
PF: predicated region fallthrough
CT: control target
= control target key end

     0   :  { %12 = vsyncpa [#allocation3], 0  ;;  %s1274_s0 = inlined_call_operand.vmem [shape: f32[2,8,128], index: 0, kind: input, shape index: {}]   ;;  %s1275_s1 = inlined_call_operand.vmem [shape: s32[2,1,8], index: 1, kind: input, shape index: {}]   ;;  %s1276_s2 = inlined_call_operand.hbm [shape: bf16[128,128], index: 2, kind: input, shape index: {}]   ;;  %s1277_s3 = inlined_call_operand.vmem [shape: f32[1,128], index: 3, kind: input, shape index: {}]   ;;  %s1278_s4 = inlined_call_operand.hbm [shape: bf16[128,128], index: 4, kind: input, shape index: {}]   ;;  %s1279_s5 = inlined_call_operand.hbm [shape: bf16[128,128], index: 5, kind: input, shape index: {}]   ;;  %s1280_s6 = inlined_call_operand.hbm [shape: f32[1,128], index: 6, kind: input, shape index: {}]   ;;  %s1281_s7 = inlined_call_operand.vmem [shape: f32[2,8,128], index: 7, kind: output, shape index: {}]  }
   0x1   :  { %13 = vsyncpa [#allocation5], 0 }
   0x2   :  { %14 = vsyncpa [#allocation8], 0  ;;  %s1179_s24 = smov 0  }
   0x3 LB: > { %s1185_s25 = sadd.s32 4294967295, %s1130_s24   ;;  %p792_p0 = scmp.ge.s32.totalorder %s1130_s24, 1  ;;  %s1130_s24 = sphi %s1179_s24, %s20_s24  }
   0x4   : > { %p208_p1 = scmp.lt.s32.totalorder %s1130_s24, 3  ;;  %p960_p2 = scmp.eq.s32.totalorder %s1185_s25, 0 }
   0x5   : > { %s236_s28 = sshll.u32 %s1278_s4, 4  ;;  %s219_s9 = sshll.u32 %s1276_s2, 4  ;;  %s237_s28 = int_to_ptr.hbm [resolvable:$true] %s236_s28  ;;  %s220_s9 = int_to_ptr.hbm [resolvable:$true] %s219_s9 }
   0x6   : > { %p1193_p3 = pnand %p792_p0, %p208_p1  ;;  %s1132_s10 = smov [#allocation4]  }
   0x7   : > { %s238_s11 = sshll.u32 %s1132_s10, 4  ;;  %s1133_s13 = smov [#allocation2]   ;;  %s239_s11 = int_to_ptr.vmem [resolvable:$true] %s238_s11 }
   0x8   : > { %p947_p4 = pneg %p1193_p3  ;;  %s221_s14 = sshll.u32 %s1133_s13, 4  ;;  %s222_s14 = int_to_ptr.vmem [resolvable:$true] %s221_s14 }
   0x9   : > { %s250_s17 = sshll.u32 %s1279_s5, 4  ;;  %s1134_s18 = smov 64   ;;  %s251_s17 = int_to_ptr.hbm [resolvable:$true] %s250_s17 }
   0xa   : > { %p1204_p5 = pnand %p960_p2, %p947_p4  ;;  %s1135_s19 = smov 4  }
   0xb   : > { %s1136_s20 = smov [#allocation6]   ;;  %s265_s26 = sshll.u32 %s1280_s6, 4  ;;  %s266_s26 = int_to_ptr.hbm [resolvable:$true] %s265_s26 }
   0xc   : > { %953 = dma.hbm_to_vmem [thread:$0]  (!%p1204_p5), %s237_s28, 1024, %s239_s11, [#allocation5], %s1134_s18, %s1134_s18, %s1135_s19  }
   0xd   : > { %950 = dma.hbm_to_vmem [thread:$0]  (!%p1204_p5), %s220_s9, 1024, %s222_s14, [#allocation3], %s1134_s18, %s1134_s18, %s1135_s19  }
   0xe   : > { %s252_s21 = sshll.u32 %s1136_s20, 4  ;;  %s1137_s27 = smov [#allocation7]   ;;  %s253_s21 = int_to_ptr.vmem [resolvable:$true] %s252_s21 }
   0xf   : > { %956 = dma.hbm_to_vmem [thread:$0]  (!%p1204_p5), %s251_s17, 1024, %s253_s21, [#allocation5], %s1134_s18, %s1134_s18, %s1135_s19  }
  0x10   : > { %s267_s30 = sshll.u32 %s1137_s27, 4  ;;  %293 = sbr.rel (%p1193_p3) target bundleno = 834 (0x342), region = 48  ;;  %s268_s30 = int_to_ptr.vmem [resolvable:$true] %s267_s30 }
  0x11   : > { %959 = dma.hbm_to_vmem [thread:$0]  (!%p1204_p5), %s266_s26, 16, %s268_s30, [#allocation8]  }
  0x15   : > { %1117 = dma.done.wait (%p960_p2), [#allocation3], 1024  }
  0x16   : > { %1119 = vsyncadd (%p960_p2), [#allocation3], 4294966272 }
  0x17   : > { %1121 = dma.done.wait (%p960_p2), [#allocation5], 2048  }
  0x18   : > { %1123 = vsyncadd (%p960_p2), [#allocation5], 4294965248 }
  0x19   : > { %1125 = dma.done.wait (%p960_p2), [#allocation8], 16  }
  0x1a   : > { %1127 = vsyncadd (%p960_p2), [#allocation8], 4294967280  ;;  %p342_p6 = scmp.lt.s32.totalorder %s1185_s25, 1  ;;  %v356_v0 = vlaneseq  ;;  %vm368_vm0 = vcmask 1043456   ;;  %v1138_v6 = vmov 0.0   ;;  %vm364_vm2 = vcmask 64512  }
  0x1b   : > { %v914_v9 = vld [vmem:[#allocation2 + $0x38] sm:$0xff]  ;;  %v913_v12 = vld [vmem:[#allocation2 + $0x30] sm:$0xff]  ;;  %v912_v15 = vld [vmem:[#allocation2 + $0x28] sm:$0xff] }
  0x1c   : > { %s1285_s25 = smov (!%p342_p6, %s1185_s25), 1  ;;  %v357_v1 = vshrl.u32 %v356_v0, 7  ;;  %v1240_v2 = vand.u32 127, %v356_v0  ;;  %474 = vmatpush.bf16.msra.mxu1 %v914_v9  ;;  %v911_v16 = vld [vmem:[#allocation2 + $0x20] sm:$0xff]  ;;  %v910_v17 = vld [vmem:[#allocation2 + $0x18] sm:$0xff]  ;;  %v909_v18 = vld [vmem:[#allocation2 + $0x10] sm:$0xff] }
  0x1d   : > { %s803_s28 = sshll.u32 %s1285_s25, 3  ;;  %s348_s9 = scalar_lea.vmem %s1275_s1, %s1285_s25  ;;  %v908_v19 = vld [vmem:[#allocation2 + $0x8] sm:$0xff]  ;;  %v907_v20 = vld [vmem:[#allocation2] sm:$0xff]  ;;  %v922_v21 = vld [vmem:[#allocation4 + $0x38] sm:$0xff] }
  0x1e   : > { %v490_v3 = vadd.s32 1, %v357_v1  ;;  %s345_s12 = scalar_lea.vmem %s1274_s0, %s803_s28  ;;  %v983_v5 = vld [vmem:[%s348_s9] ss:$0 sm:$0xff]  ;;  %656 = vmatpush.bf16.msra.mxu0 %v922_v21  ;;  %v921_v22 = vld [vmem:[#allocation4 + $0x30] sm:$0xff]  ;;  %v920_v24 = vld [vmem:[#allocation4 + $0x28] sm:$0xff]  ;;  %vm674_vm8 = vcmp.lt.s32.totalorder %v1240_v2, 2  ;;  %s352_s17 = scalar_lea.vmem %s1281_s7, %s803_s28 }
  0x1f   : > { %v354_v4 = vld [vmem:[%s345_s12] sm:$0xff]  ;;  %vm359_vm3 = vcmp.eq.s32.totalorder %v357_v1, %v983_v5  ;;  %v918_v27 = vld [vmem:[#allocation4 + $0x18] sm:$0xff]  ;;  %v917_v31 = vld [vmem:[#allocation4 + $0x10] sm:$0xff] }
  0x20   : > { %vm491_vm1 = vcmp.eq.s32.totalorder %v1240_v2, %v490_v3  ;;  %v363_v8 = vpack.c.bf16 %v354_v4, %v354_v4  ;;  %v805_v11 = vsel %vm359_vm3, 1.0, %v1138_v6  ;;  %475 = vmatpush.bf16.msra.mxu1 %v913_v12  ;;  %v919_v26 = vld [vmem:[#allocation4 + $0x20] sm:$0xff]  ;;  %v916_v36 = vld [vmem:[#allocation4 + $0x8] sm:$0xff]  ;;  %v930_v45 = vld [vmem:[#allocation6 + $0x38] sm:$0xff] }
  0x21   : > { %v1253_v7 = vsel %vm491_vm1, 1.0, %v1138_v6  ;;  %v386_v13 = vsel %vm364_vm2, %v805_v11, 0.0  ;;  %v362_v14 = vpack.c.bf16 %v805_v11, %v805_v11  ;;  %v915_v44 = vld [vmem:[#allocation4] sm:$0xff]  ;;  %595 = vmatpush.bf16.msra.mxu3 %v930_v45  ;;  %v929_v46 = vld [vmem:[#allocation6 + $0x30] sm:$0xff]  ;;  %v928_v47 = vld [vmem:[#allocation6 + $0x28] sm:$0xff] }
  0x22   : > { %v370_v10 = vsel %vm368_vm0, %v363_v8, 0  ;;  %387 = vadd.xlane.f32.xlu0 %v386_v13  ;;  %657 = vmatpush.bf16.msra.mxu0 %v921_v22  ;;  %v927_v48 = vld [vmem:[#allocation6 + $0x20] sm:$0xff]  ;;  %v926_v49 = vld [vmem:[#allocation6 + $0x18] sm:$0xff]  ;;  %v494_v54 = vpack.c.bf16 %v1253_v7, %v1253_v7  ;;  %v925_v57 = vld [vmem:[#allocation6 + $0x10] sm:$0xff] }
  0x23   : > { %379 = vmatpush.bf16.msra.mxu2 %v370_v10  ;;  %v984_v50 = vld [vmem:[%s1277_s3] ss:$0 sm:$0xff]  ;;  %v924_v58 = vld [vmem:[#allocation6 + $0x8] sm:$0xff] }
  0x24   : > { %476 = vmatpush.bf16.msra.mxu1 %v912_v15  ;;  %v923_v59 = vld [vmem:[#allocation6] sm:$0xff] }
  0x25   : > { %596 = vmatpush.bf16.msra.mxu3 %v929_v46  ;;  %v985_v1 = vld [vmem:[#allocation7] ss:$0 sm:$0xff] }
  0x26   : > { %806 = vmatmul.msk.bf16.vlgmr.msra.gmra.mxu2 %vm364_vm2, %v362_v14  ;;  %658 = vmatpush.bf16.msra.mxu0 %v920_v24 }
  0x28   : > { %477 = vmatpush.bf16.msra.mxu1 %v911_v16 }
  0x29   : > { %597 = vmatpush.bf16.msra.mxu3 %v928_v47 }
  0x2a   : > { %659 = vmatpush.bf16.msra.mxu0 %v919_v26 }
  0x2c   : > { %478 = vmatpush.bf16.msra.mxu1 %v910_v17 }
  0x2d   : > { %598 = vmatpush.bf16.msra.mxu3 %v927_v48 }
  0x2e   : > { %660 = vmatpush.bf16.msra.mxu0 %v918_v27 }
  0x30   : > { %479 = vmatpush.bf16.msra.mxu1 %v909_v18 }
  0x31   : > { %599 = vmatpush.bf16.msra.mxu3 %v926_v49 }
  0x32   : > { %661 = vmatpush.bf16.msra.mxu0 %v917_v31 }
  0x34   : > { %480 = vmatpush.bf16.msra.mxu1 %v908_v19 }
  0x35   : > { %600 = vmatpush.bf16.msra.mxu3 %v925_v57 }
  0x36   : > { %662 = vmatpush.bf16.msra.mxu0 %v916_v36 }
  0x38   : > { %481 = vmatpush.bf16.msra.mxu1 %v907_v20 }
  0x39   : > { %601 = vmatpush.bf16.msra.mxu3 %v924_v58 }
  0x3a   : > { %663 = vmatpush.bf16.msra.mxu0 %v915_v44 }
  0x3d   : > { %602 = vmatpush.bf16.msra.mxu3 %v923_v59 }
  0x95   : > { %v388_v23 = vpop.xlane.xlu0 %387 }
  0x96   : > { %v389_v25 = vmax.f32 %v388_v23, 1.0 }
  0x98   : > { %986 = vrcp.f32 %v389_v25  ;;  %v401_v32 = vand.u32 2147483648, %v389_v25  ;;  %v399_v34 = vand.u32 2147483647, %v389_v25  ;;  %vm395_vm5 = vweird.f32 %v389_v25 }
  0x9a   : > { %v402_v37 = vor.u32 1.1754944e-38, %v401_v32  ;;  %vm400_vm7 = vcmp.eq.f32.partialorder %v399_v34, 8.507059e+37 }
  0x9e   : > { %v987_v28 = vpop.eup %986 }
  0x9f   : > { %v391_v29 = vmul.f32 %v987_v28, %v389_v25  ;;  %vm396_vm4 = vweird.f32 %v987_v28 }
  0xa0   : > { %vm397_vm6 = vmor %vm395_vm5, %vm396_vm4 }
  0xa1   : > { %v392_v30 = vsub.f32 1.0, %v391_v29 }
  0xa3   : > { %v393_v33 = vmul.f32 %v987_v28, %v392_v30 }
  0xa5   : > { %v394_v35 = vadd.f32 %v987_v28, %v393_v33 }
  0xa7   : > { %v398_v39 = vsel %vm397_vm6, %v987_v28, %v394_v35 }
  0xa8   : > { %v403_v40 = vsel %vm400_vm7, %v402_v37, %v398_v39 }
  0xa9   : > { %v381_v38 = vpop.f32.mrf.mxu2 }
  0xaa   : > { %v404_v41 = vmul.f32 %v403_v40, %v381_v38 }
  0xac   : > { %v405_v42 = vpack.c.bf16 %v404_v41, %v404_v41 }
  0xae   : > { %482 = vmatmul.bf16.vlgmr.msra.gmra.mxu1 %v405_v42 }
  0xb1   : > { %v383_v43 = vpop.f32.mrf.mxu2 }
 0x12b   : > { %v483_v51 = vpop.f32.mrf.mxu1 }
 0x12c   : > { %v484_v52 = vadd.f32 %v984_v50, %v483_v51 }
 0x12e   : > { %v487_v53 = vpack.c.bf16 %v484_v52, %v484_v52 }
 0x130   : > { %664 = vmatmul.bf16.vlgmr.msra.gmra.mxu0 %v487_v53  ;;  %v499_v55 = vsel %vm368_vm0, %v487_v53, 0 }
 0x131   : > { %508 = vmatpush.bf16.msrb.mxu2 %v499_v55 }
 0x133   : > { %v485_v56 = vpop.f32.mrf.mxu1 }
 0x134   : > { %840 = vmatmul.msk.bf16.vlgmr.msrb.gmra.mxu2 %vm364_vm2, %v494_v54 }
 0x1ad   : > { %v665_v60 = vpop.f32.mrf.mxu0 }
 0x1b5   : > { %v667_v61 = vpop.f32.mrf.mxu0 }
 0x1b7   : > { %v510_v62 = vpop.f32.mrf.mxu2 }
 0x1b8   : > { %v514_v63 = vpack.c.bf16 %v510_v62, %v510_v62 }
 0x1ba   : > { %603 = vmatmul.bf16.vlgmr.msra.gmra.mxu3 %v514_v63 }
 0x1bf   : > { %v512_v0 = vpop.f32.mrf.mxu2 }
 0x23d   : > { %v604_v3 = vpop.f32.mrf.mxu3 }
 0x23e   : > { %v666_v4 = vadd.f32 %v665_v60, %v604_v3 }
 0x240   : > { %v673_v5 = vadd.f32 %v985_v1, %v666_v4 }
 0x242   : > { %v675_v6 = vsel %vm674_vm8, %v673_v5, -1e+30 }
 0x243   : > { %676 = vmax.xlane.f32.xlu0 %v675_v6 }
 0x245   : > { %v606_v7 = vpop.f32.mrf.mxu3 }
 0x2b6   : > { %v677_v8 = vpop.xlane.xlu0 %676 }
 0x2b7   : > { %v678_v9 = vsub.f32 %v675_v6, %v677_v8 }
 0x2b9   : > { %v679_v10 = vmul.f32 1.442695, %v678_v9 }
 0x2bb   : > { %988 = vpow2.f32 %v679_v10 }
 0x2c1   : > { %v989_v11 = vpop.eup %988 }
 0x2c2   : > { %681 = vadd.xlane.f32.xlu1 %v989_v11 }
 0x335   : > { %v682_v12 = vpop.xlane.xlu1 %681 }
 0x336   : > { %990 = vlog2.f32 %v682_v12 }
 0x33c   : > { %v991_v13 = vpop.eup %990 }
 0x33d   : > { %v684_v14 = vmul.f32 0.6931472, %v991_v13 }
 0x33f   : > { %v685_v2 = vsub.f32 %v678_v9, %v684_v14 }
 0x341   : > { %686 = vst [vmem:[%s352_s17] sm:$0xff] %v685_v2 }
 0x342 PF: > { %s20_s24 = sadd.s32 1, %s1130_s24  }
 0x343   : > { %p17_p7 = scmp.ge.s32.totalorder %s20_s24, 4  }
 0x345   :  { %19 = sbr.rel (!%p17_p7) target bundleno = 3 (0x3), region = 98 }
 0x34a   :  { %706 = vsyncpa [#allocation3], 1 }
 0x34b   :  { %708 = vsyncpa [#allocation3 + $0x1], 1 }
 0x34c   :  { %709 = vsyncpa [#allocation5], 1 }
 0x34d   :  { %710 = vsyncpa [#allocation8], 1 }

// kernel: discriminator_forward.6
= control target key start
LH: loop header
LB: loop body
LE: loop exit
PB: predicated region body
PF: predicated region fallthrough
CT: control target
= control target key end

     0   :  { %s2352_s0 = inlined_call_operand.vmem [shape: f32[2,8,128], index: 0, kind: input, shape index: {}]   ;;  %s2353_s1 = inlined_call_operand.hbm [shape: bf16[128,384], index: 1, kind: input, shape index: {}]   ;;  %s2354_s2 = inlined_call_operand.vmem [shape: f32[1,384], index: 2, kind: input, shape index: {}]   ;;  %s2355_s3 = inlined_call_operand.hbm [shape: bf16[128,128], index: 3, kind: input, shape index: {}]   ;;  %s2356_s4 = inlined_call_operand.vmem [shape: f32[1,128], index: 4, kind: input, shape index: {}]   ;;  %s2357_s5 = inlined_call_operand.vmem [shape: f32[1,128], index: 5, kind: input, shape index: {}]   ;;  %s2358_s6 = inlined_call_operand.vmem [shape: f32[1,128], index: 6, kind: input, shape index: {}]   ;;  %s2359_s7 = inlined_call_operand.hbm [shape: bf16[128,256], index: 7, kind: input, shape index: {}]   ;;  %s2360_s8 = inlined_call_operand.vmem [shape: f32[1,256], index: 8, kind: input, shape index: {}]   ;;  %s2361_s9 = inlined_call_operand.hbm [shape: bf16[256,128], index: 9, kind: input, shape index: {}]   ;;  %s2362_s10 = inlined_call_operand.vmem [shape: f32[1,128], index: 10, kind: input, shape index: {}]   ;;  %s2363_s11 = inlined_call_operand.vmem [shape: f32[1,128], index: 11, kind: input, shape index: {}]   ;;  %s2364_s12 = inlined_call_operand.vmem [shape: f32[1,128], index: 12, kind: input, shape index: {}]   ;;  %s2365_s13 = inlined_call_operand.vmem [shape: f32[2,8,128], index: 13, kind: output, shape index: {}]  }
   0x1   :  { %2367 = sst [smem:[#allocation13_spill]] %s2353_s1 }
   0x2   :  { %2368 = sst [smem:[#allocation14_spill]] %s2355_s3 }
   0x3   :  { %2369 = sst [smem:[#allocation15_spill]] %s2365_s13 }
   0x4   :  { %18 = vsyncpa [#allocation3], 0 }
   0x5   :  { %19 = vsyncpa [#allocation5], 0 }
   0x6   :  { %20 = vsyncpa [#allocation8], 0  ;;  %s2180_s25 = smov 0  }
   0x7 LB: > { %2370 = sst [smem:[#allocation12_spill]] %s2094_s25  ;;  %s2189_s29 = sadd.s32 4294967295, %s2094_s25   ;;  %s2094_s25 = sphi %s2180_s25, %s26_s25  }
   0x8   : > { %s2371_s3 = sld [smem:[#allocation14_spill]]  ;;  %p1522_p0 = scmp.ge.s32.totalorder %s2094_s25, 1 }
   0x9   : > { %p335_p1 = scmp.lt.s32.totalorder %s2094_s25, 3  ;;  %p1894_p2 = scmp.eq.s32.totalorder %s2189_s29, 0 }
   0xa   : > { %s2096_s14 = smov [#allocation4]   ;;  %s2373_s1 = sld [smem:[#allocation13_spill]] }
   0xb   : > { %p2194_p3 = pnand %p1522_p0, %p335_p1  ;;  %s365_s15 = sshll.u32 %s2096_s14, 4  ;;  %s366_s15 = int_to_ptr.vmem [resolvable:$true] %s365_s15 }
   0xc   : > { %s2097_s20 = smov [#allocation2]   ;;  %s2098_s22 = smov 64  }
   0xd   : > { %p1881_p4 = pneg %p2194_p3  ;;  %s348_s21 = sshll.u32 %s2097_s20, 4  ;;  %s349_s21 = int_to_ptr.vmem [resolvable:$true] %s348_s21 }
   0xe   : > { %s363_s28 = sshll.u32 %s2371_s3, 4  ;;  %s2099_s23 = smov 4   ;;  %s364_s28 = int_to_ptr.hbm [resolvable:$true] %s363_s28 }
   0xf   : > { %p2205_p5 = pnand %p1894_p2, %p1881_p4  ;;  %s386_s27 = sshll.u32 %s2359_s7, 4  ;;  %s387_s27 = int_to_ptr.hbm [resolvable:$true] %s386_s27 }
  0x10   : > { %s346_s18 = sshll.u32 %s2373_s1, 4  ;;  %s2100_s14 = smov 192   ;;  %s347_s18 = int_to_ptr.hbm [resolvable:$true] %s346_s18 }
  0x11   : > { %1887 = dma.hbm_to_vmem [thread:$0]  (!%p2205_p5), %s364_s28, 1024, %s366_s15, [#allocation5], %s2098_s22, %s2098_s22, %s2099_s23  }
  0x12   : > { %s2101_s16 = smov 12   ;;  %s2102_s17 = smov [#allocation6]  }
  0x13   : > { %1884 = dma.hbm_to_vmem [thread:$0]  (!%p2205_p5), %s347_s18, 3072, %s349_s21, [#allocation3], %s2100_s14, %s2100_s14, %s2101_s16  }
  0x14   : > { %s388_s1 = sshll.u32 %s2102_s17, 4  ;;  %s2103_s3 = smov 128   ;;  %s389_s1 = int_to_ptr.vmem [resolvable:$true] %s388_s1 }
  0x15   : > { %s2104_s20 = smov 8   ;;  %s403_s28 = sshll.u32 %s2361_s9, 4  ;;  %s404_s28 = int_to_ptr.hbm [resolvable:$true] %s403_s28 }
  0x16   : > { %1890 = dma.hbm_to_vmem [thread:$0]  (!%p2205_p5), %s387_s27, 2048, %s389_s1, [#allocation5], %s2103_s3, %s2103_s3, %s2104_s20  }
  0x17   : > { %s2105_s15 = smov [#allocation7]   ;;  %437 = sbr.rel (%p2194_p3) target bundleno = 2234 (0x8ba), region = 72 }
  0x18   : > { %s405_s24 = sshll.u32 %s2105_s15, 4  ;;  %s406_s24 = int_to_ptr.vmem [resolvable:$true] %s405_s24 }
  0x19   : > { %1893 = dma.hbm_to_vmem [thread:$0]  (!%p2205_p5), %s404_s28, 2048, %s406_s24, [#allocation8], %s2098_s22, %s2098_s22, %s2099_s23  }
  0x1c   : > { %2081 = dma.done.wait (%p1894_p2), [#allocation3], 3072  }
  0x1d   : > { %2083 = vsyncadd (%p1894_p2), [#allocation3], 4294964224 }
  0x1e   : > { %2085 = dma.done.wait (%p1894_p2), [#allocation5], 3072  }
  0x1f   : > { %2087 = vsyncadd (%p1894_p2), [#allocation5], 4294964224 }
  0x20   : > { %2089 = dma.done.wait (%p1894_p2), [#allocation8], 2048  }
  0x21   : > { %2091 = vsyncadd (%p1894_p2), [#allocation8], 4294965248  ;;  %v1621_v0 = vld [vmem:[#allocation2 + $0xa8] sm:$0xf]  ;;  %v1823_v1 = vld [vmem:[#allocation2 + $0xb0] sm:$0xf0] }
  0x22   : > { %v1822_v2 = vld [vmem:[#allocation2 + $0xac] sm:$0xf]  ;;  %v1622_v3 = vor.u32 %v1823_v1, %v1621_v0  ;;  %v1623_v4 = vld [vmem:[#allocation2 + $0xb4] sm:$0xf0]  ;;  %v1609_v5 = vld [vmem:[#allocation2 + $0x90] sm:$0xf] }
  0x23   : > { %v1820_v6 = vld [vmem:[#allocation2 + $0x98] sm:$0xf0]  ;;  %v1626_v7 = vor.u32 %v1822_v2, %v1623_v4  ;;  %v1819_v8 = vld [vmem:[#allocation2 + $0x94] sm:$0xf]  ;;  %v1611_v9 = vld [vmem:[#allocation2 + $0x9c] sm:$0xf0] }
  0x24   : > { %674 = vmatpush.bf16.msra.mxu0 %v1622_v3  ;;  %v1610_v10 = vor.u32 %v1820_v6, %v1609_v5  ;;  %v1614_v11 = vor.u32 %v1819_v8, %v1611_v9  ;;  %v1597_v12 = vld [vmem:[#allocation2 + $0x78] sm:$0xf]  ;;  %v1817_v13 = vld [vmem:[#allocation2 + $0x80] sm:$0xf0]  ;;  %v1816_v14 = vld [vmem:[#allocation2 + $0x7c] sm:$0xf] }
  0x25   : > { %687 = vmatpush.bf16.msra.mxu1 %v1626_v7  ;;  %v1599_v15 = vld [vmem:[#allocation2 + $0x84] sm:$0xf0]  ;;  %v1598_v16 = vor.u32 %v1817_v13, %v1597_v12  ;;  %v1585_v18 = vld [vmem:[#allocation2 + $0x60] sm:$0xf]  ;;  %v1814_v19 = vld [vmem:[#allocation2 + $0x68] sm:$0xf0] }
  0x26   : > { %v1602_v17 = vor.u32 %v1816_v14, %v1599_v15  ;;  %v1813_v20 = vld [vmem:[#allocation2 + $0x64] sm:$0xf]  ;;  %v1587_v21 = vld [vmem:[#allocation2 + $0x6c] sm:$0xf0]  ;;  %p495_p6 = scmp.lt.s32.totalorder %s2189_s29, 1  ;;  %v1586_v22 = vor.u32 %v1814_v19, %v1585_v18  ;;  %vm722_vm0 = vcmask 261120  }
  0x27   : > { %v1629_v23 = vld [vmem:[#allocation2 + $0xb0] sm:$0xf]  ;;  %v1824_v24 = vld [vmem:[#allocation2 + $0xb8] sm:$0xf0]  ;;  %v1617_v25 = vld [vmem:[#allocation2 + $0x98] sm:$0xf]  ;;  %v1590_v26 = vor.u32 %v1813_v20, %v1587_v21 }
  0x28   : > { %675 = vmatpush.bf16.msra.mxu0 %v1610_v10  ;;  %v1573_v27 = vld [vmem:[#allocation2 + $0x48] sm:$0xf]  ;;  %v1811_v28 = vld [vmem:[#allocation2 + $0x50] sm:$0xf0]  ;;  %v1630_v29 = vor.u32 %v1824_v24, %v1629_v23  ;;  %v1821_v30 = vld [vmem:[#allocation2 + $0xa0] sm:$0xf0] }
  0x29   : > { %688 = vmatpush.bf16.msra.mxu1 %v1614_v11  ;;  %v1810_v31 = vld [vmem:[#allocation2 + $0x4c] sm:$0xf]  ;;  %v1575_v32 = vld [vmem:[#allocation2 + $0x54] sm:$0xf0]  ;;  %s2378_s29 = smov (!%p495_p6, %s2189_s29), 1  ;;  %v1618_v33 = vor.u32 %v1821_v30, %v1617_v25  ;;  %v1574_v34 = vor.u32 %v1811_v28, %v1573_v27  ;;  %s2106_s19 = smov 64  }
  0x2a   : > { %700 = vmatpush.bf16.msra.mxu2 %v1630_v29  ;;  %v1561_v35 = vld [vmem:[#allocation2 + $0x30] sm:$0xf]  ;;  %v1605_v36 = vld [vmem:[#allocation2 + $0x80] sm:$0xf]  ;;  %v1818_v37 = vld [vmem:[#allocation2 + $0x88] sm:$0xf0]  ;;  %v1578_v38 = vor.u32 %v1810_v31, %v1575_v32 }
  0x2b   : > { %v1808_v39 = vld [vmem:[#allocation2 + $0x38] sm:$0xf0]  ;;  %v1807_v40 = vld [vmem:[#allocation2 + $0x34] sm:$0xf]  ;;  %v1563_v41 = vld [vmem:[#allocation2 + $0x3c] sm:$0xf0]  ;;  %v1606_v42 = vor.u32 %v1818_v37, %v1605_v36 }
  0x2c   : > { %676 = vmatpush.bf16.msra.mxu0 %v1598_v16  ;;  %v1562_v43 = vor.u32 %v1808_v39, %v1561_v35  ;;  %v1593_v44 = vld [vmem:[#allocation2 + $0x68] sm:$0xf]  ;;  %v1815_v45 = vld [vmem:[#allocation2 + $0x70] sm:$0xf0]  ;;  %v1566_v46 = vor.u32 %v1807_v40, %v1563_v41  ;;  %v1549_v47 = vld [vmem:[#allocation2 + $0x18] sm:$0xf] }
  0x2d   : > { %689 = vmatpush.bf16.msra.mxu1 %v1602_v17  ;;  %v1805_v48 = vld [vmem:[#allocation2 + $0x20] sm:$0xf0]  ;;  %v1804_v49 = vld [vmem:[#allocation2 + $0x1c] sm:$0xf]  ;;  %v1551_v50 = vld [vmem:[#allocation2 + $0x24] sm:$0xf0]  ;;  %v1594_v51 = vor.u32 %v1815_v45, %v1593_v44 }
  0x2e   : > { %701 = vmatpush.bf16.msra.mxu2 %v1618_v33  ;;  %s1533_s1 = sshll.u32 %s2378_s29, 3  ;;  %v1550_v52 = vor.u32 %v1805_v48, %v1549_v47  ;;  %v1581_v53 = vld [vmem:[#allocation2 + $0x50] sm:$0xf]  ;;  %v1812_v54 = vld [vmem:[#allocation2 + $0x58] sm:$0xf0]  ;;  %v1554_v55 = vor.u32 %v1804_v49, %v1551_v50  ;;  %s2107_s21 = smov 96   ;;  %v714_v33 = vlaneseq }
  0x2f   : > { %v1537_v56 = vld [vmem:[#allocation2] sm:$0xf]  ;;  %v1802_v57 = vld [vmem:[#allocation2 + $0x8] sm:$0xf0]  ;;  %s498_s25 = scalar_lea.vmem %s2352_s0, %s1533_s1  ;;  %v1801_v58 = vld [vmem:[#allocation2 + $0x4] sm:$0xf]  ;;  %v1582_v60 = vor.u32 %v1812_v54, %v1581_v53 }
  0x30   : > { %677 = vmatpush.bf16.msra.mxu0 %v1586_v22  ;;  %v1539_v59 = vld [vmem:[#allocation2 + $0xc] sm:$0xf0]  ;;  %v1538_v61 = vor.u32 %v1802_v57, %v1537_v56  ;;  %v2249_v62 = vld [vmem:[%s498_s25] sm:$0xff]  ;;  %v1569_v63 = vld [vmem:[#allocation2 + $0x38] sm:$0xf]  ;;  %s2108_s22 = smov 32  }
  0x31   : > { %690 = vmatpush.bf16.msra.mxu1 %v1590_v26  ;;  %v1809_v0 = vld [vmem:[#allocation2 + $0x40] sm:$0xf0]  ;;  %v1542_v1 = vor.u32 %v1801_v58, %v1539_v59  ;;  %v505_v2 = vpack.c.bf16 %v2249_v62, %v2249_v62  ;;  %v1557_v4 = vld [vmem:[#allocation2 + $0x20] sm:$0xf]  ;;  %v1806_v5 = vld [vmem:[#allocation2 + $0x28] sm:$0xf0] }
  0x32   : > { %702 = vmatpush.bf16.msra.mxu2 %v1606_v42  ;;  %v1570_v3 = vor.u32 %v1809_v0, %v1569_v63  ;;  %v1558_v6 = vor.u32 %v1806_v5, %v1557_v4  ;;  %v1545_v7 = vld [vmem:[#allocation2 + $0x8] sm:$0xf]  ;;  %v1803_v8 = vld [vmem:[#allocation2 + $0x10] sm:$0xf0]  ;;  %v538_v10 = vld [vmem:[%s2354_s2] sm:$0x7] }
  0x33   : > { %v1546_v9 = vor.u32 %v1803_v8, %v1545_v7  ;;  %v540_v11 = vperm.slane %v538_v10, 0  ;;  %v541_v12 = vperm.slane %v538_v10, 1  ;;  %v542_v24 = vperm.slane %v538_v10, 2 }
  0x34   : > { %678 = vmatpush.bf16.msra.mxu0 %v1574_v34  ;;  %vm759_vm1 = vcmask 1043456   ;;  %v715_v34 = vshrl.u32 %v714_v33, 7  ;;  %v717_v35 = vand.u32 127, %v714_v33  ;;  %vm743_vm3 = vcmask 64512  }
  0x35   : > { %691 = vmatpush.bf16.msra.mxu1 %v1578_v38  ;;  %vm963_vm4 = vcmask 523264   ;;  %vm965_vm5 = vcmask 785408  }
  0x36   : > { %703 = vmatpush.bf16.msra.mxu2 %v1594_v51  ;;  %vm718_vm2 = vcmp.le.s32.totalorder %v717_v35, %v715_v34 }
  0x38   : > { %679 = vmatpush.bf16.msra.mxu0 %v1562_v43 }
  0x39   : > { %692 = vmatpush.bf16.msra.mxu1 %v1566_v46 }
  0x3a   : > { %704 = vmatpush.bf16.msra.mxu2 %v1582_v60 }
  0x3c   : > { %680 = vmatpush.bf16.msra.mxu0 %v1550_v52 }
  0x3d   : > { %693 = vmatpush.bf16.msra.mxu1 %v1554_v55 }
  0x3e   : > { %705 = vmatpush.bf16.msra.mxu2 %v1570_v3 }
  0x40   : > { %681 = vmatpush.bf16.msra.mxu0 %v1538_v61 }
  0x41   : > { %694 = vmatpush.bf16.msra.mxu1 %v1542_v1 }
  0x42   : > { %706 = vmatpush.bf16.msra.mxu2 %v1558_v6 }
  0x43   : > { %682 = vmatmul.bf16.vlgmr.msra.gmra.mxu0 %v505_v2 }
  0x44   : > { %695 = vmatmul.bf16.vlgmr.msra.gmra.mxu1 %v505_v2 }
  0x46   : > { %707 = vmatpush.bf16.msra.mxu2 %v1546_v9 }
  0x49   : > { %708 = vmatmul.bf16.vlgmr.msra.gmra.mxu2 %v505_v2 }
  0xc0   : > { %v683_v13 = vpop.f32.mrf.mxu0 }
  0xc1   : > { %v696_v14 = vpop.f32.mrf.mxu1  ;;  %v684_v15 = vadd.f32 %v683_v13, %v540_v11 }
  0xc2   : > { %v697_v16 = vadd.f32 %v696_v14, %v541_v12 }
  0xc3   : > { %v713_v18 = vmul.f32 0.17677669, %v684_v15 }
  0xc4   : > { %v720_v17 = vpack.c.bf16 %v697_v16, %v697_v16 }
  0xc5   : > { %v719_v22 = vpack.c.bf16 %v713_v18, %v713_v18 }
  0xc6   : > { %838 = vrot.lane.b32.xlu2 %v720_v17, %s2106_s19  ;;  %780 = vrot.lane.b32.xlu1 %v720_v17, %s2107_s21  ;;  %v727_v19 = vsel %vm722_vm0, %v720_v17, 0 }
  0xc7   : > { %736 = vmatpush.bf16.xpose.msra.mxu3 %v727_v19 }
  0xc8   : > { %v685_v20 = vpop.f32.mrf.mxu0 }
  0xc9   : > { %v698_v21 = vpop.f32.mrf.mxu1 }
  0xcc   : > { %v709_v23 = vpop.f32.mrf.mxu2 }
  0xcd   : > { %v710_v25 = vadd.f32 %v709_v23, %v542_v24 }
  0xce   : > { %895 = vrot.lane.b32.xlu2 %v720_v17, %s2108_s22  ;;  %777 = vrot.lane.b32.xlu1 %v719_v22, %s2107_s21 }
  0xcf   : > { %1631 = vmatmul.msk.bf16.vlgmr.msra.gmra.mxu3 %vm722_vm0, %v719_v22  ;;  %v2263_v27 = vpack.c.bf16 %v710_v25, %v710_v25 }
  0xd1   : > { %v761_v28 = vsel %vm759_vm1, %v2263_v27, 0 }
  0xd2   : > { %770 = vmatpush.bf16.msrb.mxu3 %v761_v28 }
  0xd4   : > { %v711_v26 = vpop.f32.mrf.mxu2 }
  0xd6   : > { %893 = vrot.lane.b32.xlu1 %v719_v22, %s2108_s22 }
 0x120   : > { %v839_v29 = vpop.permute.xlu2 %838 }
 0x121   : > { %v844_v30 = vsel %vm722_vm0, %v839_v29, 0 }
 0x122   : > { %853 = vmatpush.bf16.xpose.msrb.mxu2 %v844_v30 }
 0x128   : > { %v896_v48 = vpop.permute.xlu2 %895 }
 0x129   : > { %v901_v50 = vsel %vm722_vm0, %v896_v48, 0  ;;  %v1828_v48 = vld [vmem:[#allocation4 + $0x18] sm:$0xff] }
 0x138   : > { %v781_v31 = vpop.permute.xlu1 %780 }
 0x139   : > { %v786_v32 = vsel %vm722_vm0, %v781_v31, 0 }
 0x13a   : > { %795 = vmatpush.bf16.xpose.msra.mxu3 %v786_v32 }
 0x140   : > { %v778_v52 = vpop.permute.xlu1 %777 }
 0x148   : > { %v894_v53 = vpop.permute.xlu1 %893 }
 0x152   : > { %v738_v36 = vpop.f32.mrf.mxu3 }
 0x153   : > { %v742_v37 = vsel %vm718_vm2, %v738_v36, -1e+30 }
 0x154   : > { %v744_v38 = vsel %vm743_vm3, %v742_v37, -inf }
 0x155   : > { %745 = vmax.xlane.f32.xlu0 %v744_v38 }
 0x15a   : > { %v740_v39 = vpop.f32.mrf.mxu3 }
 0x1c8   : > { %v746_v40 = vpop.xlane.xlu0 %745 }
 0x1c9   : > { %v747_v41 = vsub.f32 %v742_v37, %v746_v40 }
 0x1cb   : > { %v748_v42 = vmul.f32 1.442695, %v747_v41 }
 0x1cd   : > { %1930 = vpow2.f32 %v748_v42 }
 0x1d3   : > { %v1931_v43 = vpop.eup %1930 }
 0x1d4   : > { %v750_v44 = vsel %vm743_vm3, %v1931_v43, 0.0 }
 0x1d5   : > { %751 = vadd.xlane.f32.xlu0 %v750_v44  ;;  %v1832_v44 = vld [vmem:[#allocation4 + $0x38] sm:$0xff] }
 0x1d6   : > { %1036 = vmatpush.bf16.msrb.mxu1 %v1832_v44 }
 0x1e9   : > { %836 = vrot.lane.b32.xlu0 %v719_v22, %s2106_s19 }
 0x248   : > { %v752_v45 = vpop.xlane.xlu0 %751 }
 0x249   : > { %1932 = vrcp.f32 %v752_v45  ;;  %v1831_v45 = vld [vmem:[#allocation4 + $0x30] sm:$0xff] }
 0x24a   : > { %1037 = vmatpush.bf16.msrb.mxu1 %v1831_v45  ;;  %v1691_v45 = vld [vmem:[#allocation6 + $0x28] sm:$0xf0] }
 0x24f   : > { %v1933_v46 = vpop.eup %1932 }
 0x250   : > { %v754_v47 = vmul.f32 %v1933_v46, %v1931_v43  ;;  %v1830_v46 = vld [vmem:[#allocation4 + $0x28] sm:$0xff] }
 0x251   : > { %1038 = vmatpush.bf16.msrb.mxu1 %v1830_v46 }
 0x252   : > { %v755_v49 = vpack.c.bf16 %v754_v47, %v754_v47  ;;  %v1829_v47 = vld [vmem:[#allocation4 + $0x20] sm:$0xff] }
 0x254   : > { %1632 = vmatmul.msk.bf16.vlgmr.msrb.gmra.mxu3 %vm743_vm3, %v755_v49  ;;  %v1827_v49 = vld [vmem:[#allocation4 + $0x10] sm:$0xff] }
 0x255   : > { %910 = vmatpush.bf16.xpose.msrb.mxu3 %v901_v50  ;;  %1039 = vmatpush.bf16.msrb.mxu1 %v1829_v47  ;;  %v1826_v50 = vld [vmem:[#allocation4 + $0x8] sm:$0xff]  ;;  %v1681_v47 = vld [vmem:[#allocation6 + $0x10] sm:$0xf] }
 0x259   : > { %1040 = vmatpush.bf16.msrb.mxu1 %v1828_v48  ;;  %v1836_v48 = vld [vmem:[#allocation6 + $0x14] sm:$0xf0] }
 0x25b   : > { %v837_v51 = vpop.permute.xlu0 %836 }
 0x25c   : > { %1635 = vmatmul.msk.bf16.vlgmr.msrb.gmra.mxu2 %vm722_vm0, %v837_v51  ;;  %v1825_v51 = vld [vmem:[#allocation4] sm:$0xff] }
 0x25d   : > { %1041 = vmatpush.bf16.msrb.mxu1 %v1827_v49  ;;  %v1835_v49 = vld [vmem:[#allocation6 + $0x14] sm:$0xf] }
 0x261   : > { %1042 = vmatpush.bf16.msrb.mxu1 %v1826_v50  ;;  %v1682_v50 = vor.u32 %v1836_v48, %v1681_v47 }
 0x264   : > { %1633 = vmatmul.msk.bf16.vlgmr.msra.gmra.mxu3 %vm722_vm0, %v778_v52 }
 0x265   : > { %1043 = vmatpush.bf16.msrb.mxu1 %v1825_v51  ;;  %v1683_v51 = vld [vmem:[#allocation6 + $0x18] sm:$0xf0] }
 0x274   : > { %1637 = vmatmul.msk.bf16.vlgmr.msrb.gmra.mxu3 %vm722_vm0, %v894_v53 }
 0x2d7   : > { %v2278_v54 = vpop.f32.mrf.mxu3 }
 0x2df   : > { %v774_v55 = vpop.f32.mrf.mxu3  ;;  %v855_v56 = vpop.f32.mrf.mxu2 }
 0x2e0   : > { %v859_v57 = vsel %vm718_vm2, %v855_v56, -1e+30 }
 0x2e1   : > { %v860_v58 = vsel %vm743_vm3, %v859_v57, -inf }
 0x2e2   : > { %861 = vmax.xlane.f32.xlu1 %v860_v58 }
 0x2e7   : > { %v797_v59 = vpop.f32.mrf.mxu3  ;;  %v857_v60 = vpop.f32.mrf.mxu2 }
 0x2e8   : > { %v801_v61 = vsel %vm718_vm2, %v797_v59, -1e+30  ;;  %v1924_v60 = vld [vmem:[%s2356_s4] ss:$0 sm:$0xff] }
 0x2e9   : > { %v802_v63 = vsel %vm743_vm3, %v801_v61, -inf }
 0x2ea   : > { %803 = vmax.xlane.f32.xlu2 %v802_v63 }
 0x2ef   : > { %v799_v0 = vpop.f32.mrf.mxu3 }
 0x2f7   : > { %v912_v1 = vpop.f32.mrf.mxu3 }
 0x2f8   : > { %v916_v2 = vsel %vm718_vm2, %v912_v1, -1e+30 }
 0x2f9   : > { %v917_v3 = vsel %vm743_vm3, %v916_v2, -inf }
 0x2fa   : > { %918 = vmax.xlane.f32.xlu0 %v917_v3  ;;  %v1729_v3 = vld [vmem:[#allocation6 + $0x70] sm:$0xf] }
 0x2ff   : > { %v914_v4 = vpop.f32.mrf.mxu3 }
 0x300   : > { %v1848_v4 = vld [vmem:[#allocation6 + $0x74] sm:$0xf0] }
 0x30e   : > { %872 = vrot.lane.b32.xlu0 %v2263_v27, %s2106_s19 }
 0x355   : > { %v862_v5 = vpop.xlane.xlu1 %861 }
 0x356   : > { %v863_v6 = vsub.f32 %v859_v57, %v862_v5  ;;  %v1730_v5 = vor.u32 %v1848_v4, %v1729_v3 }
 0x358   : > { %v864_v7 = vmul.f32 1.442695, %v863_v6  ;;  %v1731_v6 = vld [vmem:[#allocation6 + $0x78] sm:$0xf0] }
 0x35a   : > { %1934 = vpow2.f32 %v864_v7 }
 0x35d   : > { %v804_v8 = vpop.xlane.xlu2 %803 }
 0x35e   : > { %v805_v9 = vsub.f32 %v801_v61, %v804_v8 }
 0x360   : > { %v1935_v10 = vpop.eup %1934  ;;  %v806_v11 = vmul.f32 1.442695, %v805_v9 }
 0x361   : > { %v866_v12 = vsel %vm743_vm3, %v1935_v10, 0.0 }
 0x362   : > { %1936 = vpow2.f32 %v806_v11  ;;  %867 = vadd.xlane.f32.xlu1 %v866_v12 }
 0x368   : > { %v1937_v13 = vpop.eup %1936 }
 0x369   : > { %v808_v14 = vsel %vm743_vm3, %v1937_v13, 0.0 }
 0x36a   : > { %809 = vadd.xlane.f32.xlu2 %v808_v14 }
 0x36d   : > { %v919_v15 = vpop.xlane.xlu0 %918 }
 0x36e   : > { %v920_v16 = vsub.f32 %v916_v2, %v919_v15  ;;  %v2109_v2 = vmov 128.0  }
 0x370   : > { %v921_v17 = vmul.f32 1.442695, %v920_v16 }
 0x372   : > { %1938 = vpow2.f32 %v921_v17  ;;  %v1721_v17 = vld [vmem:[#allocation6 + $0x60] sm:$0xf] }
 0x378   : > { %v1939_v18 = vpop.eup %1938 }
 0x379   : > { %v923_v19 = vsel %vm743_vm3, %v1939_v18, 0.0 }
 0x37a   : > { %924 = vadd.xlane.f32.xlu1 %v923_v19  ;;  %v1845_v19 = vld [vmem:[#allocation6 + $0x64] sm:$0xf] }
 0x380   : > { %v873_v20 = vpop.permute.xlu0 %872 }
 0x381   : > { %v878_v21 = vsel %vm759_vm1, %v873_v20, 0 }
 0x382   : > { %815 = vrot.lane.b32.xlu2 %v2263_v27, %s2107_s21  ;;  %887 = vmatpush.bf16.msra.mxu2 %v878_v21  ;;  %v1723_v21 = vld [vmem:[#allocation6 + $0x68] sm:$0xf0] }
 0x386   : > { %1190 = vmatpush.bf16.msrb.mxu2 %v1730_v5 }
 0x393   : > { %929 = vrot.lane.b32.xlu1 %v2263_v27, %s2108_s22 }
 0x3d5   : > { %v868_v22 = vpop.xlane.xlu1 %867 }
 0x3d6   : > { %1940 = vrcp.f32 %v868_v22  ;;  %v1726_v22 = vor.u32 %v1845_v19, %v1723_v21  ;;  %v1861_v19 = vld [vmem:[#allocation7 + $0x60] sm:$0xff]  ;;  %v1860_v21 = vld [vmem:[#allocation7 + $0x58] sm:$0xff] }
 0x3dc   : > { %v1941_v23 = vpop.eup %1940 }
 0x3dd   : > { %v870_v24 = vmul.f32 %v1941_v23, %v1935_v10  ;;  %v810_v25 = vpop.xlane.xlu2 %809  ;;  %v1713_v23 = vld [vmem:[#allocation6 + $0x50] sm:$0xf] }
 0x3de   : > { %1942 = vrcp.f32 %v810_v25  ;;  %v1843_v25 = vld [vmem:[#allocation6 + $0x54] sm:$0xf] }
 0x3df   : > { %v871_v26 = vpack.c.bf16 %v870_v24, %v870_v24  ;;  %v1844_v24 = vld [vmem:[#allocation6 + $0x54] sm:$0xf0] }
 0x3e1   : > { %1636 = vmatmul.msk.bf16.vlgmr.msra.gmra.mxu2 %vm743_vm3, %v871_v26  ;;  %v1714_v26 = vor.u32 %v1844_v24, %v1713_v23  ;;  %v1859_v23 = vld [vmem:[#allocation7 + $0x50] sm:$0xff]  ;;  %v1850_v24 = vld [vmem:[#allocation7 + $0x8] sm:$0xff] }
 0x3e4   : > { %v1943_v28 = vpop.eup %1942 }
 0x3e5   : > { %v812_v29 = vmul.f32 %v1943_v28, %v1937_v13  ;;  %v816_v30 = vpop.permute.xlu2 %815  ;;  %v1715_v28 = vld [vmem:[#allocation6 + $0x58] sm:$0xf0] }
 0x3e6   : > { %v821_v31 = vsel %vm759_vm1, %v816_v30, 0  ;;  %v1705_v30 = vld [vmem:[#allocation6 + $0x40] sm:$0xf] }
 0x3e7   : > { %830 = vmatpush.bf16.msrb.mxu0 %v821_v31  ;;  %v813_v32 = vpack.c.bf16 %v812_v29, %v812_v29  ;;  %v1718_v29 = vor.u32 %v1843_v25, %v1715_v28  ;;  %v1842_v31 = vld [vmem:[#allocation6 + $0x44] sm:$0xf0]  ;;  %v1857_v28 = vld [vmem:[#allocation7 + $0x40] sm:$0xff] }
 0x3e8   : > { %v1858_v25 = vld [vmem:[#allocation7 + $0x48] sm:$0xff] }
 0x3ea   : > { %1634 = vmatmul.msk.bf16.vlgmr.msrb.gmra.mxu0 %vm743_vm3, %v813_v32  ;;  %v1841_v32 = vld [vmem:[#allocation6 + $0x44] sm:$0xf] }
 0x3ed   : > { %v925_v33 = vpop.xlane.xlu1 %924 }
 0x3ee   : > { %1944 = vrcp.f32 %v925_v33  ;;  %v1706_v33 = vor.u32 %v1842_v31, %v1705_v30 }
 0x3ef   : > { %1946 = vrcp.f32 %v2109_v2 }
 0x3f4   : > { %v1945_v27 = vpop.eup %1944 }
 0x3f5   : > { %v927_v34 = vmul.f32 %v1945_v27, %v1939_v18  ;;  %v1947_v8 = vpop.eup %1946  ;;  %v1846_v18 = vld [vmem:[#allocation6 + $0x64] sm:$0xf0]  ;;  %v1707_v27 = vld [vmem:[#allocation6 + $0x48] sm:$0xf0] }
 0x3f6   : > { %v1055_v9 = vmul.f32 128.0, %v1947_v8  ;;  %vm1059_vm6 = vweird.f32 %v1947_v8  ;;  %v1722_v20 = vor.u32 %v1846_v18, %v1721_v17  ;;  %v1854_v17 = vld [vmem:[#allocation7 + $0x28] sm:$0xff] }
 0x3f7   : > { %v928_v37 = vpack.c.bf16 %v927_v34, %v927_v34  ;;  %v1710_v34 = vor.u32 %v1841_v32, %v1707_v27  ;;  %v1862_v18 = vld [vmem:[#allocation7 + $0x68] sm:$0xff] }
 0x3f8   : > { %v1056_v10 = vsub.f32 1.0, %v1055_v9  ;;  %1191 = vmatpush.bf16.msrb.mxu2 %v1722_v20  ;;  %v1852_v20 = vld [vmem:[#allocation7 + $0x18] sm:$0xff] }
 0x3fa   : > { %v1057_v11 = vmul.f32 %v1947_v8, %v1056_v10  ;;  %v1926_v10 = vld [vmem:[%s2358_s6] ss:$0 sm:$0xff] }
 0x3fc   : > { %v1058_v12 = vadd.f32 %v1947_v8, %v1057_v11  ;;  %1192 = vmatpush.bf16.msrb.mxu2 %v1714_v26  ;;  %v1849_v26 = vld [vmem:[#allocation7] sm:$0xff] }
 0x3fe   : > { %v2310_v13 = vsel %vm1059_vm6, %v1947_v8, %v1058_v12 }
 0x400   : > { %1193 = vmatpush.bf16.msrb.mxu2 %v1706_v33 }
 0x405   : > { %v930_v35 = vpop.permute.xlu1 %929 }
 0x406   : > { %v935_v36 = vsel %vm759_vm1, %v930_v35, 0  ;;  %v1697_v35 = vld [vmem:[#allocation6 + $0x30] sm:$0xf] }
 0x407   : > { %944 = vmatpush.bf16.msra.mxu0 %v935_v36  ;;  %v1840_v36 = vld [vmem:[#allocation6 + $0x34] sm:$0xf0] }
 0x40a   : > { %1638 = vmatmul.msk.bf16.vlgmr.msra.gmra.mxu0 %vm743_vm3, %v928_v37  ;;  %v1839_v37 = vld [vmem:[#allocation6 + $0x34] sm:$0xf] }
 0x464   : > { %v889_v38 = vpop.f32.mrf.mxu2 }
 0x467   : > { %v832_v39 = vpop.f32.mrf.mxu0 }
 0x468   : > { %951 = vrot.lane.b32.xlu2 %v832_v39, %s2108_s22  ;;  %v1699_v39 = vld [vmem:[#allocation6 + $0x38] sm:$0xf0] }
 0x46c   : > { %v891_v40 = vpop.f32.mrf.mxu2 }
 0x46d   : > { %v1702_v40 = vor.u32 %v1839_v37, %v1699_v39 }
 0x46f   : > { %v834_v41 = vpop.f32.mrf.mxu0 }
 0x470   : > { %955 = vrot.lane.b32.xlu2 %v889_v38, %s2106_s19  ;;  %v1698_v38 = vor.u32 %v1840_v36, %v1697_v35  ;;  %v1689_v41 = vld [vmem:[#allocation6 + $0x20] sm:$0xf] }
 0x472   : > { %1194 = vmatpush.bf16.msrb.mxu2 %v1698_v38 }
 0x487   : > { %v946_v42 = vpop.f32.mrf.mxu0 }
 0x488   : > { %959 = vrot.lane.b32.xlu0 %v946_v42, %s2107_s21  ;;  %v1838_v42 = vld [vmem:[#allocation6 + $0x24] sm:$0xf0]  ;;  %s2375_s21 = sld [smem:[#allocation15_spill]] }
 0x489   : > { %v1690_v44 = vor.u32 %v1838_v42, %v1689_v41 }
 0x48b   : > { %1195 = vmatpush.bf16.msrb.mxu2 %v1690_v44 }
 0x48e   : > { %s502_s22 = scalar_lea.vmem %s2375_s21, %s1533_s1 }
 0x48f   : > { %v948_v43 = vpop.f32.mrf.mxu0  ;;  %1196 = vmatpush.bf16.msrb.mxu2 %v1682_v50 }
 0x490   : > { %v1837_v43 = vld [vmem:[#allocation6 + $0x24] sm:$0xf] }
 0x491   : > { %v1694_v46 = vor.u32 %v1837_v43, %v1691_v45 }
 0x4c2   : > { %v952_v52 = vpop.permute.xlu2 %951 }
 0x4c3   : > { %v962_v55 = vsel %vm722_vm0, %v2278_v54, %v952_v52  ;;  %v1847_v54 = vld [vmem:[#allocation6 + $0x74] sm:$0xf]  ;;  %v1673_v52 = vld [vmem:[#allocation6] sm:$0xf] }
 0x4c4   : > { %v1734_v7 = vor.u32 %v1847_v54, %v1731_v6 }
 0x4c6   : > { %1203 = vmatpush.bf16.msra.mxu3 %v1734_v7  ;;  %v1925_v7 = vld [vmem:[%s2357_s5] ss:$0 sm:$0xff] }
 0x4ca   : > { %v956_v53 = vpop.permute.xlu2 %955  ;;  %1204 = vmatpush.bf16.msra.mxu3 %v1726_v22  ;;  %v1851_v22 = vld [vmem:[#allocation7 + $0x10] sm:$0xff] }
 0x4cb   : > { %v964_v56 = vsel %vm963_vm4, %v962_v55, %v956_v53  ;;  %v1834_v53 = vld [vmem:[#allocation6 + $0x4] sm:$0xf0]  ;;  %v1686_v55 = vor.u32 %v1835_v49, %v1683_v51 }
 0x4ce   : > { %1205 = vmatpush.bf16.msra.mxu3 %v1718_v29  ;;  %v1104_v29 = vld [vmem:[%s2360_s8] sm:$0x3] }
 0x4cf   : > { %v1106_v30 = vperm.slane %v1104_v29, 0  ;;  %v1107_v31 = vperm.slane %v1104_v29, 1 }
 0x4d2   : > { %1206 = vmatpush.bf16.msra.mxu3 %v1710_v34 }
 0x4d6   : > { %1207 = vmatpush.bf16.msra.mxu3 %v1702_v40 }
 0x4da   : > { %1208 = vmatpush.bf16.msra.mxu3 %v1694_v46 }
 0x4de   : > { %1209 = vmatpush.bf16.msra.mxu3 %v1686_v55 }
 0x4fa   : > { %v960_v57 = vpop.permute.xlu0 %959 }
 0x4fb   : > { %v966_v58 = vsel %vm965_vm5, %v964_v56, %v960_v57  ;;  %v1833_v56 = vld [vmem:[#allocation6 + $0x4] sm:$0xf]  ;;  %v1675_v57 = vld [vmem:[#allocation6 + $0x8] sm:$0xf0] }
 0x4fc   : > { %v967_v59 = vpack.c.bf16 %v966_v58, %v966_v58  ;;  %v1674_v58 = vor.u32 %v1834_v53, %v1673_v52 }
 0x4fe   : > { %1044 = vmatmul.bf16.vlgmr.msrb.gmra.mxu1 %v967_v59  ;;  %v1678_v59 = vor.u32 %v1833_v56, %v1675_v57  ;;  %1197 = vmatpush.bf16.msrb.mxu2 %v1674_v58  ;;  %v1927_v58 = vld [vmem:[%s2362_s10] ss:$0 sm:$0xff] }
 0x500   : > { %1210 = vmatpush.bf16.msra.mxu3 %v1678_v59 }
 0x57b   : > { %v1045_v61 = vpop.f32.mrf.mxu1 }
 0x57c   : > { %v1046_v63 = vadd.f32 %v1924_v60, %v1045_v61  ;;  %v1856_v60 = vld [vmem:[#allocation7 + $0x38] sm:$0xff] }
 0x57d   : > { %v1864_v61 = vld [vmem:[#allocation7 + $0x78] sm:$0xff]  ;;  %1368 = vmatpush.bf16.msrb.mxu0 %v1856_v60 }
 0x57e   : > { %v1049_v0 = vadd.f32 %v1046_v63, %v2249_v62  ;;  %1381 = vmatpush.bf16.msra.mxu1 %v1864_v61 }
 0x580   : > { %1052 = vadd.xlane.f32.xlu2 %v1049_v0 }
 0x583   : > { %v1047_v1 = vpop.f32.mrf.mxu1 }
 0x5f3   : > { %v1053_v62 = vpop.xlane.xlu2 %1052 }
 0x5f4   : > { %v1061_v14 = vmul.f32 %v2310_v13, %v1053_v62 }
 0x5f6   : > { %v2313_v15 = vsub.f32 %v1049_v0, %v1061_v14  ;;  %v1855_v14 = vld [vmem:[#allocation7 + $0x30] sm:$0xff] }
 0x5f7   : > { %1369 = vmatpush.bf16.msrb.mxu0 %v1855_v14 }
 0x5f8   : > { %v1063_v16 = vmul.f32 %v2313_v15, %v2313_v15 }
 0x5fa   : > { %1064 = vadd.xlane.f32.xlu0 %v1063_v16  ;;  %v1863_v16 = vld [vmem:[#allocation7 + $0x70] sm:$0xff] }
 0x5fb   : > { %1382 = vmatpush.bf16.msra.mxu1 %v1863_v16  ;;  %1370 = vmatpush.bf16.msrb.mxu0 %v1854_v17  ;;  %v1928_v16 = vld [vmem:[%s2363_s11] ss:$0 sm:$0xff] }
 0x5ff   : > { %1383 = vmatpush.bf16.msra.mxu1 %v1862_v18 }
 0x603   : > { %1384 = vmatpush.bf16.msra.mxu1 %v1861_v19 }
 0x607   : > { %1385 = vmatpush.bf16.msra.mxu1 %v1860_v21 }
 0x60b   : > { %1386 = vmatpush.bf16.msra.mxu1 %v1859_v23 }
 0x60f   : > { %1387 = vmatpush.bf16.msra.mxu1 %v1858_v25 }
 0x613   : > { %1388 = vmatpush.bf16.msra.mxu1 %v1857_v28 }
 0x66d   : > { %v1065_v63 = vpop.xlane.xlu0 %1064 }
 0x66e   : > { %v1066_v0 = vmul.f32 %v1065_v63, %v2310_v13 }
 0x670   : > { %v1067_v1 = vadd.f32 1e-05, %v1066_v0 }
 0x672   : > { %1948 = vrsqrt.f32 %v1067_v1  ;;  %vm1074_vm8 = vweird.f32 %v1067_v1 }
 0x678   : > { %v1949_v2 = vpop.eup %1948 }
 0x679   : > { %v1069_v3 = vmul.f32 %v1949_v2, %v1067_v1  ;;  %vm1075_vm7 = vweird.f32 %v1949_v2 }
 0x67a   : > { %vm1076_vm9 = vmor %vm1074_vm8, %vm1075_vm7 }
 0x67b   : > { %v1070_v4 = vmul.f32 %v1949_v2, %v1069_v3 }
 0x67d   : > { %v1071_v54 = vmul.f32 0.5, %v1070_v4 }
 0x67f   : > { %v1072_v5 = vsub.f32 1.5, %v1071_v54 }
 0x681   : > { %v1073_v6 = vmul.f32 %v1949_v2, %v1072_v5 }
 0x683   : > { %v1077_v8 = vsel %vm1076_vm9, %v1949_v2, %v1073_v6 }
 0x684   : > { %v1078_v9 = vmul.f32 %v1077_v8, %v2313_v15  ;;  %v1853_v15 = vld [vmem:[#allocation7 + $0x20] sm:$0xff] }
 0x685   : > { %1371 = vmatpush.bf16.msrb.mxu0 %v1853_v15 }
 0x686   : > { %v1082_v11 = vmul.f32 %v1925_v7, %v1078_v9 }
 0x688   : > { %v2325_v12 = vadd.f32 %v1926_v10, %v1082_v11 }
 0x689   : > { %1372 = vmatpush.bf16.msrb.mxu0 %v1852_v20 }
 0x68a   : > { %v1087_v62 = vpack.c.bf16 %v2325_v12, %v2325_v12 }
 0x68c   : > { %1198 = vmatmul.bf16.vlgmr.msrb.gmra.mxu2 %v1087_v62  ;;  %1211 = vmatmul.bf16.vlgmr.msra.gmra.mxu3 %v1087_v62 }
 0x68d   : > { %1373 = vmatpush.bf16.msrb.mxu0 %v1851_v22 }
 0x691   : > { %1374 = vmatpush.bf16.msrb.mxu0 %v1850_v24 }
 0x695   : > { %1375 = vmatpush.bf16.msrb.mxu0 %v1849_v26 }
 0x70f   : > { %v1199_v32 = vpop.f32.mrf.mxu2  ;;  %v1212_v33 = vpop.f32.mrf.mxu3 }
 0x710   : > { %v1200_v27 = vadd.f32 %v1199_v32, %v1106_v30  ;;  %v1213_v34 = vadd.f32 %v1212_v33, %v1107_v31 }
 0x712   : > { %v1216_v35 = vmul.f32 %v1200_v27, %v1200_v27  ;;  %v1217_v36 = vmul.f32 %v1213_v34, %v1213_v34 }
 0x714   : > { %v1218_v37 = vmul.f32 %v1216_v35, %v1200_v27  ;;  %v1219_v38 = vmul.f32 %v1217_v36, %v1213_v34 }
 0x716   : > { %v1220_v39 = vmul.f32 0.044715, %v1218_v37  ;;  %v1221_v40 = vmul.f32 0.044715, %v1219_v38 }
 0x717   : > { %v1201_v41 = vpop.f32.mrf.mxu2  ;;  %v1214_v42 = vpop.f32.mrf.mxu3 }
 0x718   : > { %v1222_v43 = vadd.f32 %v1220_v39, %v1200_v27  ;;  %v1223_v44 = vadd.f32 %v1221_v40, %v1213_v34 }
 0x71a   : > { %v1224_v45 = vmul.f32 0.7978846, %v1222_v43  ;;  %v1225_v46 = vmul.f32 0.7978846, %v1223_v44 }
 0x71c   : > { %1950 = vtanh.f32 %v1224_v45 }
 0x71d   : > { %1952 = vtanh.f32 %v1225_v46 }
 0x722   : > { %v1951_v47 = vpop.eup %1950 }
 0x723   : > { %v1953_v48 = vpop.eup %1952  ;;  %v1228_v49 = vadd.f32 1.0, %v1951_v47 }
 0x724   : > { %v1229_v50 = vadd.f32 1.0, %v1953_v48 }
 0x725   : > { %v1230_v51 = vmul.f32 0.5, %v1228_v49 }
 0x726   : > { %v1231_v52 = vmul.f32 0.5, %v1229_v50 }
 0x727   : > { %v1232_v53 = vmul.f32 %v1230_v51, %v1200_v27 }
 0x728   : > { %v1233_v55 = vmul.f32 %v1231_v52, %v1213_v34 }
 0x729   : > { %v1234_v56 = vpack.c.bf16 %v1232_v53, %v1232_v53 }
 0x72a   : > { %v1235_v57 = vpack.c.bf16 %v1233_v55, %v1233_v55 }
 0x72b   : > { %1376 = vmatmul.bf16.vlgmr.msrb.gmra.mxu0 %v1234_v56 }
 0x72c   : > { %1389 = vmatmul.bf16.vlgmr.msra.gmra.mxu1 %v1235_v57 }
 0x7a8   : > { %v1377_v59 = vpop.f32.mrf.mxu0 }
 0x7a9   : > { %v1378_v60 = vadd.f32 %v1927_v58, %v1377_v59  ;;  %v1390_v61 = vpop.f32.mrf.mxu1 }
 0x7ab   : > { %v1391_v63 = vadd.f32 %v1390_v61, %v1378_v60 }
 0x7ad   : > { %v1394_v0 = vadd.f32 %v1391_v63, %v2325_v12 }
 0x7af   : > { %1397 = vadd.xlane.f32.xlu1 %v1394_v0 }
 0x7b0   : > { %v1379_v1 = vpop.f32.mrf.mxu0 }
 0x7b1   : > { %v1392_v2 = vpop.f32.mrf.mxu1 }
 0x822   : > { %v1398_v3 = vpop.xlane.xlu1 %1397 }
 0x823   : > { %v1399_v4 = vmul.f32 %v1398_v3, %v2310_v13 }
 0x825   : > { %v1400_v54 = vsub.f32 %v1394_v0, %v1399_v4 }
 0x827   : > { %v1401_v5 = vmul.f32 %v1400_v54, %v1400_v54 }
 0x829   : > { %1402 = vadd.xlane.f32.xlu2 %v1401_v5 }
 0x89c   : > { %v1403_v6 = vpop.xlane.xlu2 %1402 }
 0x89d   : > { %v1404_v7 = vmul.f32 %v1403_v6, %v2310_v13  ;;  %v1929_v13 = vld [vmem:[%s2364_s12] ss:$0 sm:$0xff] }
 0x89f   : > { %v1405_v8 = vadd.f32 1e-05, %v1404_v7 }
 0x8a1   : > { %1954 = vrsqrt.f32 %v1405_v8  ;;  %vm1412_vm11 = vweird.f32 %v1405_v8 }
 0x8a7   : > { %v1955_v9 = vpop.eup %1954 }
 0x8a8   : > { %v1407_v10 = vmul.f32 %v1955_v9, %v1405_v8  ;;  %vm1413_vm10 = vweird.f32 %v1955_v9 }
 0x8a9   : > { %vm1414_vm12 = vmor %vm1412_vm11, %vm1413_vm10 }
 0x8aa   : > { %v1408_v11 = vmul.f32 %v1955_v9, %v1407_v10 }
 0x8ac   : > { %v1409_v62 = vmul.f32 0.5, %v1408_v11 }
 0x8ae   : > { %v1410_v12 = vsub.f32 1.5, %v1409_v62 }
 0x8b0   : > { %v1411_v14 = vmul.f32 %v1955_v9, %v1410_v12 }
 0x8b2   : > { %v1415_v17 = vsel %vm1414_vm12, %v1955_v9, %v1411_v14 }
 0x8b3   : > { %v1416_v18 = vmul.f32 %v1415_v17, %v1400_v54 }
 0x8b5   : > { %v1420_v15 = vmul.f32 %v1928_v16, %v1416_v18 }
 0x8b7   : > { %v1424_v19 = vadd.f32 %v1929_v13, %v1420_v15 }
 0x8b9   : > { %1425 = vst [vmem:[%s502_s22] sm:$0xff] %v1424_v19 }
 0x8ba PF: > { %s2376_s23 = sld [smem:[#allocation12_spill]] }
 0x8c0   : > { %s26_s25 = sadd.s32 1, %s2376_s23  }
 0x8c1   : > { %p23_p7 = scmp.ge.s32.totalorder %s26_s25, 4  }
 0x8c3   :  { %25 = sbr.rel (!%p23_p7) target bundleno = 7 (0x7), region = 119 }
 0x8c8   :  { %1445 = vsyncpa [#allocation3], 1 }
 0x8c9   :  { %1447 = vsyncpa [#allocation3 + $0x1], 1 }
 0x8ca   :  { %1448 = vsyncpa [#allocation5], 1 }
 0x8cb   :  { %1449 = vsyncpa [#allocation8], 1 }

// kernel: discriminator_forward.5
= control target key start
LH: loop header
LB: loop body
LE: loop exit
PB: predicated region body
PF: predicated region fallthrough
CT: control target
= control target key end

     0   :  { %18 = vsyncpa [#allocation3], 0  ;;  %s2352_s0 = inlined_call_operand.vmem [shape: f32[2,8,128], index: 0, kind: input, shape index: {}]   ;;  %s2353_s1 = inlined_call_operand.vmem [shape: bf16[128,384], index: 1, kind: input, shape index: {}]   ;;  %s2354_s2 = inlined_call_operand.vmem [shape: f32[1,384], index: 2, kind: input, shape index: {}]   ;;  %s2355_s3 = inlined_call_operand.vmem [shape: bf16[128,128], index: 3, kind: input, shape index: {}]   ;;  %s2356_s4 = inlined_call_operand.vmem [shape: f32[1,128], index: 4, kind: input, shape index: {}]   ;;  %s2357_s5 = inlined_call_operand.vmem [shape: f32[1,128], index: 5, kind: input, shape index: {}]   ;;  %s2358_s6 = inlined_call_operand.vmem [shape: f32[1,128], index: 6, kind: input, shape index: {}]   ;;  %s2359_s7 = inlined_call_operand.hbm [shape: bf16[128,256], index: 7, kind: input, shape index: {}]   ;;  %s2360_s8 = inlined_call_operand.vmem [shape: f32[1,256], index: 8, kind: input, shape index: {}]   ;;  %s2361_s9 = inlined_call_operand.hbm [shape: bf16[256,128], index: 9, kind: input, shape index: {}]   ;;  %s2362_s10 = inlined_call_operand.vmem [shape: f32[1,128], index: 10, kind: input, shape index: {}]   ;;  %s2363_s11 = inlined_call_operand.vmem [shape: f32[1,128], index: 11, kind: input, shape index: {}]   ;;  %s2364_s12 = inlined_call_operand.vmem [shape: f32[1,128], index: 12, kind: input, shape index: {}]   ;;  %s2365_s13 = inlined_call_operand.vmem [shape: f32[2,8,128], index: 13, kind: output, shape index: {}]  }
   0x1   :  { %19 = vsyncpa [#allocation5], 0  ;;  %s2034_s25 = smov 0  }
   0x2 LB: > { %s363_s28 = sshll.u32 %s2359_s7, 4  ;;  %s2043_s29 = sadd.s32 4294967295, %s1952_s25   ;;  %s1952_s25 = sphi %s2034_s25, %s25_s25   ;;  %s364_s28 = int_to_ptr.hbm [resolvable:$true] %s363_s28 }
   0x3   : > { %p1470_p0 = scmp.ge.s32.totalorder %s1952_s25, 1  ;;  %p334_p1 = scmp.lt.s32.totalorder %s1952_s25, 3 }
   0x4   : > { %p1824_p2 = scmp.eq.s32.totalorder %s2043_s29, 0  ;;  %s1954_s14 = smov [#allocation2]  }
   0x5   : > { %p2048_p3 = pnand %p1470_p0, %p334_p1  ;;  %s365_s15 = sshll.u32 %s1954_s14, 4  ;;  %s366_s15 = int_to_ptr.vmem [resolvable:$true] %s365_s15 }
   0x6   : > { %s380_s18 = sshll.u32 %s2361_s9, 4  ;;  %s1955_s19 = smov [#allocation4]   ;;  %s381_s18 = int_to_ptr.hbm [resolvable:$true] %s380_s18 }
   0x7   : > { %p1817_p4 = pneg %p2048_p3  ;;  %s382_s20 = sshll.u32 %s1955_s19, 4  ;;  %s383_s20 = int_to_ptr.vmem [resolvable:$true] %s382_s20 }
   0x8   : > { %s1956_s21 = smov 128   ;;  %s1957_s22 = smov 8  }
   0x9   : > { %p1818_p5 = pnand %p1824_p2, %p1817_p4  ;;  %s1958_s23 = smov 64  }
   0xa   : > { %s1959_s24 = smov 4   ;;  %414 = sbr.rel (%p2048_p3) target bundleno = 2219 (0x8ab), region = 72 }
   0xb   : > { %1820 = dma.hbm_to_vmem [thread:$0]  (!%p1818_p5), %s364_s28, 2048, %s366_s15, [#allocation3], %s1956_s21, %s1956_s21, %s1957_s22  }
   0xc   : > { %1823 = dma.hbm_to_vmem [thread:$0]  (!%p1818_p5), %s381_s18, 2048, %s383_s20, [#allocation5], %s1958_s23, %s1958_s23, %s1959_s24  }
   0xf   : > { %1943 = dma.done.wait (%p1824_p2), [#allocation3], 2048  }
  0x10   : > { %1945 = vsyncadd (%p1824_p2), [#allocation3], 4294965248 }
  0x11   : > { %1947 = dma.done.wait (%p1824_p2), [#allocation5], 2048  }
  0x12   : > { %1949 = vsyncadd (%p1824_p2), [#allocation5], 4294965248  ;;  %v1565_v0 = vld [vmem:[%s2353_s1 + $0xa8] sm:$0xf]  ;;  %v1767_v1 = vld [vmem:[%s2353_s1 + $0xb0] sm:$0xf0] }
  0x13   : > { %v1766_v2 = vld [vmem:[%s2353_s1 + $0xac] sm:$0xf]  ;;  %v1566_v3 = vor.u32 %v1767_v1, %v1565_v0  ;;  %v1567_v4 = vld [vmem:[%s2353_s1 + $0xb4] sm:$0xf0]  ;;  %v1553_v5 = vld [vmem:[%s2353_s1 + $0x90] sm:$0xf] }
  0x14   : > { %v1764_v6 = vld [vmem:[%s2353_s1 + $0x98] sm:$0xf0]  ;;  %v1570_v7 = vor.u32 %v1766_v2, %v1567_v4  ;;  %v1763_v8 = vld [vmem:[%s2353_s1 + $0x94] sm:$0xf]  ;;  %v1555_v9 = vld [vmem:[%s2353_s1 + $0x9c] sm:$0xf0] }
  0x15   : > { %641 = vmatpush.bf16.msra.mxu0 %v1566_v3  ;;  %v1554_v10 = vor.u32 %v1764_v6, %v1553_v5  ;;  %v1558_v11 = vor.u32 %v1763_v8, %v1555_v9  ;;  %v1541_v12 = vld [vmem:[%s2353_s1 + $0x78] sm:$0xf]  ;;  %v1761_v13 = vld [vmem:[%s2353_s1 + $0x80] sm:$0xf0]  ;;  %v1760_v14 = vld [vmem:[%s2353_s1 + $0x7c] sm:$0xf] }
  0x16   : > { %654 = vmatpush.bf16.msra.mxu1 %v1570_v7  ;;  %v1543_v15 = vld [vmem:[%s2353_s1 + $0x84] sm:$0xf0]  ;;  %v1542_v16 = vor.u32 %v1761_v13, %v1541_v12  ;;  %v1529_v18 = vld [vmem:[%s2353_s1 + $0x60] sm:$0xf]  ;;  %v1758_v19 = vld [vmem:[%s2353_s1 + $0x68] sm:$0xf0] }
  0x17   : > { %v1546_v17 = vor.u32 %v1760_v14, %v1543_v15  ;;  %v1757_v20 = vld [vmem:[%s2353_s1 + $0x64] sm:$0xf]  ;;  %v1531_v21 = vld [vmem:[%s2353_s1 + $0x6c] sm:$0xf0]  ;;  %p462_p6 = scmp.lt.s32.totalorder %s2043_s29, 1  ;;  %v1530_v22 = vor.u32 %v1758_v19, %v1529_v18  ;;  %vm689_vm0 = vcmask 261120  }
  0x18   : > { %v1573_v23 = vld [vmem:[%s2353_s1 + $0xb0] sm:$0xf]  ;;  %v1768_v24 = vld [vmem:[%s2353_s1 + $0xb8] sm:$0xf0]  ;;  %v1561_v25 = vld [vmem:[%s2353_s1 + $0x98] sm:$0xf]  ;;  %v1534_v26 = vor.u32 %v1757_v20, %v1531_v21 }
  0x19   : > { %642 = vmatpush.bf16.msra.mxu0 %v1554_v10  ;;  %v1517_v27 = vld [vmem:[%s2353_s1 + $0x48] sm:$0xf]  ;;  %v1755_v28 = vld [vmem:[%s2353_s1 + $0x50] sm:$0xf0]  ;;  %v1574_v29 = vor.u32 %v1768_v24, %v1573_v23  ;;  %v1765_v30 = vld [vmem:[%s2353_s1 + $0xa0] sm:$0xf0] }
  0x1a   : > { %655 = vmatpush.bf16.msra.mxu1 %v1558_v11  ;;  %v1754_v31 = vld [vmem:[%s2353_s1 + $0x4c] sm:$0xf]  ;;  %v1519_v32 = vld [vmem:[%s2353_s1 + $0x54] sm:$0xf0]  ;;  %s2368_s29 = smov (!%p462_p6, %s2043_s29), 1  ;;  %v1562_v33 = vor.u32 %v1765_v30, %v1561_v25  ;;  %v1518_v34 = vor.u32 %v1755_v28, %v1517_v27  ;;  %s1960_s24 = smov 64  }
  0x1b   : > { %667 = vmatpush.bf16.msra.mxu2 %v1574_v29  ;;  %v1505_v35 = vld [vmem:[%s2353_s1 + $0x30] sm:$0xf]  ;;  %v1549_v36 = vld [vmem:[%s2353_s1 + $0x80] sm:$0xf]  ;;  %v1762_v37 = vld [vmem:[%s2353_s1 + $0x88] sm:$0xf0]  ;;  %v1522_v38 = vor.u32 %v1754_v31, %v1519_v32 }
  0x1c   : > { %v1752_v39 = vld [vmem:[%s2353_s1 + $0x38] sm:$0xf0]  ;;  %v1751_v40 = vld [vmem:[%s2353_s1 + $0x34] sm:$0xf]  ;;  %v1507_v41 = vld [vmem:[%s2353_s1 + $0x3c] sm:$0xf0]  ;;  %v1550_v42 = vor.u32 %v1762_v37, %v1549_v36 }
  0x1d   : > { %643 = vmatpush.bf16.msra.mxu0 %v1542_v16  ;;  %v1506_v43 = vor.u32 %v1752_v39, %v1505_v35  ;;  %v1537_v44 = vld [vmem:[%s2353_s1 + $0x68] sm:$0xf]  ;;  %v1759_v45 = vld [vmem:[%s2353_s1 + $0x70] sm:$0xf0]  ;;  %v1510_v46 = vor.u32 %v1751_v40, %v1507_v41  ;;  %v1493_v47 = vld [vmem:[%s2353_s1 + $0x18] sm:$0xf] }
  0x1e   : > { %656 = vmatpush.bf16.msra.mxu1 %v1546_v17  ;;  %v1749_v48 = vld [vmem:[%s2353_s1 + $0x20] sm:$0xf0]  ;;  %v1748_v49 = vld [vmem:[%s2353_s1 + $0x1c] sm:$0xf]  ;;  %v1495_v50 = vld [vmem:[%s2353_s1 + $0x24] sm:$0xf0]  ;;  %v1538_v51 = vor.u32 %v1759_v45, %v1537_v44 }
  0x1f   : > { %668 = vmatpush.bf16.msra.mxu2 %v1562_v33  ;;  %s1477_s22 = sshll.u32 %s2368_s29, 3  ;;  %v1494_v52 = vor.u32 %v1749_v48, %v1493_v47  ;;  %v1525_v53 = vld [vmem:[%s2353_s1 + $0x50] sm:$0xf]  ;;  %v1756_v54 = vld [vmem:[%s2353_s1 + $0x58] sm:$0xf0]  ;;  %v1498_v55 = vor.u32 %v1748_v49, %v1495_v50  ;;  %s1961_s26 = smov 96   ;;  %v681_v33 = vlaneseq }
  0x20   : > { %v1481_v56 = vld [vmem:[%s2353_s1] sm:$0xf]  ;;  %v1746_v57 = vld [vmem:[%s2353_s1 + $0x8] sm:$0xf0]  ;;  %s465_s18 = scalar_lea.vmem %s2352_s0, %s1477_s22  ;;  %v1745_v58 = vld [vmem:[%s2353_s1 + $0x4] sm:$0xf]  ;;  %v1526_v60 = vor.u32 %v1756_v54, %v1525_v53  ;;  %s469_s16 = scalar_lea.vmem %s2365_s13, %s1477_s22 }
  0x21   : > { %644 = vmatpush.bf16.msra.mxu0 %v1530_v22  ;;  %v1483_v59 = vld [vmem:[%s2353_s1 + $0xc] sm:$0xf0]  ;;  %v1482_v61 = vor.u32 %v1746_v57, %v1481_v56  ;;  %v2207_v62 = vld [vmem:[%s465_s18] sm:$0xff]  ;;  %v1513_v63 = vld [vmem:[%s2353_s1 + $0x38] sm:$0xf]  ;;  %s1962_s27 = smov 32  }
  0x22   : > { %657 = vmatpush.bf16.msra.mxu1 %v1534_v26  ;;  %v1753_v0 = vld [vmem:[%s2353_s1 + $0x40] sm:$0xf0]  ;;  %v1486_v1 = vor.u32 %v1745_v58, %v1483_v59  ;;  %v472_v2 = vpack.c.bf16 %v2207_v62, %v2207_v62  ;;  %v1501_v4 = vld [vmem:[%s2353_s1 + $0x20] sm:$0xf]  ;;  %v1750_v5 = vld [vmem:[%s2353_s1 + $0x28] sm:$0xf0] }
  0x23   : > { %669 = vmatpush.bf16.msra.mxu2 %v1550_v42  ;;  %v1514_v3 = vor.u32 %v1753_v0, %v1513_v63  ;;  %v1502_v6 = vor.u32 %v1750_v5, %v1501_v4  ;;  %v1489_v7 = vld [vmem:[%s2353_s1 + $0x8] sm:$0xf]  ;;  %v1747_v8 = vld [vmem:[%s2353_s1 + $0x10] sm:$0xf0]  ;;  %v505_v10 = vld [vmem:[%s2354_s2] sm:$0x7] }
  0x24   : > { %v1490_v9 = vor.u32 %v1747_v8, %v1489_v7  ;;  %v507_v11 = vperm.slane %v505_v10, 0  ;;  %v508_v12 = vperm.slane %v505_v10, 1  ;;  %v509_v24 = vperm.slane %v505_v10, 2 }
  0x25   : > { %645 = vmatpush.bf16.msra.mxu0 %v1518_v34  ;;  %vm726_vm1 = vcmask 1043456   ;;  %v682_v34 = vshrl.u32 %v681_v33, 7  ;;  %v684_v35 = vand.u32 127, %v681_v33  ;;  %vm710_vm3 = vcmask 64512  }
  0x26   : > { %658 = vmatpush.bf16.msra.mxu1 %v1522_v38  ;;  %vm930_vm4 = vcmask 523264   ;;  %vm932_vm5 = vcmask 785408  }
  0x27   : > { %670 = vmatpush.bf16.msra.mxu2 %v1538_v51  ;;  %vm685_vm2 = vcmp.le.s32.totalorder %v684_v35, %v682_v34 }
  0x29   : > { %646 = vmatpush.bf16.msra.mxu0 %v1506_v43 }
  0x2a   : > { %659 = vmatpush.bf16.msra.mxu1 %v1510_v46 }
  0x2b   : > { %671 = vmatpush.bf16.msra.mxu2 %v1526_v60 }
  0x2d   : > { %647 = vmatpush.bf16.msra.mxu0 %v1494_v52 }
  0x2e   : > { %660 = vmatpush.bf16.msra.mxu1 %v1498_v55 }
  0x2f   : > { %672 = vmatpush.bf16.msra.mxu2 %v1514_v3 }
  0x31   : > { %648 = vmatpush.bf16.msra.mxu0 %v1482_v61 }
  0x32   : > { %661 = vmatpush.bf16.msra.mxu1 %v1486_v1 }
  0x33   : > { %673 = vmatpush.bf16.msra.mxu2 %v1502_v6 }
  0x34   : > { %649 = vmatmul.bf16.vlgmr.msra.gmra.mxu0 %v472_v2 }
  0x35   : > { %662 = vmatmul.bf16.vlgmr.msra.gmra.mxu1 %v472_v2 }
  0x37   : > { %674 = vmatpush.bf16.msra.mxu2 %v1490_v9 }
  0x3a   : > { %675 = vmatmul.bf16.vlgmr.msra.gmra.mxu2 %v472_v2 }
  0xb1   : > { %v650_v13 = vpop.f32.mrf.mxu0 }
  0xb2   : > { %v663_v14 = vpop.f32.mrf.mxu1  ;;  %v651_v15 = vadd.f32 %v650_v13, %v507_v11 }
  0xb3   : > { %v664_v16 = vadd.f32 %v663_v14, %v508_v12 }
  0xb4   : > { %v680_v18 = vmul.f32 0.17677669, %v651_v15 }
  0xb5   : > { %v687_v17 = vpack.c.bf16 %v664_v16, %v664_v16 }
  0xb6   : > { %v686_v22 = vpack.c.bf16 %v680_v18, %v680_v18 }
  0xb7   : > { %805 = vrot.lane.b32.xlu2 %v687_v17, %s1960_s24  ;;  %747 = vrot.lane.b32.xlu1 %v687_v17, %s1961_s26  ;;  %v694_v19 = vsel %vm689_vm0, %v687_v17, 0 }
  0xb8   : > { %703 = vmatpush.bf16.xpose.msra.mxu3 %v694_v19 }
  0xb9   : > { %v652_v20 = vpop.f32.mrf.mxu0 }
  0xba   : > { %v665_v21 = vpop.f32.mrf.mxu1 }
  0xbd   : > { %v676_v23 = vpop.f32.mrf.mxu2 }
  0xbe   : > { %v677_v25 = vadd.f32 %v676_v23, %v509_v24 }
  0xbf   : > { %862 = vrot.lane.b32.xlu2 %v687_v17, %s1962_s27  ;;  %744 = vrot.lane.b32.xlu1 %v686_v22, %s1961_s26 }
  0xc0   : > { %1575 = vmatmul.msk.bf16.vlgmr.msra.gmra.mxu3 %vm689_vm0, %v686_v22  ;;  %v2239_v27 = vpack.c.bf16 %v677_v25, %v677_v25 }
  0xc2   : > { %v728_v28 = vsel %vm726_vm1, %v2239_v27, 0 }
  0xc3   : > { %737 = vmatpush.bf16.msrb.mxu3 %v728_v28 }
  0xc5   : > { %v678_v26 = vpop.f32.mrf.mxu2 }
  0xc7   : > { %860 = vrot.lane.b32.xlu1 %v686_v22, %s1962_s27 }
 0x111   : > { %v806_v29 = vpop.permute.xlu2 %805 }
 0x112   : > { %v811_v30 = vsel %vm689_vm0, %v806_v29, 0 }
 0x113   : > { %820 = vmatpush.bf16.xpose.msrb.mxu2 %v811_v30 }
 0x119   : > { %v863_v48 = vpop.permute.xlu2 %862 }
 0x11a   : > { %v868_v50 = vsel %vm689_vm0, %v863_v48, 0  ;;  %v1772_v48 = vld [vmem:[%s2355_s3 + $0x18] sm:$0xff] }
 0x129   : > { %v748_v31 = vpop.permute.xlu1 %747 }
 0x12a   : > { %v753_v32 = vsel %vm689_vm0, %v748_v31, 0 }
 0x12b   : > { %762 = vmatpush.bf16.xpose.msra.mxu3 %v753_v32 }
 0x131   : > { %v745_v52 = vpop.permute.xlu1 %744 }
 0x139   : > { %v861_v53 = vpop.permute.xlu1 %860 }
 0x143   : > { %v705_v36 = vpop.f32.mrf.mxu3 }
 0x144   : > { %v709_v37 = vsel %vm685_vm2, %v705_v36, -1e+30 }
 0x145   : > { %v711_v38 = vsel %vm710_vm3, %v709_v37, -inf }
 0x146   : > { %712 = vmax.xlane.f32.xlu0 %v711_v38 }
 0x14b   : > { %v707_v39 = vpop.f32.mrf.mxu3 }
 0x1b9   : > { %v713_v40 = vpop.xlane.xlu0 %712 }
 0x1ba   : > { %v714_v41 = vsub.f32 %v709_v37, %v713_v40 }
 0x1bc   : > { %v715_v42 = vmul.f32 1.442695, %v714_v41 }
 0x1be   : > { %1852 = vpow2.f32 %v715_v42 }
 0x1c4   : > { %v1853_v43 = vpop.eup %1852 }
 0x1c5   : > { %v717_v44 = vsel %vm710_vm3, %v1853_v43, 0.0 }
 0x1c6   : > { %718 = vadd.xlane.f32.xlu0 %v717_v44  ;;  %v1776_v44 = vld [vmem:[%s2355_s3 + $0x38] sm:$0xff] }
 0x1c7   : > { %1003 = vmatpush.bf16.msrb.mxu1 %v1776_v44 }
 0x1da   : > { %803 = vrot.lane.b32.xlu0 %v686_v22, %s1960_s24 }
 0x239   : > { %v719_v45 = vpop.xlane.xlu0 %718 }
 0x23a   : > { %1854 = vrcp.f32 %v719_v45  ;;  %v1775_v45 = vld [vmem:[%s2355_s3 + $0x30] sm:$0xff] }
 0x23b   : > { %1004 = vmatpush.bf16.msrb.mxu1 %v1775_v45  ;;  %v1635_v45 = vld [vmem:[#allocation2 + $0x28] sm:$0xf0] }
 0x240   : > { %v1855_v46 = vpop.eup %1854 }
 0x241   : > { %v721_v47 = vmul.f32 %v1855_v46, %v1853_v43  ;;  %v1774_v46 = vld [vmem:[%s2355_s3 + $0x28] sm:$0xff] }
 0x242   : > { %1005 = vmatpush.bf16.msrb.mxu1 %v1774_v46 }
 0x243   : > { %v722_v49 = vpack.c.bf16 %v721_v47, %v721_v47  ;;  %v1773_v47 = vld [vmem:[%s2355_s3 + $0x20] sm:$0xff] }
 0x245   : > { %1576 = vmatmul.msk.bf16.vlgmr.msrb.gmra.mxu3 %vm710_vm3, %v722_v49  ;;  %v1771_v49 = vld [vmem:[%s2355_s3 + $0x10] sm:$0xff] }
 0x246   : > { %877 = vmatpush.bf16.xpose.msrb.mxu3 %v868_v50  ;;  %1006 = vmatpush.bf16.msrb.mxu1 %v1773_v47  ;;  %v1770_v50 = vld [vmem:[%s2355_s3 + $0x8] sm:$0xff]  ;;  %v1625_v47 = vld [vmem:[#allocation2 + $0x10] sm:$0xf] }
 0x24a   : > { %1007 = vmatpush.bf16.msrb.mxu1 %v1772_v48  ;;  %v1780_v48 = vld [vmem:[#allocation2 + $0x14] sm:$0xf0] }
 0x24c   : > { %v804_v51 = vpop.permute.xlu0 %803 }
 0x24d   : > { %1579 = vmatmul.msk.bf16.vlgmr.msrb.gmra.mxu2 %vm689_vm0, %v804_v51  ;;  %v1769_v51 = vld [vmem:[%s2355_s3] sm:$0xff] }
 0x24e   : > { %1008 = vmatpush.bf16.msrb.mxu1 %v1771_v49  ;;  %v1779_v49 = vld [vmem:[#allocation2 + $0x14] sm:$0xf] }
 0x252   : > { %1009 = vmatpush.bf16.msrb.mxu1 %v1770_v50  ;;  %v1626_v50 = vor.u32 %v1780_v48, %v1625_v47 }
 0x255   : > { %1577 = vmatmul.msk.bf16.vlgmr.msra.gmra.mxu3 %vm689_vm0, %v745_v52 }
 0x256   : > { %1010 = vmatpush.bf16.msrb.mxu1 %v1769_v51  ;;  %v1627_v51 = vld [vmem:[#allocation2 + $0x18] sm:$0xf0] }
 0x265   : > { %1581 = vmatmul.msk.bf16.vlgmr.msrb.gmra.mxu3 %vm689_vm0, %v861_v53 }
 0x2c8   : > { %v2254_v54 = vpop.f32.mrf.mxu3 }
 0x2d0   : > { %v741_v55 = vpop.f32.mrf.mxu3  ;;  %v822_v56 = vpop.f32.mrf.mxu2 }
 0x2d1   : > { %v826_v57 = vsel %vm685_vm2, %v822_v56, -1e+30 }
 0x2d2   : > { %v827_v58 = vsel %vm710_vm3, %v826_v57, -inf }
 0x2d3   : > { %828 = vmax.xlane.f32.xlu1 %v827_v58 }
 0x2d8   : > { %v764_v59 = vpop.f32.mrf.mxu3  ;;  %v824_v60 = vpop.f32.mrf.mxu2 }
 0x2d9   : > { %v768_v61 = vsel %vm685_vm2, %v764_v59, -1e+30  ;;  %v1846_v60 = vld [vmem:[%s2356_s4] ss:$0 sm:$0xff] }
 0x2da   : > { %v769_v63 = vsel %vm710_vm3, %v768_v61, -inf }
 0x2db   : > { %770 = vmax.xlane.f32.xlu2 %v769_v63 }
 0x2e0   : > { %v766_v0 = vpop.f32.mrf.mxu3 }
 0x2e8   : > { %v879_v1 = vpop.f32.mrf.mxu3 }
 0x2e9   : > { %v883_v2 = vsel %vm685_vm2, %v879_v1, -1e+30 }
 0x2ea   : > { %v884_v3 = vsel %vm710_vm3, %v883_v2, -inf }
 0x2eb   : > { %885 = vmax.xlane.f32.xlu0 %v884_v3  ;;  %v1673_v3 = vld [vmem:[#allocation2 + $0x70] sm:$0xf] }
 0x2f0   : > { %v881_v4 = vpop.f32.mrf.mxu3 }
 0x2f1   : > { %v1792_v4 = vld [vmem:[#allocation2 + $0x74] sm:$0xf0] }
 0x2ff   : > { %839 = vrot.lane.b32.xlu0 %v2239_v27, %s1960_s24 }
 0x346   : > { %v829_v5 = vpop.xlane.xlu1 %828 }
 0x347   : > { %v830_v6 = vsub.f32 %v826_v57, %v829_v5  ;;  %v1674_v5 = vor.u32 %v1792_v4, %v1673_v3 }
 0x349   : > { %v831_v7 = vmul.f32 1.442695, %v830_v6  ;;  %v1675_v6 = vld [vmem:[#allocation2 + $0x78] sm:$0xf0] }
 0x34b   : > { %1856 = vpow2.f32 %v831_v7 }
 0x34e   : > { %v771_v8 = vpop.xlane.xlu2 %770 }
 0x34f   : > { %v772_v9 = vsub.f32 %v768_v61, %v771_v8 }
 0x351   : > { %v1857_v10 = vpop.eup %1856  ;;  %v773_v11 = vmul.f32 1.442695, %v772_v9 }
 0x352   : > { %v833_v12 = vsel %vm710_vm3, %v1857_v10, 0.0 }
 0x353   : > { %1858 = vpow2.f32 %v773_v11  ;;  %834 = vadd.xlane.f32.xlu1 %v833_v12 }
 0x359   : > { %v1859_v13 = vpop.eup %1858 }
 0x35a   : > { %v775_v14 = vsel %vm710_vm3, %v1859_v13, 0.0 }
 0x35b   : > { %776 = vadd.xlane.f32.xlu2 %v775_v14 }
 0x35e   : > { %v886_v15 = vpop.xlane.xlu0 %885 }
 0x35f   : > { %v887_v16 = vsub.f32 %v883_v2, %v886_v15  ;;  %v1963_v2 = vmov 128.0  }
 0x361   : > { %v888_v17 = vmul.f32 1.442695, %v887_v16 }
 0x363   : > { %1860 = vpow2.f32 %v888_v17  ;;  %v1665_v17 = vld [vmem:[#allocation2 + $0x60] sm:$0xf] }
 0x369   : > { %v1861_v18 = vpop.eup %1860 }
 0x36a   : > { %v890_v19 = vsel %vm710_vm3, %v1861_v18, 0.0 }
 0x36b   : > { %891 = vadd.xlane.f32.xlu1 %v890_v19  ;;  %v1789_v19 = vld [vmem:[#allocation2 + $0x64] sm:$0xf] }
 0x371   : > { %v840_v20 = vpop.permute.xlu0 %839 }
 0x372   : > { %v845_v21 = vsel %vm726_vm1, %v840_v20, 0 }
 0x373   : > { %782 = vrot.lane.b32.xlu2 %v2239_v27, %s1961_s26  ;;  %854 = vmatpush.bf16.msra.mxu2 %v845_v21  ;;  %v1667_v21 = vld [vmem:[#allocation2 + $0x68] sm:$0xf0] }
 0x377   : > { %1157 = vmatpush.bf16.msrb.mxu2 %v1674_v5 }
 0x384   : > { %896 = vrot.lane.b32.xlu1 %v2239_v27, %s1962_s27 }
 0x3c6   : > { %v835_v22 = vpop.xlane.xlu1 %834 }
 0x3c7   : > { %1862 = vrcp.f32 %v835_v22  ;;  %v1670_v22 = vor.u32 %v1789_v19, %v1667_v21  ;;  %v1805_v19 = vld [vmem:[#allocation4 + $0x60] sm:$0xff]  ;;  %v1804_v21 = vld [vmem:[#allocation4 + $0x58] sm:$0xff] }
 0x3cd   : > { %v1863_v23 = vpop.eup %1862 }
 0x3ce   : > { %v837_v24 = vmul.f32 %v1863_v23, %v1857_v10  ;;  %v777_v25 = vpop.xlane.xlu2 %776  ;;  %v1657_v23 = vld [vmem:[#allocation2 + $0x50] sm:$0xf] }
 0x3cf   : > { %1864 = vrcp.f32 %v777_v25  ;;  %v1787_v25 = vld [vmem:[#allocation2 + $0x54] sm:$0xf] }
 0x3d0   : > { %v838_v26 = vpack.c.bf16 %v837_v24, %v837_v24  ;;  %v1788_v24 = vld [vmem:[#allocation2 + $0x54] sm:$0xf0] }
 0x3d2   : > { %1580 = vmatmul.msk.bf16.vlgmr.msra.gmra.mxu2 %vm710_vm3, %v838_v26  ;;  %v1658_v26 = vor.u32 %v1788_v24, %v1657_v23  ;;  %v1803_v23 = vld [vmem:[#allocation4 + $0x50] sm:$0xff]  ;;  %v1794_v24 = vld [vmem:[#allocation4 + $0x8] sm:$0xff] }
 0x3d5   : > { %v1865_v28 = vpop.eup %1864 }
 0x3d6   : > { %v779_v29 = vmul.f32 %v1865_v28, %v1859_v13  ;;  %v783_v30 = vpop.permute.xlu2 %782  ;;  %v1659_v28 = vld [vmem:[#allocation2 + $0x58] sm:$0xf0] }
 0x3d7   : > { %v788_v31 = vsel %vm726_vm1, %v783_v30, 0  ;;  %v1649_v30 = vld [vmem:[#allocation2 + $0x40] sm:$0xf] }
 0x3d8   : > { %797 = vmatpush.bf16.msrb.mxu0 %v788_v31  ;;  %v780_v32 = vpack.c.bf16 %v779_v29, %v779_v29  ;;  %v1662_v29 = vor.u32 %v1787_v25, %v1659_v28  ;;  %v1786_v31 = vld [vmem:[#allocation2 + $0x44] sm:$0xf0]  ;;  %v1801_v28 = vld [vmem:[#allocation4 + $0x40] sm:$0xff] }
 0x3d9   : > { %v1802_v25 = vld [vmem:[#allocation4 + $0x48] sm:$0xff] }
 0x3db   : > { %1578 = vmatmul.msk.bf16.vlgmr.msrb.gmra.mxu0 %vm710_vm3, %v780_v32  ;;  %v1785_v32 = vld [vmem:[#allocation2 + $0x44] sm:$0xf] }
 0x3de   : > { %v892_v33 = vpop.xlane.xlu1 %891 }
 0x3df   : > { %1866 = vrcp.f32 %v892_v33  ;;  %v1650_v33 = vor.u32 %v1786_v31, %v1649_v30 }
 0x3e0   : > { %1868 = vrcp.f32 %v1963_v2 }
 0x3e5   : > { %v1867_v27 = vpop.eup %1866 }
 0x3e6   : > { %v894_v34 = vmul.f32 %v1867_v27, %v1861_v18  ;;  %v1869_v8 = vpop.eup %1868  ;;  %v1790_v18 = vld [vmem:[#allocation2 + $0x64] sm:$0xf0]  ;;  %v1651_v27 = vld [vmem:[#allocation2 + $0x48] sm:$0xf0] }
 0x3e7   : > { %v1022_v9 = vmul.f32 128.0, %v1869_v8  ;;  %vm1026_vm6 = vweird.f32 %v1869_v8  ;;  %v1666_v20 = vor.u32 %v1790_v18, %v1665_v17  ;;  %v1798_v17 = vld [vmem:[#allocation4 + $0x28] sm:$0xff] }
 0x3e8   : > { %v895_v37 = vpack.c.bf16 %v894_v34, %v894_v34  ;;  %v1654_v34 = vor.u32 %v1785_v32, %v1651_v27  ;;  %v1806_v18 = vld [vmem:[#allocation4 + $0x68] sm:$0xff] }
 0x3e9   : > { %v1023_v10 = vsub.f32 1.0, %v1022_v9  ;;  %1158 = vmatpush.bf16.msrb.mxu2 %v1666_v20  ;;  %v1796_v20 = vld [vmem:[#allocation4 + $0x18] sm:$0xff] }
 0x3eb   : > { %v1024_v11 = vmul.f32 %v1869_v8, %v1023_v10  ;;  %v1848_v10 = vld [vmem:[%s2358_s6] ss:$0 sm:$0xff] }
 0x3ed   : > { %v1025_v12 = vadd.f32 %v1869_v8, %v1024_v11  ;;  %1159 = vmatpush.bf16.msrb.mxu2 %v1658_v26  ;;  %v1793_v26 = vld [vmem:[#allocation4] sm:$0xff] }
 0x3ef   : > { %v2310_v13 = vsel %vm1026_vm6, %v1869_v8, %v1025_v12 }
 0x3f1   : > { %1160 = vmatpush.bf16.msrb.mxu2 %v1650_v33 }
 0x3f6   : > { %v897_v35 = vpop.permute.xlu1 %896 }
 0x3f7   : > { %v902_v36 = vsel %vm726_vm1, %v897_v35, 0  ;;  %v1641_v35 = vld [vmem:[#allocation2 + $0x30] sm:$0xf] }
 0x3f8   : > { %911 = vmatpush.bf16.msra.mxu0 %v902_v36  ;;  %v1784_v36 = vld [vmem:[#allocation2 + $0x34] sm:$0xf0] }
 0x3fb   : > { %1582 = vmatmul.msk.bf16.vlgmr.msra.gmra.mxu0 %vm710_vm3, %v895_v37  ;;  %v1783_v37 = vld [vmem:[#allocation2 + $0x34] sm:$0xf] }
 0x455   : > { %v856_v38 = vpop.f32.mrf.mxu2 }
 0x458   : > { %v799_v39 = vpop.f32.mrf.mxu0 }
 0x459   : > { %918 = vrot.lane.b32.xlu2 %v799_v39, %s1962_s27  ;;  %v1643_v39 = vld [vmem:[#allocation2 + $0x38] sm:$0xf0] }
 0x45d   : > { %v858_v40 = vpop.f32.mrf.mxu2 }
 0x45e   : > { %v1646_v40 = vor.u32 %v1783_v37, %v1643_v39 }
 0x460   : > { %v801_v41 = vpop.f32.mrf.mxu0 }
 0x461   : > { %922 = vrot.lane.b32.xlu2 %v856_v38, %s1960_s24  ;;  %v1642_v38 = vor.u32 %v1784_v36, %v1641_v35  ;;  %v1633_v41 = vld [vmem:[#allocation2 + $0x20] sm:$0xf] }
 0x463   : > { %1161 = vmatpush.bf16.msrb.mxu2 %v1642_v38 }
 0x478   : > { %v913_v42 = vpop.f32.mrf.mxu0 }
 0x479   : > { %926 = vrot.lane.b32.xlu0 %v913_v42, %s1961_s26  ;;  %v1782_v42 = vld [vmem:[#allocation2 + $0x24] sm:$0xf0] }
 0x47a   : > { %v1634_v44 = vor.u32 %v1782_v42, %v1633_v41 }
 0x47c   : > { %1162 = vmatpush.bf16.msrb.mxu2 %v1634_v44 }
 0x480   : > { %v915_v43 = vpop.f32.mrf.mxu0  ;;  %1163 = vmatpush.bf16.msrb.mxu2 %v1626_v50 }
 0x481   : > { %v1781_v43 = vld [vmem:[#allocation2 + $0x24] sm:$0xf] }
 0x482   : > { %v1638_v46 = vor.u32 %v1781_v43, %v1635_v45 }
 0x4b3   : > { %v919_v52 = vpop.permute.xlu2 %918 }
 0x4b4   : > { %v929_v55 = vsel %vm689_vm0, %v2254_v54, %v919_v52  ;;  %v1791_v54 = vld [vmem:[#allocation2 + $0x74] sm:$0xf]  ;;  %v1617_v52 = vld [vmem:[#allocation2] sm:$0xf] }
 0x4b5   : > { %v1678_v7 = vor.u32 %v1791_v54, %v1675_v6 }
 0x4b7   : > { %1170 = vmatpush.bf16.msra.mxu3 %v1678_v7  ;;  %v1847_v7 = vld [vmem:[%s2357_s5] ss:$0 sm:$0xff] }
 0x4bb   : > { %v923_v53 = vpop.permute.xlu2 %922  ;;  %1171 = vmatpush.bf16.msra.mxu3 %v1670_v22  ;;  %v1795_v22 = vld [vmem:[#allocation4 + $0x10] sm:$0xff] }
 0x4bc   : > { %v931_v56 = vsel %vm930_vm4, %v929_v55, %v923_v53  ;;  %v1778_v53 = vld [vmem:[#allocation2 + $0x4] sm:$0xf0]  ;;  %v1630_v55 = vor.u32 %v1779_v49, %v1627_v51 }
 0x4bf   : > { %1172 = vmatpush.bf16.msra.mxu3 %v1662_v29  ;;  %v1071_v29 = vld [vmem:[%s2360_s8] sm:$0x3] }
 0x4c0   : > { %v1073_v30 = vperm.slane %v1071_v29, 0  ;;  %v1074_v31 = vperm.slane %v1071_v29, 1 }
 0x4c3   : > { %1173 = vmatpush.bf16.msra.mxu3 %v1654_v34 }
 0x4c7   : > { %1174 = vmatpush.bf16.msra.mxu3 %v1646_v40 }
 0x4cb   : > { %1175 = vmatpush.bf16.msra.mxu3 %v1638_v46 }
 0x4cf   : > { %1176 = vmatpush.bf16.msra.mxu3 %v1630_v55 }
 0x4eb   : > { %v927_v57 = vpop.permute.xlu0 %926 }
 0x4ec   : > { %v933_v58 = vsel %vm932_vm5, %v931_v56, %v927_v57  ;;  %v1777_v56 = vld [vmem:[#allocation2 + $0x4] sm:$0xf]  ;;  %v1619_v57 = vld [vmem:[#allocation2 + $0x8] sm:$0xf0] }
 0x4ed   : > { %v934_v59 = vpack.c.bf16 %v933_v58, %v933_v58  ;;  %v1618_v58 = vor.u32 %v1778_v53, %v1617_v52 }
 0x4ef   : > { %1011 = vmatmul.bf16.vlgmr.msrb.gmra.mxu1 %v934_v59  ;;  %v1622_v59 = vor.u32 %v1777_v56, %v1619_v57  ;;  %1164 = vmatpush.bf16.msrb.mxu2 %v1618_v58  ;;  %v1849_v58 = vld [vmem:[%s2362_s10] ss:$0 sm:$0xff] }
 0x4f1   : > { %1177 = vmatpush.bf16.msra.mxu3 %v1622_v59 }
 0x56c   : > { %v1012_v61 = vpop.f32.mrf.mxu1 }
 0x56d   : > { %v1013_v63 = vadd.f32 %v1846_v60, %v1012_v61  ;;  %v1800_v60 = vld [vmem:[#allocation4 + $0x38] sm:$0xff] }
 0x56e   : > { %v1808_v61 = vld [vmem:[#allocation4 + $0x78] sm:$0xff]  ;;  %1335 = vmatpush.bf16.msrb.mxu0 %v1800_v60 }
 0x56f   : > { %v1016_v0 = vadd.f32 %v1013_v63, %v2207_v62  ;;  %1348 = vmatpush.bf16.msra.mxu1 %v1808_v61 }
 0x571   : > { %1019 = vadd.xlane.f32.xlu2 %v1016_v0 }
 0x574   : > { %v1014_v1 = vpop.f32.mrf.mxu1 }
 0x5e4   : > { %v1020_v62 = vpop.xlane.xlu2 %1019 }
 0x5e5   : > { %v1028_v14 = vmul.f32 %v2310_v13, %v1020_v62 }
 0x5e7   : > { %v2313_v15 = vsub.f32 %v1016_v0, %v1028_v14  ;;  %v1799_v14 = vld [vmem:[#allocation4 + $0x30] sm:$0xff] }
 0x5e8   : > { %1336 = vmatpush.bf16.msrb.mxu0 %v1799_v14 }
 0x5e9   : > { %v1030_v16 = vmul.f32 %v2313_v15, %v2313_v15 }
 0x5eb   : > { %1031 = vadd.xlane.f32.xlu0 %v1030_v16  ;;  %v1807_v16 = vld [vmem:[#allocation4 + $0x70] sm:$0xff] }
 0x5ec   : > { %1349 = vmatpush.bf16.msra.mxu1 %v1807_v16  ;;  %1337 = vmatpush.bf16.msrb.mxu0 %v1798_v17  ;;  %v1850_v16 = vld [vmem:[%s2363_s11] ss:$0 sm:$0xff] }
 0x5f0   : > { %1350 = vmatpush.bf16.msra.mxu1 %v1806_v18 }
 0x5f4   : > { %1351 = vmatpush.bf16.msra.mxu1 %v1805_v19 }
 0x5f8   : > { %1352 = vmatpush.bf16.msra.mxu1 %v1804_v21 }
 0x5fc   : > { %1353 = vmatpush.bf16.msra.mxu1 %v1803_v23 }
 0x600   : > { %1354 = vmatpush.bf16.msra.mxu1 %v1802_v25 }
 0x604   : > { %1355 = vmatpush.bf16.msra.mxu1 %v1801_v28 }
 0x65e   : > { %v1032_v63 = vpop.xlane.xlu0 %1031 }
 0x65f   : > { %v1033_v0 = vmul.f32 %v1032_v63, %v2310_v13 }
 0x661   : > { %v1034_v1 = vadd.f32 1e-05, %v1033_v0 }
 0x663   : > { %1870 = vrsqrt.f32 %v1034_v1  ;;  %vm1041_vm8 = vweird.f32 %v1034_v1 }
 0x669   : > { %v1871_v2 = vpop.eup %1870 }
 0x66a   : > { %v1036_v3 = vmul.f32 %v1871_v2, %v1034_v1  ;;  %vm1042_vm7 = vweird.f32 %v1871_v2 }
 0x66b   : > { %vm1043_vm9 = vmor %vm1041_vm8, %vm1042_vm7 }
 0x66c   : > { %v1037_v4 = vmul.f32 %v1871_v2, %v1036_v3 }
 0x66e   : > { %v1038_v54 = vmul.f32 0.5, %v1037_v4 }
 0x670   : > { %v1039_v5 = vsub.f32 1.5, %v1038_v54 }
 0x672   : > { %v1040_v6 = vmul.f32 %v1871_v2, %v1039_v5 }
 0x674   : > { %v1044_v8 = vsel %vm1043_vm9, %v1871_v2, %v1040_v6 }
 0x675   : > { %v1045_v9 = vmul.f32 %v1044_v8, %v2313_v15  ;;  %v1797_v15 = vld [vmem:[#allocation4 + $0x20] sm:$0xff] }
 0x676   : > { %1338 = vmatpush.bf16.msrb.mxu0 %v1797_v15 }
 0x677   : > { %v1049_v11 = vmul.f32 %v1847_v7, %v1045_v9 }
 0x679   : > { %v2325_v12 = vadd.f32 %v1848_v10, %v1049_v11 }
 0x67a   : > { %1339 = vmatpush.bf16.msrb.mxu0 %v1796_v20 }
 0x67b   : > { %v1054_v62 = vpack.c.bf16 %v2325_v12, %v2325_v12 }
 0x67d   : > { %1165 = vmatmul.bf16.vlgmr.msrb.gmra.mxu2 %v1054_v62  ;;  %1178 = vmatmul.bf16.vlgmr.msra.gmra.mxu3 %v1054_v62 }
 0x67e   : > { %1340 = vmatpush.bf16.msrb.mxu0 %v1795_v22 }
 0x682   : > { %1341 = vmatpush.bf16.msrb.mxu0 %v1794_v24 }
 0x686   : > { %1342 = vmatpush.bf16.msrb.mxu0 %v1793_v26 }
 0x700   : > { %v1166_v32 = vpop.f32.mrf.mxu2  ;;  %v1179_v33 = vpop.f32.mrf.mxu3 }
 0x701   : > { %v1167_v27 = vadd.f32 %v1166_v32, %v1073_v30  ;;  %v1180_v34 = vadd.f32 %v1179_v33, %v1074_v31 }
 0x703   : > { %v1183_v35 = vmul.f32 %v1167_v27, %v1167_v27  ;;  %v1184_v36 = vmul.f32 %v1180_v34, %v1180_v34 }
 0x705   : > { %v1185_v37 = vmul.f32 %v1183_v35, %v1167_v27  ;;  %v1186_v38 = vmul.f32 %v1184_v36, %v1180_v34 }
 0x707   : > { %v1187_v39 = vmul.f32 0.044715, %v1185_v37  ;;  %v1188_v40 = vmul.f32 0.044715, %v1186_v38 }
 0x708   : > { %v1168_v41 = vpop.f32.mrf.mxu2  ;;  %v1181_v42 = vpop.f32.mrf.mxu3 }
 0x709   : > { %v1189_v43 = vadd.f32 %v1187_v39, %v1167_v27  ;;  %v1190_v44 = vadd.f32 %v1188_v40, %v1180_v34 }
 0x70b   : > { %v1191_v45 = vmul.f32 0.7978846, %v1189_v43  ;;  %v1192_v46 = vmul.f32 0.7978846, %v1190_v44 }
 0x70d   : > { %1872 = vtanh.f32 %v1191_v45 }
 0x70e   : > { %1874 = vtanh.f32 %v1192_v46 }
 0x713   : > { %v1873_v47 = vpop.eup %1872 }
 0x714   : > { %v1875_v48 = vpop.eup %1874  ;;  %v1195_v49 = vadd.f32 1.0, %v1873_v47 }
 0x715   : > { %v1196_v50 = vadd.f32 1.0, %v1875_v48 }
 0x716   : > { %v1197_v51 = vmul.f32 0.5, %v1195_v49 }
 0x717   : > { %v1198_v52 = vmul.f32 0.5, %v1196_v50 }
 0x718   : > { %v1199_v53 = vmul.f32 %v1197_v51, %v1167_v27 }
 0x719   : > { %v1200_v55 = vmul.f32 %v1198_v52, %v1180_v34 }
 0x71a   : > { %v1201_v56 = vpack.c.bf16 %v1199_v53, %v1199_v53 }
 0x71b   : > { %v1202_v57 = vpack.c.bf16 %v1200_v55, %v1200_v55 }
 0x71c   : > { %1343 = vmatmul.bf16.vlgmr.msrb.gmra.mxu0 %v1201_v56 }
 0x71d   : > { %1356 = vmatmul.bf16.vlgmr.msra.gmra.mxu1 %v1202_v57 }
 0x799   : > { %v1344_v59 = vpop.f32.mrf.mxu0 }
 0x79a   : > { %v1345_v60 = vadd.f32 %v1849_v58, %v1344_v59  ;;  %v1357_v61 = vpop.f32.mrf.mxu1 }
 0x79c   : > { %v1358_v63 = vadd.f32 %v1357_v61, %v1345_v60 }
 0x79e   : > { %v1361_v0 = vadd.f32 %v1358_v63, %v2325_v12 }
 0x7a0   : > { %1364 = vadd.xlane.f32.xlu1 %v1361_v0 }
 0x7a1   : > { %v1346_v1 = vpop.f32.mrf.mxu0 }
 0x7a2   : > { %v1359_v2 = vpop.f32.mrf.mxu1 }
 0x813   : > { %v1365_v3 = vpop.xlane.xlu1 %1364 }
 0x814   : > { %v1366_v4 = vmul.f32 %v1365_v3, %v2310_v13 }
 0x816   : > { %v1367_v54 = vsub.f32 %v1361_v0, %v1366_v4 }
 0x818   : > { %v1368_v5 = vmul.f32 %v1367_v54, %v1367_v54 }
 0x81a   : > { %1369 = vadd.xlane.f32.xlu2 %v1368_v5 }
 0x88d   : > { %v1370_v6 = vpop.xlane.xlu2 %1369 }
 0x88e   : > { %v1371_v7 = vmul.f32 %v1370_v6, %v2310_v13  ;;  %v1851_v13 = vld [vmem:[%s2364_s12] ss:$0 sm:$0xff] }
 0x890   : > { %v1372_v8 = vadd.f32 1e-05, %v1371_v7 }
 0x892   : > { %1876 = vrsqrt.f32 %v1372_v8  ;;  %vm1379_vm11 = vweird.f32 %v1372_v8 }
 0x898   : > { %v1877_v9 = vpop.eup %1876 }
 0x899   : > { %v1374_v10 = vmul.f32 %v1877_v9, %v1372_v8  ;;  %vm1380_vm10 = vweird.f32 %v1877_v9 }
 0x89a   : > { %vm1381_vm12 = vmor %vm1379_vm11, %vm1380_vm10 }
 0x89b   : > { %v1375_v11 = vmul.f32 %v1877_v9, %v1374_v10 }
 0x89d   : > { %v1376_v62 = vmul.f32 0.5, %v1375_v11 }
 0x89f   : > { %v1377_v12 = vsub.f32 1.5, %v1376_v62 }
 0x8a1   : > { %v1378_v14 = vmul.f32 %v1877_v9, %v1377_v12 }
 0x8a3   : > { %v1382_v17 = vsel %vm1381_vm12, %v1877_v9, %v1378_v14 }
 0x8a4   : > { %v1383_v18 = vmul.f32 %v1382_v17, %v1367_v54 }
 0x8a6   : > { %v1387_v15 = vmul.f32 %v1850_v16, %v1383_v18 }
 0x8a8   : > { %v1391_v19 = vadd.f32 %v1851_v13, %v1387_v15 }
 0x8aa   : > { %1392 = vst [vmem:[%s469_s16] sm:$0xff] %v1391_v19 }
 0x8ab PF: > { %s25_s25 = sadd.s32 1, %s1952_s25  }
 0x8ac   : > { %p22_p7 = scmp.ge.s32.totalorder %s25_s25, 4  }
 0x8ae   :  { %24 = sbr.rel (!%p22_p7) target bundleno = 2 (0x2), region = 111 }
 0x8b3   :  { %1412 = vsyncpa [#allocation3], 1 }
 0x8b4   :  { %1414 = vsyncpa [#allocation3 + $0x1], 1 }
 0x8b5   :  { %1415 = vsyncpa [#allocation5], 1 }

</bundles_post_ra>
